<compile_context>
chip_gen: v7x
topology: tpu7x:2x2x1
jax: 0.10.0
libtpu: 0.0.40
codegen_flags: <defaults>
</compile_context>

<pallas_src>
import jax
import jax.numpy as jnp
from jax import lax
from jax.experimental import pallas as pl
from jax.experimental.pallas import tpu as pltpu

# ---------------- model dims (small, consistent with the module) -------------
B, T, D = 2, 8, 32
LORA = 8
HEADS = 4
DH = D // HEADS
BLOCK_ID, N_BLOCKS = 1, 4


# ------------------------------- Pallas kernel -------------------------------
def block_kernel(x_ref, vecs_ref, hln_ref, lam_ref, acat_ref, bblk_ref,
                 wrkvg_ref, wocrk_ref, wcmv_ref, uexp_ref, s0_ref,
                 asel3_ref, gmask3_ref, hselb_ref, p2_ref, p2t_ref,
                 out_ref, state_ref):
    rows, dim = x_ref.shape[1], x_ref.shape[2]      # (bc*T, D)
    dh, bcd = s0_ref.shape                          # (dh, bc*D)
    bc = bcd // dim
    t_len = rows // bc
    tdh = t_len * dh
    L = acat_ref.shape[1] // 5
    bch = p2_ref.shape[1] // 2                      # bc * n_heads
    f32, bf16 = jnp.float32, jnp.bfloat16

    x = x_ref[0]                                    # (bc*T, D)

    def row(i):
        return vecs_ref[i:i + 1, :]                 # (1, D)

    def mm(a, b):
        # bf16 operands, f32 accumulation -> one MXU pass (perf-review rec #2).
        return jnp.dot(a.astype(bf16), b.astype(bf16), preferred_element_type=f32)

    def mm_f32(a, b):
        # precision-critical dots (per-head LN statistics) stay full f32.
        return jnp.dot(a, b, precision=lax.Precision.HIGHEST,
                       preferred_element_type=f32)

    def sigmoid(z):
        # 0.5*(tanh(z/2)+1): EUP tanh, no f32 divide.
        return 0.5 * (jnp.tanh(0.5 * z) + 1.0)

    def layernorm(h, w, b):
        mu = jnp.mean(h, axis=-1, keepdims=True)
        var = jnp.mean(jnp.square(h - mu), axis=-1, keepdims=True)
        return (h - mu) * lax.rsqrt(var + 1e-5) * w + b

    # token shift (ZeroPad2d((0,0,1,-1))): xx[t] = h[t-1], xx[0] = 0 per sequence.
    first_row = (lax.broadcasted_iota(jnp.int32, (rows, 1), 0) % t_len) == 0

    def shift(h):
        return jnp.where(first_row, 0.0, pltpu.roll(h, shift=1, axis=0))

    def batch_lanes(m):                             # (bc*T, D) -> (T, bc*D)
        return jnp.concatenate([m[b * t_len:(b + 1) * t_len, :] for b in range(bc)],
                               axis=1)

    def unbatch_lanes(m):                           # (T, bc*D) -> (bc*T, D)
        return jnp.concatenate([m[:, b * dim:(b + 1) * dim] for b in range(bc)],
                               axis=0)

    # -------------------- time mixing (on ln1(x)) --------------------
    h1 = layernorm(x, row(0), row(1))
    xxx = shift(h1) - h1
    lerpx = h1 + xxx * row(4)                       # x_weight

    # five LoRAs fused: one (rows,5L) first stage + one block-diag second stage.
    lora_all = lam_ref[...] + mm(jnp.tanh(mm(lerpx, acat_ref[...])), bblk_ref[...])
    lora_rkvg = lora_all[:, :4 * dim]               # (rows, 4D)  r|k|v|g lambdas
    lora_d = lora_all[:, 4 * dim:]                  # (rows, D)

    # fused r/k/v/g projections: one (rows,4D)@(4D,4D) block-diag matmul.
    h1c = jnp.concatenate([h1, h1, h1, h1], axis=1)
    xxc = jnp.concatenate([xxx, xxx, xxx, xxx], axis=1)
    rkvg = mm(h1c + xxc * lora_rkvg, wrkvg_ref[...])
    r = rkvg[:, 0 * dim:1 * dim]
    k = rkvg[:, 1 * dim:2 * dim]
    v = rkvg[:, 2 * dim:3 * dim]
    g = rkvg[:, 3 * dim:4 * dim]

    # decay w = exp(-exp(d_lora(h1 + xxx * d_lora(lerpx))))   (LoRA weights ~1e-3,
    # bf16 error here is negligible relative to the f32 lambda).
    a_d = acat_ref[:, 4 * L:]                       # (D, L)
    b_d = bblk_ref[4 * L:, 4 * dim:]                # (L, D)
    d_mix = h1 + xxx * lora_d
    w = jnp.exp(-jnp.exp(lam_ref[:, 4 * dim:] + mm(jnp.tanh(mm(d_mix, a_d)), b_d)))

    # ---- fused expand of [r ; k ; w] into the per-head (T*dh, bc*D) layout ----
    # (perf-review rec #3: one selection-matmul chain per batch instead of three)
    e_parts = []
    for b in range(bc):
        m3_b = jnp.concatenate([r[b * t_len:(b + 1) * t_len, :],
                                k[b * t_len:(b + 1) * t_len, :],
                                w[b * t_len:(b + 1) * t_len, :]], axis=0)   # (3T, D)
        e_parts.append(
            mm(mm(asel3_ref[...], m3_b) * gmask3_ref[...], hselb_ref[...]))
    e3 = jnp.concatenate(e_parts, axis=1)           # (3*T*dh, bc*D): [r | k | w] row blocks

    # -------------- WKV recurrence on a flat 2-D (dh, bc*D) state --------------
    v_l = batch_lanes(v)                            # (T, bc*D)
    u_e = uexp_ref[...]                             # (dh, bc*D)
    state = s0_ref[...]                             # (dh, bc*D)

    # TODO(synk): T is small & static here; for long sequences move this to a
    # lax.fori_loop with the state carried in a VMEM scratch.
    wkv_rows = []
    for t in range(t_len):
        rt = e3[t * dh:(t + 1) * dh, :]
        kt = e3[tdh + t * dh:tdh + (t + 1) * dh, :]
        wt = e3[2 * tdh + t * dh:2 * tdh + (t + 1) * dh, :]
        kv = kt * v_l[t:t + 1, :]
        wkv_rows.append(jnp.sum(rt * (state + u_e * kv), axis=0, keepdims=True))
        state = wt * state + kv
    owkv = jnp.concatenate(wkv_rows, axis=0)        # (T, bc*D), kept in registers

    # ---- per-head LayerNorm via one-hot head pooling (perf-review rec #4) ----
    inv_dh = 1.0 / dh
    cat = jnp.concatenate([owkv, owkv * owkv], axis=1)          # (T, 2*bcd)
    stats = mm_f32(cat, p2_ref[...]) * inv_dh                   # (T, 2*bch)
    mu_h = stats[:, :bch]
    var_h = jnp.maximum(stats[:, bch:] - mu_h * mu_h, 0.0)      # clamp: cancellation guard
    bcast = mm_f32(jnp.concatenate([mu_h, var_h], axis=1), p2t_ref[...])  # (T, 2*bcd)
    mu = bcast[:, :bcd]
    var = bcast[:, bcd:]
    owkv_n = (owkv - mu) * lax.rsqrt(var + 1e-5) * hln_ref[0:1, :] + hln_ref[1:2, :]

    gl = batch_lanes(g)
    o = (gl * sigmoid(gl)) * owkv_n                 # SiLU gate
    o_rows = unbatch_lanes(o)                       # (rows, D)

    # ------ fused o_proj + channel-mix r/k projections (perf-review rec #7) ------
    h2 = layernorm(x, row(2), row(3))
    xxx2 = shift(h2) - h2
    ocrk = jnp.concatenate([o_rows, h2 + xxx2 * row(5), h2 + xxx2 * row(6)], axis=1)
    prj = mm(ocrk, wocrk_ref[...])                  # (rows, 6D) = x1 | r_cm | k_cm
    x1 = prj[:, :dim]
    r_cm = prj[:, dim:2 * dim]
    kk = jnp.square(jnp.maximum(prj[:, 2 * dim:], 0.0))
    v_cm = mm(kk, wcmv_ref[...])
    cm_out = sigmoid(r_cm) * v_cm

    # natural-layout stores; relayout / reshape happens in the wrapper (rec #6).
    out_ref[0] = x1 + x + cm_out                    # (bc*T, D)
    state_ref[0] = state                            # (dh, bc*D)


# ------------------------------- wrapper --------------------------------
def _blkdiag(blocks):
    rtot = sum(bl.shape[0] for bl in blocks)
    ctot = sum(bl.shape[1] for bl in blocks)
    out = jnp.zeros((rtot, ctot), jnp.float32)
    r = c = 0
    for bl in blocks:
        out = out.at[r:r + bl.shape[0], c:c + bl.shape[1]].set(bl.astype(jnp.float32))
        r += bl.shape[0]
        c += bl.shape[1]
    return out


def _num_tensorcores_per_chip():
    # v7x (and megacore v4/v5p) can shard a "parallel" grid axis across TensorCores;
    # v5e / v6e are single-TC, where a 2-wide grid is just a serial loop.
    try:
        kind = jax.devices()[0].device_kind.lower()
    except Exception:
        return 1
    return 2 if any(s in kind for s in ("v7", "v4", "v5p")) else 1


@jax.jit
def block_forward(x, vecs, head_ln, tm_proj, lora_a, lora_b,
                  cm_r, cm_k, cm_v, init_state):
    b, t_len, dim = x.shape
    n_heads, dh = init_state.shape[0], init_state.shape[1]
    bf16 = jnp.bfloat16

    # Generation-dependent grid (perf-review rec #1).
    n_tc = _num_tensorcores_per_chip()
    n_steps = n_tc if (n_tc > 1 and b % n_tc == 0) else 1
    bc = b // n_steps
    bcd = bc * dim
    bch = bc * n_heads
    tdh = t_len * dh

    # ---- fused / re-laid-out parameters (tiny, built once under jit) ----
    vec7 = jnp.stack([vecs[0], vecs[1], vecs[2], vecs[3],
                      vecs[4], vecs[6], vecs[7]], axis=0)                 # (7, D)
    hln = jnp.stack([jnp.tile(head_ln[0], bc * n_heads),
                     jnp.tile(head_ln[1], bc * n_heads)], axis=0)         # (2, bcd)
    lam_cat = jnp.concatenate([vecs[8 + i] for i in range(5)])[None, :]   # (1, 5D)
    a_cat = jnp.concatenate([lora_a[i] for i in range(5)], axis=1).astype(bf16)
    b_blk = _blkdiag([lora_b[i] for i in range(5)]).astype(bf16)          # (5L, 5D)
    w_rkvg = _blkdiag([tm_proj[i] for i in range(4)]).astype(bf16)        # (4D, 4D)
    w_ocrk = _blkdiag([tm_proj[4], cm_r, cm_k]).astype(bf16)              # (3D, 6D)
    w_cmv = cm_v.astype(bf16)                                             # (4D, D)

    # u in expanded layout: u_e[i, b*D + h*dh + j] = u[h*dh + i]
    u_e = jnp.tile(jnp.repeat(vecs[5].reshape(n_heads, dh).T, dh, axis=1), (1, bc))
    # init_state in flat 2-D layout: s0[i, b*D + h*dh + j] = init_state[h, i, j]
    s0 = jnp.tile(jnp.transpose(init_state, (1, 0, 2)).reshape(dh, dim), (1, bc))

    # 0/1 expansion / head-segment constants (exact in bf16)
    asel = (jnp.arange(tdh)[:, None] // dh
            == jnp.arange(t_len)[None, :]).astype(jnp.float32)            # (T*dh, T)
    asel3 = _blkdiag([asel, asel, asel]).astype(bf16)                     # (3T*dh, 3T)
    gmask3 = jnp.tile((jnp.arange(tdh)[:, None] % dh
                       == jnp.arange(dim)[None, :] % dh).astype(jnp.float32),
                      (3, 1))                                             # (3T*dh, D)
    hsel_b = (jnp.arange(dim)[:, None] // dh
              == jnp.arange(dim)[None, :] // dh).astype(bf16)             # (D, D)
    p_head = (jnp.arange(bcd)[:, None] // dh
              == jnp.arange(bch)[None, :]).astype(jnp.float32)            # (bcd, bch)
    p2 = _blkdiag([p_head, p_head])                                       # (2bcd, 2bch)
    p2t = p2.T                                                            # (2bch, 2bcd)

    xk = x.reshape(n_steps, bc * t_len, dim)

    consts = (vec7, hln, lam_cat, a_cat, b_blk, w_rkvg, w_ocrk, w_cmv,
              u_e, s0, asel3, gmask3, hsel_b, p2, p2t)

    def full_spec(a):
        return pl.BlockSpec(a.shape, lambda i, n=a.ndim: (0,) * n)

    grid_spec = pltpu.PrefetchScalarGridSpec(
        num_scalar_prefetch=0,
        grid=(n_steps,),
        in_specs=[pl.BlockSpec((1, bc * t_len, dim), lambda i: (i, 0, 0))]
                 + [full_spec(a) for a in consts],
        out_specs=[pl.BlockSpec((1, bc * t_len, dim), lambda i: (i, 0, 0)),
                   pl.BlockSpec((1, dh, bcd), lambda i: (i, 0, 0))],
    )
    out_shape = (jax.ShapeDtypeStruct((n_steps, bc * t_len, dim), jnp.float32),
                 jax.ShapeDtypeStruct((n_steps, dh, bcd), jnp.float32))

    out_flat, state_flat = pl.pallas_call(
        block_kernel,
        out_shape=out_shape,
        grid_spec=grid_spec,
        compiler_params=pltpu.CompilerParams(dimension_semantics=("parallel",)),
    )(xk, *consts)

    out = out_flat.reshape(b, t_len, dim)
    state = (state_flat.reshape(n_steps, dh, bc, n_heads, dh)
             .transpose(0, 2, 3, 1, 4).reshape(b, n_heads, dh, dh))
    return out, state


# ------------------------- pure-JAX reference --------------------------
def reference_block(x, vecs, head_ln, tm_proj, lora_a, lora_b,
                    cm_r, cm_k, cm_v, init_state):
    b, t_len, dim = x.shape
    n_heads, dh = init_state.shape[0], init_state.shape[1]

    def ln(h, w, bb):
        mu = h.mean(-1, keepdims=True)
        var = ((h - mu) ** 2).mean(-1, keepdims=True)
        return (h - mu) / jnp.sqrt(var + 1e-5) * w + bb

    def shift(h):
        return jnp.concatenate([jnp.zeros_like(h[:, :1]), h[:, :-1]], axis=1)

    def lora(h, idx, lam_row):
        return vecs[lam_row] + jnp.tanh(h @ lora_a[idx]) @ lora_b[idx]

    h1 = ln(x, vecs[0], vecs[1])
    xx = shift(h1)
    xxx = xx - h1
    lerpx = h1 + xxx * vecs[4]

    r = (h1 + xxx * lora(lerpx, 0, 8)) @ tm_proj[0]
    k = (h1 + xxx * lora(lerpx, 1, 9)) @ tm_proj[1]
    v = (h1 + xxx * lora(lerpx, 2, 10)) @ tm_proj[2]
    g = (h1 + xxx * lora(lerpx, 3, 11)) @ tm_proj[3]
    w = jnp.exp(-jnp.exp(lora(h1 + xxx * lora(lerpx, 4, 12), 4, 12)))

    def heads(a):
        return a.reshape(b, t_len, n_heads, dh).transpose(0, 2, 1, 3)

    r3, k3, v3, w3, g3 = map(heads, (r, k, v, w, g))
    u2 = vecs[5].reshape(n_heads, dh)

    state = jnp.broadcast_to(init_state, (b, n_heads, dh, dh))
    outs = []
    for t in range(t_len):
        kt, vt, rt, wt = k3[:, :, t], v3[:, :, t], r3[:, :, t], w3[:, :, t]
        kv = kt[..., :, None] * vt[..., None, :]
        wkv_t = state + u2[None, :, :, None] * kv
        outs.append(jnp.einsum('bhi,bhij->bhj', rt, wkv_t))
        state = wt[..., :, None] * state + kv
    owkv = jnp.stack(outs, axis=2)                       # (B, H, T, dh)

    mu = owkv.mean(-1, keepdims=True)
    var = ((owkv - mu) ** 2).mean(-1, keepdims=True)
    owkv_n = (owkv - mu) / jnp.sqrt(var + 1e-5) * head_ln[0] + head_ln[1]

    o = (g3 * jax.nn.sigmoid(g3)) * owkv_n
    o = o.transpose(0, 2, 1, 3).reshape(b, t_len, dim)
    x1 = o @ tm_proj[4]

    h2 = ln(x, vecs[2], vecs[3])
    xx2 = shift(h2)
    xxx2 = xx2 - h2
    r_cm = (h2 + xxx2 * vecs[6]) @ cm_r
    k_cm = (h2 + xxx2 * vecs[7]) @ cm_k
    v_cm = (jnp.maximum(k_cm, 0.0) ** 2) @ cm_v
    cm_out = jax.nn.sigmoid(r_cm) * v_cm

    return x1 + x + cm_out, state


# ------------------------------- main -----------------------------------
if __name__ == "__main__":
    key = jax.random.PRNGKey(0)
    ks = jax.random.split(key, 24)

    r0 = BLOCK_ID / (N_BLOCKS - 1)
    r1 = 1.0 - BLOCK_ID / N_BLOCKS
    idx = jnp.arange(D).astype(jnp.float32)

    ln1_w, ln1_b = jnp.ones((D,)), jnp.zeros((D,))
    ln2_w, ln2_b = jnp.ones((D,)), jnp.zeros((D,))
    x_weight = 1.0 - (idx / D) ** r1
    ih = (jnp.arange(D) % DH).astype(jnp.float32)
    u_vec = r0 * (1.0 - ih / (D - 1)) + (0.1 * (ih + 1.0)) % 3.0
    cm_rw = 1.0 - (idx / D) ** r1
    cm_kw = 1.0 - (idx / D) ** r1

    std = D ** -0.5
    # LoRA params (r, k, v, g, d)
    lam = jax.random.normal(ks[0], (5, D))
    lora_a = jax.random.normal(ks[1], (5, D, LORA)) * 1e-3
    lora_b = jax.random.normal(ks[2], (5, LORA, D)) * 1e-3
    # time-mixing projections (stored pre-transposed: y = x @ W), [r,k,v,g,o]
    tm_proj = jnp.concatenate([
        jax.random.normal(ks[3], (4, D, D)) * std,
        jax.random.normal(ks[4], (1, D, D)) * 0.02,   # o_proj (orig zeros)
    ], axis=0)
    init_state = jax.random.normal(ks[5], (HEADS, DH, DH))
    hln_w = jnp.full((DH,), ((1 + BLOCK_ID) / N_BLOCKS) ** 0.7, jnp.float32)
    hln_b = jnp.zeros((DH,))
    # channel-mixing projections (pre-transposed)
    cm_r = jax.random.normal(ks[6], (D, D)) * 0.02          # orig zeros
    cm_k = jax.random.normal(ks[7], (D, 4 * D)) * std       # orig orthogonal
    cm_v = jax.random.normal(ks[8], (4 * D, D)) * (4 * D) ** -0.5  # orig zeros

    vecs = jnp.stack([ln1_w, ln1_b, ln2_w, ln2_b, x_weight, u_vec,
                      cm_rw, cm_kw,
                      lam[0], lam[1], lam[2], lam[3], lam[4]], axis=0)
    head_ln = jnp.stack([hln_w, hln_b], axis=0)

    x = jax.random.normal(ks[9], (B, T, D), dtype=jnp.float32)

    args = (x.astype(jnp.float32), vecs.astype(jnp.float32),
            head_ln.astype(jnp.float32), tm_proj.astype(jnp.float32),
            lora_a.astype(jnp.float32), lora_b.astype(jnp.float32),
            cm_r.astype(jnp.float32), cm_k.astype(jnp.float32),
            cm_v.astype(jnp.float32), init_state.astype(jnp.float32))

    out, state_out = block_forward(*args)
    out = jax.block_until_ready(out)
    state_out = jax.block_until_ready(state_out)

    # Reference pinned to f32-"highest" matmuls so the comparison stays meaningful
    # now that the kernel runs its heavy dots with bf16 operands (f32 accumulation).
    with jax.default_matmul_precision("highest"):
        ref_out, ref_state = reference_block(*args)
    ref_out = jax.block_until_ready(ref_out)
    ref_state = jax.block_until_ready(ref_state)

    # bf16-operand kernel vs f32 reference: tolerance scaled to bf16 noise and the
    # tensors' dynamic range (max-norm relative check, ~3% of range).
    def _close(got, want, atol, rtol):
        err = float(jnp.max(jnp.abs(got - want)))
        tol = atol + rtol * float(jnp.max(jnp.abs(want)))
        return err <= tol, err, tol

    ok_o, err_o, tol_o = _close(out, ref_out, 5e-2, 3e-2)
    ok_s, err_s, tol_s = _close(state_out, ref_state, 5e-2, 3e-2)
    assert ok_o, ("output mismatch", err_o, tol_o)
    assert ok_s, ("state mismatch", err_s, tol_s)

    print("KERNEL_OK")
</pallas_src>

<mosaic_0001>
module attributes {stable_mosaic.version = 11 : i64} {
  func.func @block_kernel(%arg0: i32, %arg1: memref<1x16x32xf32, #tpu.memory_space<vmem>>, %arg2: memref<7x32xf32, #tpu.memory_space<vmem>>, %arg3: memref<2x64xf32, #tpu.memory_space<vmem>>, %arg4: memref<1x160xf32, #tpu.memory_space<vmem>>, %arg5: memref<32x40xbf16, #tpu.memory_space<vmem>>, %arg6: memref<40x160xbf16, #tpu.memory_space<vmem>>, %arg7: memref<128x128xbf16, #tpu.memory_space<vmem>>, %arg8: memref<96x192xbf16, #tpu.memory_space<vmem>>, %arg9: memref<128x32xbf16, #tpu.memory_space<vmem>>, %arg10: memref<8x64xf32, #tpu.memory_space<vmem>>, %arg11: memref<8x64xf32, #tpu.memory_space<vmem>>, %arg12: memref<192x24xbf16, #tpu.memory_space<vmem>>, %arg13: memref<192x32xf32, #tpu.memory_space<vmem>>, %arg14: memref<32x32xbf16, #tpu.memory_space<vmem>>, %arg15: memref<128x16xf32, #tpu.memory_space<vmem>>, %arg16: memref<16x128xf32, #tpu.memory_space<vmem>>, %arg17: memref<1x16x32xf32, #tpu.memory_space<vmem>>, %arg18: memref<1x8x64xf32, #tpu.memory_space<vmem>>) attributes {dimension_semantics = [#tpu.dimension_semantics<parallel>], iteration_bounds = array<i64: 1>, scalar_prefetch = 0 : i64, scratch_operands = 0 : i64, tpu.core_type = #tpu.core_type<tc>, window_params = [{transform_indices = @transform_0, window_bounds = array<i64: 1, 16, 32>}, {pipeline_mode = #tpu.pipeline_mode<synchronous>, transform_indices = @transform_1, window_bounds = array<i64: 7, 32>}, {pipeline_mode = #tpu.pipeline_mode<synchronous>, transform_indices = @transform_2, window_bounds = array<i64: 2, 64>}, {pipeline_mode = #tpu.pipeline_mode<synchronous>, transform_indices = @transform_3, window_bounds = array<i64: 1, 160>}, {pipeline_mode = #tpu.pipeline_mode<synchronous>, transform_indices = @transform_4, window_bounds = array<i64: 32, 40>}, {pipeline_mode = #tpu.pipeline_mode<synchronous>, transform_indices = @transform_5, window_bounds = array<i64: 40, 160>}, {pipeline_mode = #tpu.pipeline_mode<synchronous>, transform_indices = @transform_6, window_bounds = array<i64: 128, 128>}, {pipeline_mode = #tpu.pipeline_mode<synchronous>, transform_indices = @transform_7, window_bounds = array<i64: 96, 192>}, {pipeline_mode = #tpu.pipeline_mode<synchronous>, transform_indices = @transform_8, window_bounds = array<i64: 128, 32>}, {pipeline_mode = #tpu.pipeline_mode<synchronous>, transform_indices = @transform_9, window_bounds = array<i64: 8, 64>}, {pipeline_mode = #tpu.pipeline_mode<synchronous>, transform_indices = @transform_10, window_bounds = array<i64: 8, 64>}, {pipeline_mode = #tpu.pipeline_mode<synchronous>, transform_indices = @transform_11, window_bounds = array<i64: 192, 24>}, {pipeline_mode = #tpu.pipeline_mode<synchronous>, transform_indices = @transform_12, window_bounds = array<i64: 192, 32>}, {pipeline_mode = #tpu.pipeline_mode<synchronous>, transform_indices = @transform_13, window_bounds = array<i64: 32, 32>}, {pipeline_mode = #tpu.pipeline_mode<synchronous>, transform_indices = @transform_14, window_bounds = array<i64: 128, 16>}, {pipeline_mode = #tpu.pipeline_mode<synchronous>, transform_indices = @transform_15, window_bounds = array<i64: 16, 128>}, {transform_indices = @transform_16, window_bounds = array<i64: 1, 16, 32>}, {transform_indices = @transform_17, window_bounds = array<i64: 1, 8, 64>}]} {
    %c0 = arith.constant 0 : index
    %c0_0 = arith.constant 0 : index
    %c0_1 = arith.constant 0 : index
    %0 = vector.load %arg1[%c0, %c0_0, %c0_1] : memref<1x16x32xf32, #tpu.memory_space<vmem>>, vector<1x16x32xf32>
    %1 = vector.shape_cast %0 : vector<1x16x32xf32> to vector<16x32xf32>
    %2 = tpu.iota {dimensions = array<i32: 0>} : vector<16x1xi32>
    %c8_i32 = arith.constant 8 : i32
    %c0_i32 = arith.constant 0 : i32
    %3 = arith.cmpi eq, %c8_i32, %c0_i32 : i32
    %c1_i32 = arith.constant 1 : i32
    %4 = arith.select %3, %c1_i32, %c8_i32 : i32
    %5 = vector.broadcast %4 : i32 to vector<16x1xi32>
    %6 = arith.remsi %2, %5 : vector<16x1xi32>
    %c0_i32_2 = arith.constant 0 : i32
    %7 = vector.broadcast %c0_i32_2 : i32 to vector<16x1xi32>
    %8 = arith.cmpi ne, %6, %7 : vector<16x1xi32>
    %c0_i32_3 = arith.constant 0 : i32
    %9 = vector.broadcast %c0_i32_3 : i32 to vector<16x1xi32>
    %10 = arith.cmpi slt, %6, %9 : vector<16x1xi32>
    %c0_i32_4 = arith.constant 0 : i32
    %11 = arith.cmpi slt, %4, %c0_i32_4 : i32
    %12 = vector.broadcast %11 : i1 to vector<16x1xi1>
    %13 = vector.broadcast %12 : vector<16x1xi1> to vector<16x1xi1>
    %14 = arith.xori %10, %13 : vector<16x1xi1>
    %15 = arith.andi %14, %8 : vector<16x1xi1>
    %16 = vector.broadcast %4 : i32 to vector<16x1xi32>
    %17 = arith.addi %6, %16 : vector<16x1xi32>
    %18 = arith.select %15, %17, %6 : vector<16x1xi1>, vector<16x1xi32>
    %c0_i32_5 = arith.constant 0 : i32
    %19 = vector.broadcast %c0_i32_5 : i32 to vector<16x1xi32>
    %20 = arith.cmpi eq, %18, %19 : vector<16x1xi32>
    %c0_6 = arith.constant 0 : index
    %c0_7 = arith.constant 0 : index
    %21 = vector.load %arg2[%c0_6, %c0_7] : memref<7x32xf32, #tpu.memory_space<vmem>>, vector<1x32xf32>
    %c1 = arith.constant 1 : index
    %c0_8 = arith.constant 0 : index
    %22 = vector.load %arg2[%c1, %c0_8] : memref<7x32xf32, #tpu.memory_space<vmem>>, vector<1x32xf32>
    %cst = arith.constant dense<0.000000e+00> : vector<16xf32>
    %23 = vector.multi_reduction <add>, %1, %cst [1] : vector<16x32xf32> to vector<16xf32>
    %24 = vector.shape_cast %23 : vector<16xf32> to vector<16x1xf32>
    %cst_9 = arith.constant 3.200000e+01 : f32
    %25 = vector.broadcast %cst_9 : f32 to vector<16x1xf32>
    %26 = arith.divf %24, %25 : vector<16x1xf32>
    %27 = vector.broadcast %26 : vector<16x1xf32> to vector<16x32xf32>
    %28 = arith.subf %1, %27 : vector<16x32xf32>
    %29 = arith.mulf %28, %28 : vector<16x32xf32>
    %cst_10 = arith.constant dense<0.000000e+00> : vector<16xf32>
    %30 = vector.multi_reduction <add>, %29, %cst_10 [1] : vector<16x32xf32> to vector<16xf32>
    %31 = vector.shape_cast %30 : vector<16xf32> to vector<16x1xf32>
    %cst_11 = arith.constant 3.200000e+01 : f32
    %32 = vector.broadcast %cst_11 : f32 to vector<16x1xf32>
    %33 = arith.divf %31, %32 : vector<16x1xf32>
    %34 = vector.broadcast %26 : vector<16x1xf32> to vector<16x32xf32>
    %35 = arith.subf %1, %34 : vector<16x32xf32>
    %cst_12 = arith.constant 9.99999974E-6 : f32
    %36 = vector.broadcast %cst_12 : f32 to vector<16x1xf32>
    %37 = arith.addf %33, %36 : vector<16x1xf32>
    %38 = math.rsqrt %37 : vector<16x1xf32>
    %39 = vector.broadcast %38 : vector<16x1xf32> to vector<16x32xf32>
    %40 = arith.mulf %35, %39 : vector<16x32xf32>
    %41 = vector.broadcast %21 : vector<1x32xf32> to vector<16x32xf32>
    %42 = arith.mulf %40, %41 : vector<16x32xf32>
    %43 = vector.broadcast %22 : vector<1x32xf32> to vector<16x32xf32>
    %44 = arith.addf %42, %43 : vector<16x32xf32>
    %c1_i32_13 = arith.constant 1 : i32
    %45 = tpu.dynamic_rotate %44 by %c1_i32_13 dim 0 : vector<16x32xf32>, i32 -> vector<16x32xf32>
    %cst_14 = arith.constant 0.000000e+00 : f32
    %46 = vector.shape_cast %20 : vector<16x1xi1> to vector<16x1xi1>
    %47 = vector.broadcast %46 : vector<16x1xi1> to vector<16x32xi1>
    %48 = vector.broadcast %cst_14 : f32 to vector<16x32xf32>
    %49 = arith.select %47, %48, %45 : vector<16x32xi1>, vector<16x32xf32>
    %50 = arith.subf %49, %44 : vector<16x32xf32>
    %c4 = arith.constant 4 : index
    %c0_15 = arith.constant 0 : index
    %51 = vector.load %arg2[%c4, %c0_15] : memref<7x32xf32, #tpu.memory_space<vmem>>, vector<1x32xf32>
    %52 = vector.broadcast %51 : vector<1x32xf32> to vector<16x32xf32>
    %53 = arith.mulf %50, %52 : vector<16x32xf32>
    %54 = arith.addf %44, %53 : vector<16x32xf32>
    %c0_16 = arith.constant 0 : index
    %c0_17 = arith.constant 0 : index
    %55 = vector.load %arg4[%c0_16, %c0_17] : memref<1x160xf32, #tpu.memory_space<vmem>>, vector<1x160xf32>
    %c0_18 = arith.constant 0 : index
    %c0_19 = arith.constant 0 : index
    %56 = vector.load %arg5[%c0_18, %c0_19] : memref<32x40xbf16, #tpu.memory_space<vmem>>, vector<32x40xbf16>
    %57 = arith.truncf %54 : vector<16x32xf32> to vector<16x32xbf16>
    %cst_20 = arith.constant dense<0.000000e+00> : vector<16x40xf32>
    %58 = tpu.matmul %57, %56, %cst_20 {dimension_numbers = #tpu.dot_dimension_numbers<[1], [0], [0], [1], [0, 0, 1, 1], [], []>} : vector<16x32xbf16>, vector<32x40xbf16>, vector<16x40xf32> -> vector<16x40xf32>
    %59 = math.tanh %58 : vector<16x40xf32>
    %c0_21 = arith.constant 0 : index
    %c0_22 = arith.constant 0 : index
    %60 = vector.load %arg6[%c0_21, %c0_22] : memref<40x160xbf16, #tpu.memory_space<vmem>>, vector<40x160xbf16>
    %61 = arith.truncf %59 : vector<16x40xf32> to vector<16x40xbf16>
    %cst_23 = arith.constant dense<0.000000e+00> : vector<16x160xf32>
    %62 = tpu.matmul %61, %60, %cst_23 {dimension_numbers = #tpu.dot_dimension_numbers<[1], [0], [0], [1], [0, 0, 1, 1], [], []>} : vector<16x40xbf16>, vector<40x160xbf16>, vector<16x160xf32> -> vector<16x160xf32>
    %63 = vector.broadcast %55 : vector<1x160xf32> to vector<16x160xf32>
    %64 = arith.addf %63, %62 : vector<16x160xf32>
    %65 = vector.extract_strided_slice %64 {offsets = [0, 0], sizes = [16, 128], strides = [1, 1]} : vector<16x160xf32> to vector<16x128xf32>
    %66 = vector.extract_strided_slice %64 {offsets = [0, 128], sizes = [16, 32], strides = [1, 1]} : vector<16x160xf32> to vector<16x32xf32>
    %67 = tpu.concatenate %44, %44, %44, %44 in 1 : vector<16x32xf32>, vector<16x32xf32>, vector<16x32xf32>, vector<16x32xf32> -> vector<16x128xf32>
    %68 = tpu.concatenate %50, %50, %50, %50 in 1 : vector<16x32xf32>, vector<16x32xf32>, vector<16x32xf32>, vector<16x32xf32> -> vector<16x128xf32>
    %69 = arith.mulf %68, %65 : vector<16x128xf32>
    %70 = arith.addf %67, %69 : vector<16x128xf32>
    %c0_24 = arith.constant 0 : index
    %c0_25 = arith.constant 0 : index
    %71 = vector.load %arg7[%c0_24, %c0_25] : memref<128x128xbf16, #tpu.memory_space<vmem>>, vector<128x128xbf16>
    %72 = arith.truncf %70 : vector<16x128xf32> to vector<16x128xbf16>
    %cst_26 = arith.constant dense<0.000000e+00> : vector<16x128xf32>
    %73 = tpu.matmul %72, %71, %cst_26 {dimension_numbers = #tpu.dot_dimension_numbers<[1], [0], [0], [1], [0, 0, 1, 1], [], []>} : vector<16x128xbf16>, vector<128x128xbf16>, vector<16x128xf32> -> vector<16x128xf32>
    %74 = vector.extract_strided_slice %73 {offsets = [0, 0], sizes = [16, 32], strides = [1, 1]} : vector<16x128xf32> to vector<16x32xf32>
    %75 = vector.extract_strided_slice %73 {offsets = [0, 32], sizes = [16, 32], strides = [1, 1]} : vector<16x128xf32> to vector<16x32xf32>
    %76 = vector.extract_strided_slice %73 {offsets = [0, 64], sizes = [16, 32], strides = [1, 1]} : vector<16x128xf32> to vector<16x32xf32>
    %77 = vector.extract_strided_slice %73 {offsets = [0, 96], sizes = [16, 32], strides = [1, 1]} : vector<16x128xf32> to vector<16x32xf32>
    %c0_27 = arith.constant 0 : index
    %c32 = arith.constant 32 : index
    %78 = vector.load %arg5[%c0_27, %c32] : memref<32x40xbf16, #tpu.memory_space<vmem>>, vector<32x8xbf16>
    %c32_28 = arith.constant 32 : index
    %c128 = arith.constant 128 : index
    %79 = vector.load %arg6[%c32_28, %c128] : memref<40x160xbf16, #tpu.memory_space<vmem>>, vector<8x32xbf16>
    %80 = arith.mulf %50, %66 : vector<16x32xf32>
    %81 = arith.addf %44, %80 : vector<16x32xf32>
    %c0_29 = arith.constant 0 : index
    %c128_30 = arith.constant 128 : index
    %82 = vector.load %arg4[%c0_29, %c128_30] : memref<1x160xf32, #tpu.memory_space<vmem>>, vector<1x32xf32>
    %83 = arith.truncf %81 : vector<16x32xf32> to vector<16x32xbf16>
    %cst_31 = arith.constant dense<0.000000e+00> : vector<16x8xf32>
    %84 = tpu.matmul %83, %78, %cst_31 {dimension_numbers = #tpu.dot_dimension_numbers<[1], [0], [0], [1], [0, 0, 1, 1], [], []>} : vector<16x32xbf16>, vector<32x8xbf16>, vector<16x8xf32> -> vector<16x8xf32>
    %85 = math.tanh %84 : vector<16x8xf32>
    %86 = arith.truncf %85 : vector<16x8xf32> to vector<16x8xbf16>
    %cst_32 = arith.constant dense<0.000000e+00> : vector<16x32xf32>
    %87 = tpu.matmul %86, %79, %cst_32 {dimension_numbers = #tpu.dot_dimension_numbers<[1], [0], [0], [1], [0, 0, 1, 1], [], []>} : vector<16x8xbf16>, vector<8x32xbf16>, vector<16x32xf32> -> vector<16x32xf32>
    %88 = vector.broadcast %82 : vector<1x32xf32> to vector<16x32xf32>
    %89 = arith.addf %88, %87 : vector<16x32xf32>
    %90 = math.exp %89 : vector<16x32xf32>
    %cst_33 = arith.constant 0.000000e+00 : f32
    %91 = vector.broadcast %cst_33 : f32 to vector<16x32xf32>
    %92 = arith.subf %91, %90 : vector<16x32xf32>
    %93 = math.exp %92 : vector<16x32xf32>
    %94 = vector.extract_strided_slice %74 {offsets = [0, 0], sizes = [8, 32], strides = [1, 1]} : vector<16x32xf32> to vector<8x32xf32>
    %95 = vector.extract_strided_slice %75 {offsets = [0, 0], sizes = [8, 32], strides = [1, 1]} : vector<16x32xf32> to vector<8x32xf32>
    %96 = vector.extract_strided_slice %93 {offsets = [0, 0], sizes = [8, 32], strides = [1, 1]} : vector<16x32xf32> to vector<8x32xf32>
    %97 = tpu.concatenate %94, %95, %96 in 0 : vector<8x32xf32>, vector<8x32xf32>, vector<8x32xf32> -> vector<24x32xf32>
    %c0_34 = arith.constant 0 : index
    %c0_35 = arith.constant 0 : index
    %98 = vector.load %arg12[%c0_34, %c0_35] : memref<192x24xbf16, #tpu.memory_space<vmem>>, vector<192x24xbf16>
    %99 = arith.truncf %97 : vector<24x32xf32> to vector<24x32xbf16>
    %cst_36 = arith.constant dense<0.000000e+00> : vector<192x32xf32>
    %100 = tpu.matmul %98, %99, %cst_36 {dimension_numbers = #tpu.dot_dimension_numbers<[1], [0], [0], [1], [0, 0, 1, 1], [], []>} : vector<192x24xbf16>, vector<24x32xbf16>, vector<192x32xf32> -> vector<192x32xf32>
    %c0_37 = arith.constant 0 : index
    %c0_38 = arith.constant 0 : index
    %101 = vector.load %arg13[%c0_37, %c0_38] : memref<192x32xf32, #tpu.memory_space<vmem>>, vector<192x32xf32>
    %102 = arith.mulf %100, %101 : vector<192x32xf32>
    %c0_39 = arith.constant 0 : index
    %c0_40 = arith.constant 0 : index
    %103 = vector.load %arg14[%c0_39, %c0_40] : memref<32x32xbf16, #tpu.memory_space<vmem>>, vector<32x32xbf16>
    %104 = arith.truncf %102 : vector<192x32xf32> to vector<192x32xbf16>
    %cst_41 = arith.constant dense<0.000000e+00> : vector<192x32xf32>
    %105 = tpu.matmul %104, %103, %cst_41 {dimension_numbers = #tpu.dot_dimension_numbers<[1], [0], [0], [1], [0, 0, 1, 1], [], []>} : vector<192x32xbf16>, vector<32x32xbf16>, vector<192x32xf32> -> vector<192x32xf32>
    %106 = vector.extract_strided_slice %74 {offsets = [8, 0], sizes = [8, 32], strides = [1, 1]} : vector<16x32xf32> to vector<8x32xf32>
    %107 = vector.extract_strided_slice %75 {offsets = [8, 0], sizes = [8, 32], strides = [1, 1]} : vector<16x32xf32> to vector<8x32xf32>
    %108 = vector.extract_strided_slice %93 {offsets = [8, 0], sizes = [8, 32], strides = [1, 1]} : vector<16x32xf32> to vector<8x32xf32>
    %109 = tpu.concatenate %106, %107, %108 in 0 : vector<8x32xf32>, vector<8x32xf32>, vector<8x32xf32> -> vector<24x32xf32>
    %c0_42 = arith.constant 0 : index
    %c0_43 = arith.constant 0 : index
    %110 = vector.load %arg12[%c0_42, %c0_43] : memref<192x24xbf16, #tpu.memory_space<vmem>>, vector<192x24xbf16>
    %111 = arith.truncf %109 : vector<24x32xf32> to vector<24x32xbf16>
    %cst_44 = arith.constant dense<0.000000e+00> : vector<192x32xf32>
    %112 = tpu.matmul %110, %111, %cst_44 {dimension_numbers = #tpu.dot_dimension_numbers<[1], [0], [0], [1], [0, 0, 1, 1], [], []>} : vector<192x24xbf16>, vector<24x32xbf16>, vector<192x32xf32> -> vector<192x32xf32>
    %c0_45 = arith.constant 0 : index
    %c0_46 = arith.constant 0 : index
    %113 = vector.load %arg13[%c0_45, %c0_46] : memref<192x32xf32, #tpu.memory_space<vmem>>, vector<192x32xf32>
    %114 = arith.mulf %112, %113 : vector<192x32xf32>
    %c0_47 = arith.constant 0 : index
    %c0_48 = arith.constant 0 : index
    %115 = vector.load %arg14[%c0_47, %c0_48] : memref<32x32xbf16, #tpu.memory_space<vmem>>, vector<32x32xbf16>
    %116 = arith.truncf %114 : vector<192x32xf32> to vector<192x32xbf16>
    %cst_49 = arith.constant dense<0.000000e+00> : vector<192x32xf32>
    %117 = tpu.matmul %116, %115, %cst_49 {dimension_numbers = #tpu.dot_dimension_numbers<[1], [0], [0], [1], [0, 0, 1, 1], [], []>} : vector<192x32xbf16>, vector<32x32xbf16>, vector<192x32xf32> -> vector<192x32xf32>
    %118 = tpu.concatenate %105, %117 in 1 : vector<192x32xf32>, vector<192x32xf32> -> vector<192x64xf32>
    %119 = vector.extract_strided_slice %76 {offsets = [0, 0], sizes = [8, 32], strides = [1, 1]} : vector<16x32xf32> to vector<8x32xf32>
    %120 = vector.extract_strided_slice %76 {offsets = [8, 0], sizes = [8, 32], strides = [1, 1]} : vector<16x32xf32> to vector<8x32xf32>
    %121 = tpu.concatenate %119, %120 in 1 : vector<8x32xf32>, vector<8x32xf32> -> vector<8x64xf32>
    %c0_50 = arith.constant 0 : index
    %c0_51 = arith.constant 0 : index
    %122 = vector.load %arg10[%c0_50, %c0_51] : memref<8x64xf32, #tpu.memory_space<vmem>>, vector<8x64xf32>
    %c0_52 = arith.constant 0 : index
    %c0_53 = arith.constant 0 : index
    %123 = vector.load %arg11[%c0_52, %c0_53] : memref<8x64xf32, #tpu.memory_space<vmem>>, vector<8x64xf32>
    %124 = vector.extract_strided_slice %118 {offsets = [0, 0], sizes = [8, 64], strides = [1, 1]} : vector<192x64xf32> to vector<8x64xf32>
    %125 = vector.extract_strided_slice %118 {offsets = [64, 0], sizes = [8, 64], strides = [1, 1]} : vector<192x64xf32> to vector<8x64xf32>
    %126 = vector.extract_strided_slice %118 {offsets = [128, 0], sizes = [8, 64], strides = [1, 1]} : vector<192x64xf32> to vector<8x64xf32>
    %127 = vector.extract_strided_slice %121 {offsets = [0, 0], sizes = [1, 64], strides = [1, 1]} : vector<8x64xf32> to vector<1x64xf32>
    %128 = vector.broadcast %127 : vector<1x64xf32> to vector<8x64xf32>
    %129 = arith.mulf %125, %128 : vector<8x64xf32>
    %130 = arith.mulf %122, %129 : vector<8x64xf32>
    %131 = arith.addf %123, %130 : vector<8x64xf32>
    %132 = arith.mulf %124, %131 : vector<8x64xf32>
    %cst_54 = arith.constant dense<0.000000e+00> : vector<64xf32>
    %133 = vector.multi_reduction <add>, %132, %cst_54 [0] : vector<8x64xf32> to vector<64xf32>
    %134 = vector.shape_cast %133 : vector<64xf32> to vector<1x64xf32>
    %135 = arith.mulf %126, %123 : vector<8x64xf32>
    %136 = arith.addf %135, %129 : vector<8x64xf32>
    %137 = vector.extract_strided_slice %118 {offsets = [8, 0], sizes = [8, 64], strides = [1, 1]} : vector<192x64xf32> to vector<8x64xf32>
    %138 = vector.extract_strided_slice %118 {offsets = [72, 0], sizes = [8, 64], strides = [1, 1]} : vector<192x64xf32> to vector<8x64xf32>
    %139 = vector.extract_strided_slice %118 {offsets = [136, 0], sizes = [8, 64], strides = [1, 1]} : vector<192x64xf32> to vector<8x64xf32>
    %140 = vector.extract_strided_slice %121 {offsets = [1, 0], sizes = [1, 64], strides = [1, 1]} : vector<8x64xf32> to vector<1x64xf32>
    %141 = vector.broadcast %140 : vector<1x64xf32> to vector<8x64xf32>
    %142 = arith.mulf %138, %141 : vector<8x64xf32>
    %143 = arith.mulf %122, %142 : vector<8x64xf32>
    %144 = arith.addf %136, %143 : vector<8x64xf32>
    %145 = arith.mulf %137, %144 : vector<8x64xf32>
    %cst_55 = arith.constant dense<0.000000e+00> : vector<64xf32>
    %146 = vector.multi_reduction <add>, %145, %cst_55 [0] : vector<8x64xf32> to vector<64xf32>
    %147 = vector.shape_cast %146 : vector<64xf32> to vector<1x64xf32>
    %148 = arith.mulf %139, %136 : vector<8x64xf32>
    %149 = arith.addf %148, %142 : vector<8x64xf32>
    %150 = vector.extract_strided_slice %118 {offsets = [16, 0], sizes = [8, 64], strides = [1, 1]} : vector<192x64xf32> to vector<8x64xf32>
    %151 = vector.extract_strided_slice %118 {offsets = [80, 0], sizes = [8, 64], strides = [1, 1]} : vector<192x64xf32> to vector<8x64xf32>
    %152 = vector.extract_strided_slice %118 {offsets = [144, 0], sizes = [8, 64], strides = [1, 1]} : vector<192x64xf32> to vector<8x64xf32>
    %153 = vector.extract_strided_slice %121 {offsets = [2, 0], sizes = [1, 64], strides = [1, 1]} : vector<8x64xf32> to vector<1x64xf32>
    %154 = vector.broadcast %153 : vector<1x64xf32> to vector<8x64xf32>
    %155 = arith.mulf %151, %154 : vector<8x64xf32>
    %156 = arith.mulf %122, %155 : vector<8x64xf32>
    %157 = arith.addf %149, %156 : vector<8x64xf32>
    %158 = arith.mulf %150, %157 : vector<8x64xf32>
    %cst_56 = arith.constant dense<0.000000e+00> : vector<64xf32>
    %159 = vector.multi_reduction <add>, %158, %cst_56 [0] : vector<8x64xf32> to vector<64xf32>
    %160 = vector.shape_cast %159 : vector<64xf32> to vector<1x64xf32>
    %161 = arith.mulf %152, %149 : vector<8x64xf32>
    %162 = arith.addf %161, %155 : vector<8x64xf32>
    %163 = vector.extract_strided_slice %118 {offsets = [24, 0], sizes = [8, 64], strides = [1, 1]} : vector<192x64xf32> to vector<8x64xf32>
    %164 = vector.extract_strided_slice %118 {offsets = [88, 0], sizes = [8, 64], strides = [1, 1]} : vector<192x64xf32> to vector<8x64xf32>
    %165 = vector.extract_strided_slice %118 {offsets = [152, 0], sizes = [8, 64], strides = [1, 1]} : vector<192x64xf32> to vector<8x64xf32>
    %166 = vector.extract_strided_slice %121 {offsets = [3, 0], sizes = [1, 64], strides = [1, 1]} : vector<8x64xf32> to vector<1x64xf32>
    %167 = vector.broadcast %166 : vector<1x64xf32> to vector<8x64xf32>
    %168 = arith.mulf %164, %167 : vector<8x64xf32>
    %169 = arith.mulf %122, %168 : vector<8x64xf32>
    %170 = arith.addf %162, %169 : vector<8x64xf32>
    %171 = arith.mulf %163, %170 : vector<8x64xf32>
    %cst_57 = arith.constant dense<0.000000e+00> : vector<64xf32>
    %172 = vector.multi_reduction <add>, %171, %cst_57 [0] : vector<8x64xf32> to vector<64xf32>
    %173 = vector.shape_cast %172 : vector<64xf32> to vector<1x64xf32>
    %174 = arith.mulf %165, %162 : vector<8x64xf32>
    %175 = arith.addf %174, %168 : vector<8x64xf32>
    %176 = vector.extract_strided_slice %118 {offsets = [32, 0], sizes = [8, 64], strides = [1, 1]} : vector<192x64xf32> to vector<8x64xf32>
    %177 = vector.extract_strided_slice %118 {offsets = [96, 0], sizes = [8, 64], strides = [1, 1]} : vector<192x64xf32> to vector<8x64xf32>
    %178 = vector.extract_strided_slice %118 {offsets = [160, 0], sizes = [8, 64], strides = [1, 1]} : vector<192x64xf32> to vector<8x64xf32>
    %179 = vector.extract_strided_slice %121 {offsets = [4, 0], sizes = [1, 64], strides = [1, 1]} : vector<8x64xf32> to vector<1x64xf32>
    %180 = vector.broadcast %179 : vector<1x64xf32> to vector<8x64xf32>
    %181 = arith.mulf %177, %180 : vector<8x64xf32>
    %182 = arith.mulf %122, %181 : vector<8x64xf32>
    %183 = arith.addf %175, %182 : vector<8x64xf32>
    %184 = arith.mulf %176, %183 : vector<8x64xf32>
    %cst_58 = arith.constant dense<0.000000e+00> : vector<64xf32>
    %185 = vector.multi_reduction <add>, %184, %cst_58 [0] : vector<8x64xf32> to vector<64xf32>
    %186 = vector.shape_cast %185 : vector<64xf32> to vector<1x64xf32>
    %187 = arith.mulf %178, %175 : vector<8x64xf32>
    %188 = arith.addf %187, %181 : vector<8x64xf32>
    %189 = vector.extract_strided_slice %118 {offsets = [40, 0], sizes = [8, 64], strides = [1, 1]} : vector<192x64xf32> to vector<8x64xf32>
    %190 = vector.extract_strided_slice %118 {offsets = [104, 0], sizes = [8, 64], strides = [1, 1]} : vector<192x64xf32> to vector<8x64xf32>
    %191 = vector.extract_strided_slice %118 {offsets = [168, 0], sizes = [8, 64], strides = [1, 1]} : vector<192x64xf32> to vector<8x64xf32>
    %192 = vector.extract_strided_slice %121 {offsets = [5, 0], sizes = [1, 64], strides = [1, 1]} : vector<8x64xf32> to vector<1x64xf32>
    %193 = vector.broadcast %192 : vector<1x64xf32> to vector<8x64xf32>
    %194 = arith.mulf %190, %193 : vector<8x64xf32>
    %195 = arith.mulf %122, %194 : vector<8x64xf32>
    %196 = arith.addf %188, %195 : vector<8x64xf32>
    %197 = arith.mulf %189, %196 : vector<8x64xf32>
    %cst_59 = arith.constant dense<0.000000e+00> : vector<64xf32>
    %198 = vector.multi_reduction <add>, %197, %cst_59 [0] : vector<8x64xf32> to vector<64xf32>
    %199 = vector.shape_cast %198 : vector<64xf32> to vector<1x64xf32>
    %200 = arith.mulf %191, %188 : vector<8x64xf32>
    %201 = arith.addf %200, %194 : vector<8x64xf32>
    %202 = vector.extract_strided_slice %118 {offsets = [48, 0], sizes = [8, 64], strides = [1, 1]} : vector<192x64xf32> to vector<8x64xf32>
    %203 = vector.extract_strided_slice %118 {offsets = [112, 0], sizes = [8, 64], strides = [1, 1]} : vector<192x64xf32> to vector<8x64xf32>
    %204 = vector.extract_strided_slice %118 {offsets = [176, 0], sizes = [8, 64], strides = [1, 1]} : vector<192x64xf32> to vector<8x64xf32>
    %205 = vector.extract_strided_slice %121 {offsets = [6, 0], sizes = [1, 64], strides = [1, 1]} : vector<8x64xf32> to vector<1x64xf32>
    %206 = vector.broadcast %205 : vector<1x64xf32> to vector<8x64xf32>
    %207 = arith.mulf %203, %206 : vector<8x64xf32>
    %208 = arith.mulf %122, %207 : vector<8x64xf32>
    %209 = arith.addf %201, %208 : vector<8x64xf32>
    %210 = arith.mulf %202, %209 : vector<8x64xf32>
    %cst_60 = arith.constant dense<0.000000e+00> : vector<64xf32>
    %211 = vector.multi_reduction <add>, %210, %cst_60 [0] : vector<8x64xf32> to vector<64xf32>
    %212 = vector.shape_cast %211 : vector<64xf32> to vector<1x64xf32>
    %213 = arith.mulf %204, %201 : vector<8x64xf32>
    %214 = arith.addf %213, %207 : vector<8x64xf32>
    %215 = vector.extract_strided_slice %118 {offsets = [56, 0], sizes = [8, 64], strides = [1, 1]} : vector<192x64xf32> to vector<8x64xf32>
    %216 = vector.extract_strided_slice %118 {offsets = [120, 0], sizes = [8, 64], strides = [1, 1]} : vector<192x64xf32> to vector<8x64xf32>
    %217 = vector.extract_strided_slice %118 {offsets = [184, 0], sizes = [8, 64], strides = [1, 1]} : vector<192x64xf32> to vector<8x64xf32>
    %218 = vector.extract_strided_slice %121 {offsets = [7, 0], sizes = [1, 64], strides = [1, 1]} : vector<8x64xf32> to vector<1x64xf32>
    %219 = vector.broadcast %218 : vector<1x64xf32> to vector<8x64xf32>
    %220 = arith.mulf %216, %219 : vector<8x64xf32>
    %221 = arith.mulf %122, %220 : vector<8x64xf32>
    %222 = arith.addf %214, %221 : vector<8x64xf32>
    %223 = arith.mulf %215, %222 : vector<8x64xf32>
    %cst_61 = arith.constant dense<0.000000e+00> : vector<64xf32>
    %224 = vector.multi_reduction <add>, %223, %cst_61 [0] : vector<8x64xf32> to vector<64xf32>
    %225 = vector.shape_cast %224 : vector<64xf32> to vector<1x64xf32>
    %226 = arith.mulf %217, %214 : vector<8x64xf32>
    %227 = arith.addf %226, %220 : vector<8x64xf32>
    %228 = tpu.concatenate %134, %147, %160, %173, %186, %199, %212, %225 in 0 : vector<1x64xf32>, vector<1x64xf32>, vector<1x64xf32>, vector<1x64xf32>, vector<1x64xf32>, vector<1x64xf32>, vector<1x64xf32>, vector<1x64xf32> -> vector<8x64xf32>
    %229 = arith.mulf %228, %228 : vector<8x64xf32>
    %230 = tpu.concatenate %228, %229 in 1 : vector<8x64xf32>, vector<8x64xf32> -> vector<8x128xf32>
    %c0_62 = arith.constant 0 : index
    %c0_63 = arith.constant 0 : index
    %231 = vector.load %arg15[%c0_62, %c0_63] : memref<128x16xf32, #tpu.memory_space<vmem>>, vector<128x16xf32>
    %cst_64 = arith.constant dense<0.000000e+00> : vector<8x16xf32>
    %232 = tpu.matmul %230, %231, %cst_64 {dimension_numbers = #tpu.dot_dimension_numbers<[1], [0], [0], [1], [0, 0, 1, 1], [], []>, precision = #tpu.contract_precision<fp32>} : vector<8x128xf32>, vector<128x16xf32>, vector<8x16xf32> -> vector<8x16xf32>
    %cst_65 = arith.constant 1.250000e-01 : f32
    %233 = vector.broadcast %cst_65 : f32 to vector<8x16xf32>
    %234 = arith.mulf %232, %233 : vector<8x16xf32>
    %235 = vector.extract_strided_slice %234 {offsets = [0, 0], sizes = [8, 8], strides = [1, 1]} : vector<8x16xf32> to vector<8x8xf32>
    %236 = vector.extract_strided_slice %234 {offsets = [0, 8], sizes = [8, 8], strides = [1, 1]} : vector<8x16xf32> to vector<8x8xf32>
    %237 = arith.mulf %235, %235 : vector<8x8xf32>
    %238 = arith.subf %236, %237 : vector<8x8xf32>
    %cst_66 = arith.constant 0.000000e+00 : f32
    %239 = vector.broadcast %cst_66 : f32 to vector<8x8xf32>
    %240 = arith.maximumf %238, %239 : vector<8x8xf32>
    %241 = tpu.concatenate %235, %240 in 1 : vector<8x8xf32>, vector<8x8xf32> -> vector<8x16xf32>
    %c0_67 = arith.constant 0 : index
    %c0_68 = arith.constant 0 : index
    %242 = vector.load %arg16[%c0_67, %c0_68] : memref<16x128xf32, #tpu.memory_space<vmem>>, vector<16x128xf32>
    %cst_69 = arith.constant dense<0.000000e+00> : vector<8x128xf32>
    %243 = tpu.matmul %241, %242, %cst_69 {dimension_numbers = #tpu.dot_dimension_numbers<[1], [0], [0], [1], [0, 0, 1, 1], [], []>, precision = #tpu.contract_precision<fp32>} : vector<8x16xf32>, vector<16x128xf32>, vector<8x128xf32> -> vector<8x128xf32>
    %244 = vector.extract_strided_slice %243 {offsets = [0, 0], sizes = [8, 64], strides = [1, 1]} : vector<8x128xf32> to vector<8x64xf32>
    %245 = vector.extract_strided_slice %243 {offsets = [0, 64], sizes = [8, 64], strides = [1, 1]} : vector<8x128xf32> to vector<8x64xf32>
    %246 = arith.subf %228, %244 : vector<8x64xf32>
    %cst_70 = arith.constant 9.99999974E-6 : f32
    %247 = vector.broadcast %cst_70 : f32 to vector<8x64xf32>
    %248 = arith.addf %245, %247 : vector<8x64xf32>
    %249 = math.rsqrt %248 : vector<8x64xf32>
    %250 = arith.mulf %246, %249 : vector<8x64xf32>
    %c0_71 = arith.constant 0 : index
    %c0_72 = arith.constant 0 : index
    %251 = vector.load %arg3[%c0_71, %c0_72] : memref<2x64xf32, #tpu.memory_space<vmem>>, vector<1x64xf32>
    %252 = vector.broadcast %251 : vector<1x64xf32> to vector<8x64xf32>
    %253 = arith.mulf %250, %252 : vector<8x64xf32>
    %c1_73 = arith.constant 1 : index
    %c0_74 = arith.constant 0 : index
    %254 = vector.load %arg3[%c1_73, %c0_74] : memref<2x64xf32, #tpu.memory_space<vmem>>, vector<1x64xf32>
    %255 = vector.broadcast %254 : vector<1x64xf32> to vector<8x64xf32>
    %256 = arith.addf %253, %255 : vector<8x64xf32>
    %257 = vector.extract_strided_slice %77 {offsets = [0, 0], sizes = [8, 32], strides = [1, 1]} : vector<16x32xf32> to vector<8x32xf32>
    %258 = vector.extract_strided_slice %77 {offsets = [8, 0], sizes = [8, 32], strides = [1, 1]} : vector<16x32xf32> to vector<8x32xf32>
    %259 = tpu.concatenate %257, %258 in 1 : vector<8x32xf32>, vector<8x32xf32> -> vector<8x64xf32>
    %cst_75 = arith.constant 5.000000e-01 : f32
    %260 = vector.broadcast %cst_75 : f32 to vector<8x64xf32>
    %261 = arith.mulf %260, %259 : vector<8x64xf32>
    %262 = math.tanh %261 : vector<8x64xf32>
    %cst_76 = arith.constant 1.000000e+00 : f32
    %263 = vector.broadcast %cst_76 : f32 to vector<8x64xf32>
    %264 = arith.addf %262, %263 : vector<8x64xf32>
    %cst_77 = arith.constant 5.000000e-01 : f32
    %265 = vector.broadcast %cst_77 : f32 to vector<8x64xf32>
    %266 = arith.mulf %265, %264 : vector<8x64xf32>
    %267 = arith.mulf %259, %266 : vector<8x64xf32>
    %268 = arith.mulf %267, %256 : vector<8x64xf32>
    %269 = vector.extract_strided_slice %268 {offsets = [0, 0], sizes = [8, 32], strides = [1, 1]} : vector<8x64xf32> to vector<8x32xf32>
    %270 = vector.extract_strided_slice %268 {offsets = [0, 32], sizes = [8, 32], strides = [1, 1]} : vector<8x64xf32> to vector<8x32xf32>
    %271 = tpu.concatenate %269, %270 in 0 : vector<8x32xf32>, vector<8x32xf32> -> vector<16x32xf32>
    %c2 = arith.constant 2 : index
    %c0_78 = arith.constant 0 : index
    %272 = vector.load %arg2[%c2, %c0_78] : memref<7x32xf32, #tpu.memory_space<vmem>>, vector<1x32xf32>
    %c3 = arith.constant 3 : index
    %c0_79 = arith.constant 0 : index
    %273 = vector.load %arg2[%c3, %c0_79] : memref<7x32xf32, #tpu.memory_space<vmem>>, vector<1x32xf32>
    %cst_80 = arith.constant dense<0.000000e+00> : vector<16xf32>
    %274 = vector.multi_reduction <add>, %1, %cst_80 [1] : vector<16x32xf32> to vector<16xf32>
    %275 = vector.shape_cast %274 : vector<16xf32> to vector<16x1xf32>
    %cst_81 = arith.constant 3.200000e+01 : f32
    %276 = vector.broadcast %cst_81 : f32 to vector<16x1xf32>
    %277 = arith.divf %275, %276 : vector<16x1xf32>
    %278 = vector.broadcast %277 : vector<16x1xf32> to vector<16x32xf32>
    %279 = arith.subf %1, %278 : vector<16x32xf32>
    %280 = arith.mulf %279, %279 : vector<16x32xf32>
    %cst_82 = arith.constant dense<0.000000e+00> : vector<16xf32>
    %281 = vector.multi_reduction <add>, %280, %cst_82 [1] : vector<16x32xf32> to vector<16xf32>
    %282 = vector.shape_cast %281 : vector<16xf32> to vector<16x1xf32>
    %cst_83 = arith.constant 3.200000e+01 : f32
    %283 = vector.broadcast %cst_83 : f32 to vector<16x1xf32>
    %284 = arith.divf %282, %283 : vector<16x1xf32>
    %285 = vector.broadcast %277 : vector<16x1xf32> to vector<16x32xf32>
    %286 = arith.subf %1, %285 : vector<16x32xf32>
    %cst_84 = arith.constant 9.99999974E-6 : f32
    %287 = vector.broadcast %cst_84 : f32 to vector<16x1xf32>
    %288 = arith.addf %284, %287 : vector<16x1xf32>
    %289 = math.rsqrt %288 : vector<16x1xf32>
    %290 = vector.broadcast %289 : vector<16x1xf32> to vector<16x32xf32>
    %291 = arith.mulf %286, %290 : vector<16x32xf32>
    %292 = vector.broadcast %272 : vector<1x32xf32> to vector<16x32xf32>
    %293 = arith.mulf %291, %292 : vector<16x32xf32>
    %294 = vector.broadcast %273 : vector<1x32xf32> to vector<16x32xf32>
    %295 = arith.addf %293, %294 : vector<16x32xf32>
    %c1_i32_85 = arith.constant 1 : i32
    %296 = tpu.dynamic_rotate %295 by %c1_i32_85 dim 0 : vector<16x32xf32>, i32 -> vector<16x32xf32>
    %cst_86 = arith.constant 0.000000e+00 : f32
    %297 = vector.shape_cast %20 : vector<16x1xi1> to vector<16x1xi1>
    %298 = vector.broadcast %297 : vector<16x1xi1> to vector<16x32xi1>
    %299 = vector.broadcast %cst_86 : f32 to vector<16x32xf32>
    %300 = arith.select %298, %299, %296 : vector<16x32xi1>, vector<16x32xf32>
    %301 = arith.subf %300, %295 : vector<16x32xf32>
    %c5 = arith.constant 5 : index
    %c0_87 = arith.constant 0 : index
    %302 = vector.load %arg2[%c5, %c0_87] : memref<7x32xf32, #tpu.memory_space<vmem>>, vector<1x32xf32>
    %303 = vector.broadcast %302 : vector<1x32xf32> to vector<16x32xf32>
    %304 = arith.mulf %301, %303 : vector<16x32xf32>
    %305 = arith.addf %295, %304 : vector<16x32xf32>
    %c6 = arith.constant 6 : index
    %c0_88 = arith.constant 0 : index
    %306 = vector.load %arg2[%c6, %c0_88] : memref<7x32xf32, #tpu.memory_space<vmem>>, vector<1x32xf32>
    %307 = vector.broadcast %306 : vector<1x32xf32> to vector<16x32xf32>
    %308 = arith.mulf %301, %307 : vector<16x32xf32>
    %309 = arith.addf %295, %308 : vector<16x32xf32>
    %310 = tpu.concatenate %271, %305, %309 in 1 : vector<16x32xf32>, vector<16x32xf32>, vector<16x32xf32> -> vector<16x96xf32>
    %c0_89 = arith.constant 0 : index
    %c0_90 = arith.constant 0 : index
    %311 = vector.load %arg8[%c0_89, %c0_90] : memref<96x192xbf16, #tpu.memory_space<vmem>>, vector<96x192xbf16>
    %312 = arith.truncf %310 : vector<16x96xf32> to vector<16x96xbf16>
    %cst_91 = arith.constant dense<0.000000e+00> : vector<16x192xf32>
    %313 = tpu.matmul %312, %311, %cst_91 {dimension_numbers = #tpu.dot_dimension_numbers<[1], [0], [0], [1], [0, 0, 1, 1], [], []>} : vector<16x96xbf16>, vector<96x192xbf16>, vector<16x192xf32> -> vector<16x192xf32>
    %314 = vector.extract_strided_slice %313 {offsets = [0, 0], sizes = [16, 32], strides = [1, 1]} : vector<16x192xf32> to vector<16x32xf32>
    %315 = vector.extract_strided_slice %313 {offsets = [0, 32], sizes = [16, 32], strides = [1, 1]} : vector<16x192xf32> to vector<16x32xf32>
    %316 = vector.extract_strided_slice %313 {offsets = [0, 64], sizes = [16, 128], strides = [1, 1]} : vector<16x192xf32> to vector<16x128xf32>
    %cst_92 = arith.constant 0.000000e+00 : f32
    %317 = vector.broadcast %cst_92 : f32 to vector<16x128xf32>
    %318 = arith.maximumf %316, %317 : vector<16x128xf32>
    %319 = arith.mulf %318, %318 : vector<16x128xf32>
    %c0_93 = arith.constant 0 : index
    %c0_94 = arith.constant 0 : index
    %320 = vector.load %arg9[%c0_93, %c0_94] : memref<128x32xbf16, #tpu.memory_space<vmem>>, vector<128x32xbf16>
    %321 = arith.truncf %319 : vector<16x128xf32> to vector<16x128xbf16>
    %cst_95 = arith.constant dense<0.000000e+00> : vector<16x32xf32>
    %322 = tpu.matmul %321, %320, %cst_95 {dimension_numbers = #tpu.dot_dimension_numbers<[1], [0], [0], [1], [0, 0, 1, 1], [], []>} : vector<16x128xbf16>, vector<128x32xbf16>, vector<16x32xf32> -> vector<16x32xf32>
    %cst_96 = arith.constant 5.000000e-01 : f32
    %323 = vector.broadcast %cst_96 : f32 to vector<16x32xf32>
    %324 = arith.mulf %323, %315 : vector<16x32xf32>
    %325 = math.tanh %324 : vector<16x32xf32>
    %cst_97 = arith.constant 1.000000e+00 : f32
    %326 = vector.broadcast %cst_97 : f32 to vector<16x32xf32>
    %327 = arith.addf %325, %326 : vector<16x32xf32>
    %cst_98 = arith.constant 5.000000e-01 : f32
    %328 = vector.broadcast %cst_98 : f32 to vector<16x32xf32>
    %329 = arith.mulf %328, %327 : vector<16x32xf32>
    %330 = arith.mulf %329, %322 : vector<16x32xf32>
    %331 = arith.addf %314, %1 : vector<16x32xf32>
    %332 = arith.addf %331, %330 : vector<16x32xf32>
    %c0_99 = arith.constant 0 : index
    %c0_100 = arith.constant 0 : index
    %c0_101 = arith.constant 0 : index
    %333 = vector.load %arg17[%c0_99, %c0_100, %c0_101] : memref<1x16x32xf32, #tpu.memory_space<vmem>>, vector<1x16x32xf32>
    %334 = vector.shape_cast %333 : vector<1x16x32xf32> to vector<16x32xf32>
    %335 = vector.shape_cast %332 : vector<16x32xf32> to vector<1x16x32xf32>
    tpu.vector_store %arg17[%c0_99, %c0_100, %c0_101], %335 {strides = array<i32>} : memref<1x16x32xf32, #tpu.memory_space<vmem>>, vector<1x16x32xf32>,
    %c0_102 = arith.constant 0 : index
    %c0_103 = arith.constant 0 : index
    %c0_104 = arith.constant 0 : index
    %336 = vector.load %arg18[%c0_102, %c0_103, %c0_104] : memref<1x8x64xf32, #tpu.memory_space<vmem>>, vector<1x8x64xf32>
    %337 = vector.shape_cast %336 : vector<1x8x64xf32> to vector<8x64xf32>
    %338 = vector.shape_cast %227 : vector<8x64xf32> to vector<1x8x64xf32>
    tpu.vector_store %arg18[%c0_102, %c0_103, %c0_104], %338 {strides = array<i32>} : memref<1x8x64xf32, #tpu.memory_space<vmem>>, vector<1x8x64xf32>,
    return
  }
  func.func @transform_0(%arg0: i32) -> (i32, i32, i32) {
    %c0_i32 = arith.constant 0 : i32
    %c0_i32_0 = arith.constant 0 : i32
    %c0_i32_1 = arith.constant 0 : i32
    return %arg0, %c0_i32, %c0_i32_0 : i32, i32, i32
  }
  func.func @transform_1(%arg0: i32) -> (i32, i32) {
    %c0_i32 = arith.constant 0 : i32
    %c0_i32_0 = arith.constant 0 : i32
    %c0_i32_1 = arith.constant 0 : i32
    return %c0_i32, %c0_i32_0 : i32, i32
  }
  func.func @transform_2(%arg0: i32) -> (i32, i32) {
    %c0_i32 = arith.constant 0 : i32
    %c0_i32_0 = arith.constant 0 : i32
    %c0_i32_1 = arith.constant 0 : i32
    return %c0_i32, %c0_i32_0 : i32, i32
  }
  func.func @transform_3(%arg0: i32) -> (i32, i32) {
    %c0_i32 = arith.constant 0 : i32
    %c0_i32_0 = arith.constant 0 : i32
    %c0_i32_1 = arith.constant 0 : i32
    return %c0_i32, %c0_i32_0 : i32, i32
  }
  func.func @transform_4(%arg0: i32) -> (i32, i32) {
    %c0_i32 = arith.constant 0 : i32
    %c0_i32_0 = arith.constant 0 : i32
    %c0_i32_1 = arith.constant 0 : i32
    return %c0_i32, %c0_i32_0 : i32, i32
  }
  func.func @transform_5(%arg0: i32) -> (i32, i32) {
    %c0_i32 = arith.constant 0 : i32
    %c0_i32_0 = arith.constant 0 : i32
    %c0_i32_1 = arith.constant 0 : i32
    return %c0_i32, %c0_i32_0 : i32, i32
  }
  func.func @transform_6(%arg0: i32) -> (i32, i32) {
    %c0_i32 = arith.constant 0 : i32
    %c0_i32_0 = arith.constant 0 : i32
    %c0_i32_1 = arith.constant 0 : i32
    return %c0_i32, %c0_i32_0 : i32, i32
  }
  func.func @transform_7(%arg0: i32) -> (i32, i32) {
    %c0_i32 = arith.constant 0 : i32
    %c0_i32_0 = arith.constant 0 : i32
    %c0_i32_1 = arith.constant 0 : i32
    return %c0_i32, %c0_i32_0 : i32, i32
  }
  func.func @transform_8(%arg0: i32) -> (i32, i32) {
    %c0_i32 = arith.constant 0 : i32
    %c0_i32_0 = arith.constant 0 : i32
    %c0_i32_1 = arith.constant 0 : i32
    return %c0_i32, %c0_i32_0 : i32, i32
  }
  func.func @transform_9(%arg0: i32) -> (i32, i32) {
    %c0_i32 = arith.constant 0 : i32
    %c0_i32_0 = arith.constant 0 : i32
    %c0_i32_1 = arith.constant 0 : i32
    return %c0_i32, %c0_i32_0 : i32, i32
  }
  func.func @transform_10(%arg0: i32) -> (i32, i32) {
    %c0_i32 = arith.constant 0 : i32
    %c0_i32_0 = arith.constant 0 : i32
    %c0_i32_1 = arith.constant 0 : i32
    return %c0_i32, %c0_i32_0 : i32, i32
  }
  func.func @transform_11(%arg0: i32) -> (i32, i32) {
    %c0_i32 = arith.constant 0 : i32
    %c0_i32_0 = arith.constant 0 : i32
    %c0_i32_1 = arith.constant 0 : i32
    return %c0_i32, %c0_i32_0 : i32, i32
  }
  func.func @transform_12(%arg0: i32) -> (i32, i32) {
    %c0_i32 = arith.constant 0 : i32
    %c0_i32_0 = arith.constant 0 : i32
    %c0_i32_1 = arith.constant 0 : i32
    return %c0_i32, %c0_i32_0 : i32, i32
  }
  func.func @transform_13(%arg0: i32) -> (i32, i32) {
    %c0_i32 = arith.constant 0 : i32
    %c0_i32_0 = arith.constant 0 : i32
    %c0_i32_1 = arith.constant 0 : i32
    return %c0_i32, %c0_i32_0 : i32, i32
  }
  func.func @transform_14(%arg0: i32) -> (i32, i32) {
    %c0_i32 = arith.constant 0 : i32
    %c0_i32_0 = arith.constant 0 : i32
    %c0_i32_1 = arith.constant 0 : i32
    return %c0_i32, %c0_i32_0 : i32, i32
  }
  func.func @transform_15(%arg0: i32) -> (i32, i32) {
    %c0_i32 = arith.constant 0 : i32
    %c0_i32_0 = arith.constant 0 : i32
    %c0_i32_1 = arith.constant 0 : i32
    return %c0_i32, %c0_i32_0 : i32, i32
  }
  func.func @transform_16(%arg0: i32) -> (i32, i32, i32) {
    %c0_i32 = arith.constant 0 : i32
    %c0_i32_0 = arith.constant 0 : i32
    %c0_i32_1 = arith.constant 0 : i32
    return %arg0, %c0_i32, %c0_i32_0 : i32, i32, i32
  }
  func.func @transform_17(%arg0: i32) -> (i32, i32, i32) {
    %c0_i32 = arith.constant 0 : i32
    %c0_i32_0 = arith.constant 0 : i32
    %c0_i32_1 = arith.constant 0 : i32
    return %arg0, %c0_i32, %c0_i32_0 : i32, i32, i32
  }
}

</mosaic_0001>

<bundles_post_ra>
// kernel: squeeze.41
= control target key start
LH: loop header
LB: loop body
LE: loop exit
PB: predicated region body
PF: predicated region fallthrough
CT: control target
= control target key end

     0   :  { %s37_s8 = smov 104   ;;  %vm7_vm0 = vcmask 64512   ;;  %s38_s9 = smov 112   ;;  %s55_s0 = inlined_call_operand.vmem [shape: f32[32], index: 0, kind: input, shape index: {}]   ;;  %s56_s1 = inlined_call_operand.vmem [shape: f32[4,8], index: 1, kind: output, shape index: {}]  }
   0x1   :  { %v4_v0 = vld [vmem:[%s55_s0] sm:$0x1]  ;;  %s36_s0 = smov 120  }
   0x2   :  { %5 = vst [vmem:[#allocation1] sm:$0x1] %v4_v0 }
   0x9   :  { %v9_v1 = vld [vmem:[#allocation1] sm:$0x1]  }
   0xa   :  { %v21_v2 = vld [vmem:[#allocation1] sm:$0x1]   ;;  %10 = vrot.lane.b32.xlu0 %v9_v1, %s36_s0 }
   0xb   :  { %22 = vrot.lane.b32.xlu1 %v21_v2, %s37_s8  ;;  %v6_v3 = vld [vmem:[#allocation1] sm:$0x1]  }
   0xc   :  { %v15_v4 = vld [vmem:[#allocation1] sm:$0x1]   ;;  %8 = vst.msk [vmem:[#allocation0] sm:$0x1] %vm7_vm0, %v6_v3  }
   0xe   :  { %16 = vrot.lane.b32.xlu0 %v15_v4, %s38_s9 }
  0x7c   :  { %v11_v5 = vpop.permute.xlu0 %10  }
  0x7d   :  { %v23_v6 = vpop.permute.xlu1 %22   ;;  %14 = vst.msk [vmem:[#allocation0 + $0x1] sm:$0x1] %vm7_vm0, %v11_v5  }
  0x7e   :  { %26 = vst.msk [vmem:[#allocation0 + $0x3] sm:$0x1] %vm7_vm0, %v23_v6  }
  0x80   :  { %v17_v7 = vpop.permute.xlu0 %16  }
  0x81   :  { %20 = vst.msk [vmem:[#allocation0 + $0x2] sm:$0x1] %vm7_vm0, %v17_v7  }
  0x88   :  { %v30_v8 = vld [vmem:[#allocation0] sm:$0xf] }
  0x89   :  { %32 = vst [vmem:[%s56_s1] sm:$0xf] %v30_v8 }

// kernel: tile.23
= control target key start
LH: loop header
LB: loop body
LE: loop exit
PB: predicated region body
PF: predicated region fallthrough
CT: control target
= control target key end

     0   :  { %s22_s0 = inlined_call_operand.vmem [shape: f32[8], index: 0, kind: input, shape index: {}]   ;;  %s23_s1 = inlined_call_operand.vmem [shape: f32[8,8], index: 1, kind: output, shape index: {}]  }
   0x1   :  { %v4_v0 = vld [vmem:[%s22_s0] ss:$0 sm:$0xff] }
   0x2   :  { %5 = vst [vmem:[%s23_s1] sm:$0xff] %v4_v0 }

// kernel: tile.27
= control target key start
LH: loop header
LB: loop body
LE: loop exit
PB: predicated region body
PF: predicated region fallthrough
CT: control target
= control target key end

     0   :  { %s67_s10 = smov 56   ;;  %s68_s11 = smov 40   ;;  %vm3_vm0 = vcmask 64512   ;;  %vm9_vm1 = vcmask 523712   ;;  %vm15_vm2 = vcmask 458112   ;;  %vm21_vm3 = vcmask 392512   ;;  %s111_s0 = inlined_call_operand.vmem [shape: f32[8,8], index: 0, kind: input, shape index: {}]   ;;  %s112_s1 = inlined_call_operand.vmem [shape: f32[1,64], index: 1, kind: output, shape index: {}]  }
   0x1   :  { %v53_v0 = vld [vmem:[%s111_s0 + $0x7] sm:$0x1]   ;;  %v55_v1 = vld [vmem:[%s111_s0 + $0x5] sm:$0x1]   ;;  %v54_v2 = vld [vmem:[%s111_s0 + $0x6] sm:$0x1]  }
   0x2   :  { %7 = vrot.lane.b32.xlu0 %v53_v0, %s67_s10  ;;  %19 = vrot.lane.b32.xlu1 %v55_v1, %s68_s11  ;;  %v56_v3 = vld [vmem:[%s111_s0 + $0x4] sm:$0x1]   ;;  %v2_v4 = vld [vmem:[%s111_s0] sm:$0x1]   ;;  %s69_s18 = smov 48   ;;  %s70_s19 = smov 32  }
   0x3   :  { %4 = vst.msk [vmem:[#allocation0] sm:$0x1] %vm3_vm0, %v2_v4   ;;  %v57_v5 = vld [vmem:[%s111_s0 + $0x3] sm:$0x1]   ;;  %v58_v6 = vld [vmem:[%s111_s0 + $0x2] sm:$0x1]  }
   0x4   :  { %s71_s24 = smov 24   ;;  %s72_s25 = smov 16   ;;  %v59_v7 = vld [vmem:[%s111_s0 + $0x1] sm:$0x1]   ;;  %vm27_vm4 = vcmask 326912   ;;  %vm33_vm5 = vcmask 261312  }
   0x5   :  { %s73_s0 = smov 8   ;;  %vm39_vm6 = vcmask 195712   ;;  %vm45_vm7 = vcmask 130112  }
   0x6   :  { %13 = vrot.lane.b32.xlu0 %v54_v2, %s69_s18  ;;  %25 = vrot.lane.b32.xlu1 %v56_v3, %s70_s19 }
   0xa   :  { %31 = vrot.lane.b32.xlu0 %v57_v5, %s71_s24  ;;  %37 = vrot.lane.b32.xlu1 %v58_v6, %s72_s25 }
   0xe   :  { %43 = vrot.lane.b32.xlu0 %v59_v7, %s73_s0 }
  0x74   :  { %v8_v8 = vpop.permute.xlu0 %7   ;;  %v20_v9 = vpop.permute.xlu1 %19  }
  0x75   :  { %10 = vst.msk [vmem:[#allocation0] sm:$0x1] %vm9_vm1, %v8_v8  }
  0x78   :  { %v14_v10 = vpop.permute.xlu0 %13   ;;  %v26_v11 = vpop.permute.xlu1 %25  }
  0x79   :  { %16 = vst.msk [vmem:[#allocation0] sm:$0x1] %vm15_vm2, %v14_v10  }
  0x7a   :  { %22 = vst.msk [vmem:[#allocation0] sm:$0x1] %vm21_vm3, %v20_v9  }
  0x7b   :  { %28 = vst.msk [vmem:[#allocation0] sm:$0x1] %vm27_vm4, %v26_v11  }
  0x7c   :  { %v32_v12 = vpop.permute.xlu0 %31   ;;  %v38_v13 = vpop.permute.xlu1 %37  }
  0x7d   :  { %34 = vst.msk [vmem:[#allocation0] sm:$0x1] %vm33_vm5, %v32_v12  }
  0x7e   :  { %40 = vst.msk [vmem:[#allocation0] sm:$0x1] %vm39_vm6, %v38_v13  }
  0x80   :  { %v44_v14 = vpop.permute.xlu0 %43  }
  0x81   :  { %46 = vst.msk [vmem:[#allocation0] sm:$0x1] %vm45_vm7, %v44_v14  }
  0x88   :  { %v50_v15 = vld [vmem:[#allocation0] sm:$0x1] }
  0x89   :  { %52 = vst [vmem:[%s112_s1] sm:$0x1] %v50_v15 }

// kernel: tile.32
= control target key start
LH: loop header
LB: loop body
LE: loop exit
PB: predicated region body
PF: predicated region fallthrough
CT: control target
= control target key end

     0   :  { %vm42_vm0 = vcmask 1047556   ;;  %vm44_vm1 = vcmask 261120   ;;  %vm54_vm2 = vcmask 523520   ;;  %s111_s0 = inlined_call_operand.vmem [shape: f32[8,2,32], index: 0, kind: input, shape index: {}]   ;;  %s112_s1 = inlined_call_operand.vmem [shape: f32[8,64], index: 1, kind: output, shape index: {}]  }
   0x1   :  { %v62_v0 = vld [vmem:[%s111_s0 + $0xe] sm:$0x3]  ;;  %v63_v1 = vld [vmem:[%s111_s0 + $0xc] sm:$0x3]  ;;  %v64_v2 = vld [vmem:[%s111_s0 + $0xa] sm:$0x3] }
   0x2   :  { %8 = vst [vmem:[#allocation0 + $0x38] sm:$0x3] %v62_v0  ;;  %13 = vst [vmem:[#allocation0 + $0x30] sm:$0x3] %v63_v1  ;;  %v65_v3 = vld [vmem:[%s111_s0 + $0x8] sm:$0x3] }
   0x3   :  { %18 = vst [vmem:[#allocation0 + $0x28] sm:$0x3] %v64_v2  ;;  %v66_v4 = vld [vmem:[%s111_s0 + $0x6] sm:$0x3]  ;;  %v67_v5 = vld [vmem:[%s111_s0 + $0x4] sm:$0x3] }
   0x4   :  { %23 = vst [vmem:[#allocation0 + $0x20] sm:$0x3] %v65_v3  ;;  %28 = vst [vmem:[#allocation0 + $0x18] sm:$0x3] %v66_v4  ;;  %v68_v6 = vld [vmem:[%s111_s0 + $0x2] sm:$0x3] }
   0x5   :  { %33 = vst [vmem:[#allocation0 + $0x10] sm:$0x3] %v67_v5  ;;  %v38_v7 = vld [vmem:[%s111_s0] sm:$0x3]  ;;  %37 = vst [vmem:[#allocation0 + $0x8] sm:$0x3] %v68_v6 }
   0x6   :  { %39 = vst [vmem:[#allocation0] sm:$0x3] %v38_v7  ;;  %s70_s0 = smov 32  }
   0xb   :  { %v41_v8 = vld [vmem:[#allocation0] ss:$8 sm:$0xf0]   ;;  %v49_v9 = vld [vmem:[#allocation0 + $0x1] ss:$8 sm:$0xf0]  }
   0xd   :  { %v40_v10 = vld [vmem:[#allocation0] ss:$8 sm:$0xf]   ;;  %v47_v11 = vld [vmem:[#allocation0 + $0x1] ss:$8 sm:$0xf]  }
   0xe   :  { %v43_v12 = vsel %vm42_vm0, %v41_v8, %v40_v10  ;;  %v51_v13 = vsel %vm42_vm0, %v49_v9, %v47_v11 }
   0xf   :  { %52 = vrot.lane.b32.xlu0 %v51_v13, %s70_s0  ;;  %45 = vst.msk [vmem:[%s112_s1] sm:$0xff] %vm44_vm1, %v43_v12  }
  0x81   :  { %v53_v14 = vpop.permute.xlu0 %52  }
  0x82   :  { %55 = vst.msk [vmem:[%s112_s1] sm:$0xff] %vm54_vm2, %v53_v14  }

// kernel: block_forward.1
= control target key start
LH: loop header
LB: loop body
LE: loop exit
PB: predicated region body
PF: predicated region fallthrough
CT: control target
= control target key end

     0   :  { %s5584_s0 = inlined_call_operand.vmem [shape: f32[1,16,32], index: 0, kind: input, shape index: {}]   ;;  %s5585_s1 = inlined_call_operand.vmem [shape: f32[7,32], index: 1, kind: input, shape index: {}]   ;;  %s5586_s2 = inlined_call_operand.vmem [shape: f32[2,64], index: 2, kind: input, shape index: {}]   ;;  %s5587_s3 = inlined_call_operand.vmem [shape: f32[1,160], index: 3, kind: input, shape index: {}]   ;;  %s5588_s4 = inlined_call_operand.vmem [shape: bf16[32,40], index: 4, kind: input, shape index: {}]   ;;  %s5589_s5 = inlined_call_operand.vmem [shape: bf16[40,160], index: 5, kind: input, shape index: {}]   ;;  %s5590_s6 = inlined_call_operand.vmem [shape: bf16[128,128], index: 6, kind: input, shape index: {}]   ;;  %s5591_s7 = inlined_call_operand.vmem [shape: bf16[96,192], index: 7, kind: input, shape index: {}]   ;;  %s5592_s8 = inlined_call_operand.vmem [shape: bf16[128,32], index: 8, kind: input, shape index: {}]   ;;  %s5593_s9 = inlined_call_operand.vmem [shape: f32[8,64], index: 9, kind: input, shape index: {}]   ;;  %s5594_s10 = inlined_call_operand.vmem [shape: f32[8,64], index: 10, kind: input, shape index: {}]   ;;  %s5595_s11 = inlined_call_operand.vmem [shape: bf16[192,24], index: 11, kind: input, shape index: {}]   ;;  %s5596_s12 = inlined_call_operand.vmem [shape: f32[192,32], index: 12, kind: input, shape index: {}]   ;;  %s5597_s13 = inlined_call_operand.vmem [shape: bf16[32,32], index: 13, kind: input, shape index: {}]   ;;  %s5598_s14 = inlined_call_operand.vmem [shape: f32[128,16], index: 14, kind: input, shape index: {}]   ;;  %s5599_s15 = inlined_call_operand.vmem [shape: f32[16,128], index: 15, kind: input, shape index: {}]   ;;  %s5600_s16 = inlined_call_operand.hbm [shape: f32[1,16,32], index: 16, kind: output, shape index: {0}]   ;;  %s5601_s17 = inlined_call_operand.vmem [shape: f32[1,8,64], index: 17, kind: output, shape index: {1}]  }
   0x1   :  { %5624 = sst [smem:[#allocation16_spill]] %s5584_s0 }
   0x2   :  { %5625 = sst [smem:[#allocation17_spill]] %s5585_s1 }
   0x3   :  { %s5626_s26 = sld [smem:[#allocation16_spill]]  ;;  %vm90_vm0 = vcmask 261120  }
   0x9   :  { %v57_v0 = vld [vmem:[%s5626_s26] sm:$0xff]  ;;  %v58_v1 = vld [vmem:[%s5626_s26 + $0x8] sm:$0xff] }
   0xa   :  { %v91_v2 = vsel %vm90_vm0, %v57_v0, 0.0  ;;  %v94_v3 = vsel %vm90_vm0, %v58_v1, 0.0 }
   0xb   :  { %92 = vadd.xlane.f32.xlu0 %v91_v2 }
   0xf   :  { %95 = vadd.xlane.f32.xlu0 %v94_v3 }
  0x10   :  { %23 = vsyncpa [#allocation3], 0  ;;  %v4201_v14 = vld [vmem:[%s5588_s4] sm:$0xff]   ;;  %s4313_s30 = smov 96   ;;  %v4202_v15 = vld [vmem:[%s5588_s4 + $0x8] sm:$0xff]   ;;  %v5607_v16 = vmov 0.0   ;;  %v59_v23 = vlaneseq }
  0x11   :  { %3566 = vmatprep.subr.bf16.mxu0 %v5607_v16  ;;  %vm4315_vm1 = vmmov 0   ;;  %s5627_s20 = sld [smem:[#allocation17_spill]]  ;;  %s4316_s28 = smov 32   ;;  %vm251_vm5 = vcmask 1043456   ;;  %vm247_vm6 = vcmask 326656   ;;  %v4217_v44 = vld [vmem:[%s5590_s6 + $0x30] sm:$0xff]  }
  0x12   :  { %3567 = vmatpush3.bf16.msra.mxu0 %v4201_v14  ;;  %3570 = vmatprep.mubr.msk.bf16.mxu0 %vm4315_vm1, %v5607_v16  ;;  %v4436_v24 = vshrl.u32 %v59_v23, 7  ;;  %s4317_s29 = smov 64   ;;  %v4218_v45 = vld [vmem:[%s5590_s6 + $0x38] sm:$0xff]   ;;  %vm338_vm7 = vcmask 523264   ;;  %vm341_vm8 = vcmask 785408   ;;  %vm540_vm9 = vcmask 64512  }
  0x13   :  { %3568 = vmatprep.subr.bf16.mxu0 %v5607_v16  ;;  %vm696_vm10 = vcmask 195584   ;;  %vm1707_vm11 = vcmask 1040384   ;;  %vm1709_vm12 = vcmask 1041408   ;;  %vm1711_vm13 = vcmask 1042432   ;;  %s4320_s23 = smov 8   ;;  %s4321_s24 = smov [#allocation2]  }
  0x14   :  { %v61_v30 = vadd.s32 8, %v4436_v24  ;;  %v66_v37 = vand.u32 7, %v4436_v24  ;;  %vm132_vm3 = vcmp.lt.s32.totalorder %v4436_v24, 1  ;;  %vm1714_vm14 = vcmask 1044480  }
  0x15   :  { %vm1716_vm15 = vcmask 1045504  }
  0x16   :  { %3569 = vmatpush3.bf16.msra.mxu0 %v4202_v15  ;;  %v73_v38 = vand.u32 7, %v61_v30  ;;  %vm4458_vm2 = vcmp.eq.s32.totalorder %v66_v37, 0  ;;  %v4214_v30 = vld [vmem:[%s5590_s6 + $0x18] sm:$0xff]  }
  0x17   :  { %3574 = vmatprep.subr.bf16.mxu0 %v5607_v16  ;;  %v3250_v26 = vld [vmem:[%s5627_s20] ss:$0 sm:$0xff]  ;;  %v3339_v27 = vld [vmem:[%s5627_s20 + $0x2] ss:$0 sm:$0xff]  ;;  %v3251_v29 = vld [vmem:[%s5627_s20 + $0x1] ss:$0 sm:$0xff] }
  0x18   :  { %v3340_v34 = vld [vmem:[%s5627_s20 + $0x3] ss:$0 sm:$0xff]  ;;  %vm4463_vm4 = vcmp.eq.s32.totalorder %v73_v38, 0  ;;  %v3252_v52 = vld [vmem:[%s5627_s20 + $0x4] ss:$0 sm:$0xff] }
  0x19   :  { %v3341_v59 = vld [vmem:[%s5627_s20 + $0x5] ss:$0 sm:$0xff] }
  0x25   :  { %487 = vrot.lane.b32.xlu0 %v4201_v14, %s4313_s30 }
  0x98   :  { %v93_v4 = vpop.xlane.xlu0 %92 }
  0x99   :  { %v98_v5 = vmul.f32 0.03125, %v93_v4 }
  0x9b   :  { %v100_v6 = vsub.f32 %v57_v0, %v98_v5  ;;  %v3342_v0 = vld [vmem:[%s5627_s20 + $0x6] ss:$0 sm:$0xff] }
  0x9c   :  { %v96_v7 = vpop.xlane.xlu0 %95 }
  0x9d   :  { %v99_v8 = vmul.f32 0.03125, %v96_v7  ;;  %v102_v9 = vmul.f32 %v100_v6, %v100_v6 }
  0x9f   :  { %v101_v10 = vsub.f32 %v58_v1, %v99_v8  ;;  %v104_v11 = vsel %vm90_vm0, %v102_v9, 0.0 }
  0xa0   :  { %105 = vadd.xlane.f32.xlu1 %v104_v11 }
  0xa1   :  { %v103_v12 = vmul.f32 %v101_v10, %v101_v10 }
  0xa3   :  { %v107_v13 = vsel %vm90_vm0, %v103_v12, 0.0 }
  0xa4   :  { %108 = vadd.xlane.f32.xlu1 %v107_v13 }
  0xb5   :  { %489 = vrot.lane.b32.xlu1 %v4202_v15, %s4313_s30 }
 0x12d   :  { %v106_v17 = vpop.xlane.xlu1 %105 }
 0x12e   :  { %v110_v18 = vmul.f32 0.03125, %v106_v17  ;;  %v4203_v17 = vld [vmem:[%s5589_s5 + $0x4] ss:$8 sps:$4 sm:$0xff]  }
 0x12f   :  { %258 = vmatprep.subr.bf16.mxu1 %v4203_v17 }
 0x130   :  { %v112_v19 = vadd.f32 1e-05, %v110_v18  ;;  %v4205_v18 = vld [vmem:[%s5589_s5] ss:$8 sps:$4 sm:$0xff]  }
 0x131   :  { %v109_v20 = vpop.xlane.xlu1 %108  ;;  %259 = vmatpush1.bf16.msra.mxu1 %v4205_v18 }
 0x132   :  { %4259 = vrsqrt.f32 %v112_v19  ;;  %v111_v21 = vmul.f32 0.03125, %v109_v20  ;;  %v4206_v19 = vld [vmem:[%s5589_s5 + $0x14] ss:$8 sps:$4 sm:$0xff]   ;;  %v220_v20 = vld [vmem:[%s5589_s5 + $0x20] sm:$0xff] }
 0x133   :  { %260 = vmatprep.subr.bf16.mxu1 %v4206_v19  ;;  %v3261_v23 = vcombine.high %v220_v20, %v220_v20 }
 0x134   :  { %v113_v22 = vadd.f32 1e-05, %v111_v21  ;;  %v4208_v21 = vld [vmem:[%s5589_s5 + $0x10] ss:$8 sps:$4 sm:$0xff]  }
 0x135   :  { %261 = vmatpush1.bf16.msra.mxu1 %v4208_v21 }
 0x136   :  { %4261 = vrsqrt.f32 %v113_v22  ;;  %v5604_v22 = vmov 0   ;;  %3262 = vmatprep.subr.msk.bf16.mxu1 %vm251_vm5, %v3261_v23 }
 0x137   :  { %290 = vmatprep.mubr.bf16.mxu1 %v5604_v22 }
 0x13c   :  { %v4260_v25 = vpop.eup %4259 }
 0x13d   :  { %v116_v28 = vmul.f32 %v4260_v25, %v100_v6  ;;  %v3260_v25 = vcombine.low %v220_v20, %v220_v20 }
 0x13f   :  { %v122_v31 = vmul.f32 %v3250_v26, %v116_v28  ;;  %v2900_v32 = vmul.f32 %v3339_v27, %v116_v28  ;;  %v4212_v28 = vld [vmem:[%s5590_s6 + $0x8] sm:$0xff]  }
 0x140   :  { %v4262_v33 = vpop.eup %4261 }
 0x141   :  { %v4451_v35 = vadd.f32 %v3251_v29, %v122_v31  ;;  %v117_v36 = vmul.f32 %v4262_v33, %v101_v10  ;;  %v2906_v41 = vadd.f32 %v3340_v34, %v2900_v32  ;;  %v4215_v31 = vld [vmem:[%s5590_s6 + $0x20] sm:$0xff]  }
 0x143   :  { %v123_v39 = vmul.f32 %v3250_v26, %v117_v36  ;;  %v2901_v40 = vmul.f32 %v3339_v27, %v117_v36  ;;  %318 = vrot.lane.b32.xlu0 %v4451_v35, %s4316_s28  ;;  %v130_v46 = vrot.slane %v4451_v35, 7  ;;  %v2908_v48 = vrot.slane %v2906_v41, 7  ;;  %v4211_v27 = vld [vmem:[%s5590_s6] sm:$0xff]  }
 0x144   :  { %v253_v26 = vsel %vm251_vm5, %v3260_v25, 0 }
 0x145   :  { %v4456_v42 = vadd.f32 %v3251_v29, %v123_v39  ;;  %v2907_v43 = vadd.f32 %v3340_v34, %v2901_v40  ;;  %263 = vmatpush1.bf16.msra.mxu1 %v253_v26  ;;  %v4213_v29 = vld [vmem:[%s5590_s6 + $0x10] sm:$0xff]   ;;  %v488_v40 = vpop.permute.xlu0 %487 }
 0x146   :  { %3594 = vmatprep.subr.bf16.mxu1 %v5607_v16 }
 0x147   :  { %324 = vrot.lane.b32.xlu0 %v4451_v35, %s4317_s29  ;;  %320 = vrot.lane.b32.xlu1 %v4456_v42, %s4316_s28  ;;  %v131_v47 = vrot.slane %v4456_v42, 7  ;;  %v2909_v49 = vrot.slane %v2907_v43, 7 }
 0x149   :  { %v134_v50 = vsel %vm132_vm3, %v131_v47, %v130_v46  ;;  %v133_v51 = vsel %vm132_vm3, %v130_v46, %v131_v47  ;;  %v2910_v53 = vsel %vm132_vm3, %v2908_v48, %v2909_v49  ;;  %v2911_v54 = vsel %vm132_vm3, %v2909_v49, %v2908_v48 }
 0x14a   :  { %v139_v55 = vsel %vm4458_vm2, 0.0, %v134_v50  ;;  %v140_v56 = vsel %vm4463_vm4, 0.0, %v133_v51  ;;  %v2912_v57 = vsel %vm4458_vm2, 0.0, %v2911_v54  ;;  %v2913_v58 = vsel %vm4463_vm4, 0.0, %v2910_v53 }
 0x14b   :  { %326 = vrot.lane.b32.xlu1 %v4456_v42, %s4317_s29  ;;  %v4490_v60 = vsub.f32 %v139_v55, %v4451_v35  ;;  %v4493_v61 = vsub.f32 %v140_v56, %v4456_v42  ;;  %v2914_v62 = vsub.f32 %v2912_v57, %v2906_v41  ;;  %v2915_v63 = vsub.f32 %v2913_v58, %v2907_v43  ;;  %v152_v55 = vld [vmem:[%s5587_s3] sm:$0x3] }
 0x14c   :  { %v5605_v54 = vsub.s32 0, %v4436_v24  ;;  %v5606_v56 = vsub.s32 1, %v4436_v24  ;;  %vm1718_vm2 = vcmask 1046528   ;;  %vm2394_vm3 = vcmask 130048  }
 0x14d   :  { %352 = vrot.lane.b32.xlu0 %v4490_v60, %s4317_s29  ;;  %v148_v1 = vmul.f32 %v3252_v52, %v4490_v60  ;;  %v149_v2 = vmul.f32 %v3252_v52, %v4493_v61  ;;  %v2921_v3 = vmul.f32 %v3341_v59, %v2914_v62  ;;  %v2922_v4 = vmul.f32 %v3341_v59, %v2915_v63 }
 0x14e   :  { %v2930_v5 = vmul.f32 %v3342_v0, %v2914_v62  ;;  %v2931_v6 = vmul.f32 %v3342_v0, %v2915_v63  ;;  %v305_v62 = vrot.slane %v152_v55, %v5605_v54  ;;  %v309_v63 = vrot.slane %v152_v55, %v5606_v56  ;;  %v4641_v55 = vld [vmem:[%s5595_s11 + $0x40] sm:$0xff]  }
 0x14f   :  { %346 = vrot.lane.b32.xlu1 %v4490_v60, %s4316_s28  ;;  %v150_v7 = vadd.f32 %v148_v1, %v4451_v35  ;;  %v151_v8 = vadd.f32 %v149_v2, %v4456_v42  ;;  %v4506_v9 = vadd.f32 %v2921_v3, %v2906_v41  ;;  %v4508_v10 = vadd.f32 %v2922_v4, %v2907_v43 }
 0x150   :  { %v4510_v11 = vadd.f32 %v2930_v5, %v2906_v41  ;;  %v4512_v12 = vadd.f32 %v2931_v6, %v2907_v43  ;;  %v490_v41 = vpop.permute.xlu1 %489  ;;  %v4216_v43 = vld [vmem:[%s5590_s6 + $0x28] sm:$0xff]   ;;  %s3235_s6 = sshll.u32 %s4321_s24, 4  ;;  %s3236_s6 = int_to_ptr.vmem [resolvable:$true] %s3235_s6 }
 0x151   :  { %5632 = vst [vmem:[#allocation5_spill] sm:$0xff] %v4506_v9  ;;  %5633 = vst [vmem:[#allocation6_spill] sm:$0xff] %v4508_v10  ;;  %358 = vrot.lane.b32.xlu0 %v4490_v60, %s4313_s30  ;;  %v157_v13 = vpack.c.bf16 %v151_v8, %v150_v7  ;;  %p4294_p1 = scmp.lt.s32.totalorder %s3236_s6, %s3236_s6 }
 0x152   :  { %5634 = vst [vmem:[#allocation7_spill] sm:$0xff] %v4510_v11  ;;  %5635 = vst [vmem:[#allocation8_spill] sm:$0xff] %v4512_v12  ;;  %v1607_v11 = vsub.s32 2, %v4436_v24 }
 0x153   :  { %348 = vrot.lane.b32.xlu1 %v4493_v61, %s4316_s28  ;;  %3571 = vmatmul.mubr.msk.bf16.vlgmr.msra.gmra.mrb[0].mxu0 %vm90_vm0, %v157_v13 }
 0x154   :  { %3590 = vmatprep.mubr.msk.bf16.mxu0 %vm4315_vm1, %v5607_v16  ;;  %3575 = vmatpush3.bf16.msra.mxu0 %v4211_v27 }
 0x155   :  { %330 = vrot.lane.b32.xlu0 %v4451_v35, %s4313_s30  ;;  %3576 = vmatprep.subr.bf16.mxu0 %v5607_v16 }
 0x157   :  { %354 = vrot.lane.b32.xlu1 %v4493_v61, %s4317_s29 }
 0x158   :  { %3577 = vmatpush3.bf16.msra.mxu0 %v4212_v28 }
 0x159   :  { %3578 = vmatprep.subr.bf16.mxu0 %v5607_v16 }
 0x15b   :  { %360 = vrot.lane.b32.xlu1 %v4493_v61, %s4313_s30 }
 0x15c   :  { %3579 = vmatpush3.bf16.msra.mxu0 %v4213_v29 }
 0x15d   :  { %3580 = vmatprep.subr.bf16.mxu0 %v5607_v16 }
 0x15f   :  { %332 = vrot.lane.b32.xlu1 %v4456_v42, %s4313_s30 }
 0x160   :  { %3581 = vmatpush3.bf16.msra.mxu0 %v4214_v30 }
 0x161   :  { %3582 = vmatprep.subr.bf16.mxu0 %v5607_v16 }
 0x164   :  { %3583 = vmatpush3.bf16.msra.mxu0 %v4215_v31 }
 0x165   :  { %3584 = vmatprep.subr.bf16.mxu0 %v5607_v16 }
 0x168   :  { %3585 = vmatpush3.bf16.msra.mxu0 %v4216_v43 }
 0x169   :  { %3586 = vmatprep.subr.bf16.mxu0 %v5607_v16 }
 0x16c   :  { %3587 = vmatpush3.bf16.msra.mxu0 %v4217_v44 }
 0x16d   :  { %3588 = vmatprep.subr.bf16.mxu0 %v5607_v16 }
 0x170   :  { %3589 = vmatpush3.bf16.msra.mxu0 %v4218_v45 }
 0x1b5   :  { %v319_v49 = vpop.permute.xlu0 %318 }
 0x1b6   :  { %v336_v13 = vsel %vm90_vm0, %v4451_v35, %v319_v49 }
 0x1b9   :  { %v321_v46 = vpop.permute.xlu1 %320  ;;  %v325_v51 = vpop.permute.xlu0 %324 }
 0x1ba   :  { %v337_v23 = vsel %vm90_vm0, %v4456_v42, %v321_v46  ;;  %v339_v28 = vsel %vm338_vm7, %v336_v13, %v325_v51 }
 0x1bd   :  { %v327_v47 = vpop.permute.xlu1 %326 }
 0x1be   :  { %v340_v29 = vsel %vm338_vm7, %v337_v23, %v327_v47 }
 0x1bf   :  { %v353_v52 = vpop.permute.xlu0 %352 }
 0x1c1   :  { %v347_v48 = vpop.permute.xlu1 %346 }
 0x1c2   :  { %v364_v57 = vsel %vm90_vm0, %v4490_v60, %v347_v48 }
 0x1c3   :  { %v359_v58 = vpop.permute.xlu0 %358  ;;  %v366_v0 = vsel %vm338_vm7, %v364_v57, %v353_v52  ;;  %v3274_v57 = vld [vmem:[%s5587_s3 + $0x1] ss:$0 sm:$0xff] }
 0x1c4   :  { %v368_v4 = vsel %vm341_vm8, %v366_v0, %v359_v58 }
 0x1c5   :  { %v349_v50 = vpop.permute.xlu1 %348 }
 0x1c6   :  { %v365_v5 = vsel %vm90_vm0, %v4493_v61, %v349_v50 }
 0x1c7   :  { %v331_v6 = vpop.permute.xlu0 %330 }
 0x1c8   :  { %v342_v31 = vsel %vm341_vm8, %v339_v28, %v331_v6  ;;  %v4223_v28 = vld [vmem:[%s5595_s11 + $0x10] sm:$0xff]  }
 0x1c9   :  { %v355_v53 = vpop.permute.xlu1 %354 }
 0x1ca   :  { %v367_v17 = vsel %vm338_vm7, %v365_v5, %v355_v53  ;;  %v4219_v53 = vld [vmem:[%s5595_s11] sm:$0xff]  }
 0x1cd   :  { %v361_v59 = vpop.permute.xlu1 %360 }
 0x1ce   :  { %v369_v25 = vsel %vm341_vm8, %v367_v17, %v361_v59 }
 0x1d1   :  { %v333_v18 = vpop.permute.xlu1 %332 }
 0x226   :  { %v207_v32 = vpop.f32.mrb[0].mxu0 }
 0x227   :  { %v3572_v33 = vpop.f32.mrb[1].mxu0  ;;  %4263 = vtanh.f32 %v207_v32  ;;  %v343_v32 = vsel %vm341_vm8, %v340_v29, %v333_v18  ;;  %v4229_v29 = vld [vmem:[%s5595_s11 + $0x50] sm:$0xff]  }
 0x228   :  { %v210_v34 = vpop.f32.mrb[2].mxu0 }
 0x229   :  { %4265 = vtanh.f32 %v210_v34  ;;  %v3573_v36 = vpop.f32.mrb[3].mxu0 }
 0x231   :  { %v4264_v37 = vpop.eup %4263 }
 0x233   :  { %v4266_v38 = vpop.eup %4265 }
 0x234   :  { %v221_v39 = vpack.c.bf16 %v4266_v38, %v4264_v37 }
 0x236   :  { %3263 = vmatmul.mubr.msk.bf16.vlgmr.msra.gmra.mrb[0].mxu1 %vm247_vm6, %v221_v39 }
 0x237   :  { %3595 = vmatpush3.bf16.msra.mxu1 %v488_v40  ;;  %3598 = vmatprep.mubr.msk.bf16.mxu1 %vm4315_vm1, %v5607_v16  ;;  %v480_v40 = vld [vmem:[%s5589_s5 + $0x24] sm:$0xf] }
 0x238   :  { %3596 = vmatprep.subr.bf16.mxu1 %v5607_v16 }
 0x23b   :  { %3597 = vmatpush3.bf16.msra.mxu1 %v490_v41 }
 0x23c   :  { %3602 = vmatprep.subr.bf16.mxu1 %v5607_v16 }
 0x309   :  { %v292_v1 = vpop.f32.mrb[0].mxu1 }
 0x30a   :  { %v312_v2 = vadd.f32 %v305_v62, %v292_v1  ;;  %v294_v3 = vpop.f32.mrb[1].mxu1 }
 0x30b   :  { %v313_v7 = vadd.f32 %v309_v63, %v294_v3  ;;  %v296_v8 = vpop.f32.mrb[2].mxu1 }
 0x30c   :  { %v370_v19 = vmul.f32 %v368_v4, %v312_v2  ;;  %v314_v20 = vadd.f32 %v305_v62, %v296_v8  ;;  %v298_v21 = vpop.f32.mrb[3].mxu1 }
 0x30d   :  { %v481_v26 = vmul.f32 %v313_v7, %v4490_v60  ;;  %v315_v27 = vadd.f32 %v309_v63, %v298_v21 }
 0x30e   :  { %v371_v30 = vmul.f32 %v369_v25, %v314_v20  ;;  %v372_v34 = vadd.f32 %v370_v19, %v342_v31  ;;  %v4654_v20 = vld [vmem:[%s5597_s13] sm:$0xff]   ;;  %v4220_v25 = vld [vmem:[%s5595_s11 + $0x8] sm:$0xff]  }
 0x30f   :  { %v482_v33 = vmul.f32 %v315_v27, %v4493_v61  ;;  %v483_v37 = vadd.f32 %v481_v26, %v4451_v35  ;;  %v545_v61 = vsel %vm251_vm5, %v480_v40, 0  ;;  %v4222_v26 = vld [vmem:[%s5595_s11 + $0x48] sm:$0xff]   ;;  %v4736_v40 = vld [vmem:[%s5596_s12 + $0x80] sm:$0xff] }
 0x310   :  { %v373_v36 = vadd.f32 %v371_v30, %v343_v32  ;;  %v4679_v31 = vld [vmem:[%s5597_s13 + $0x8] sm:$0xff]  }
 0x311   :  { %v484_v38 = vadd.f32 %v482_v33, %v4456_v42  ;;  %v4224_v33 = vld [vmem:[%s5595_s11 + $0x18] sm:$0xff]  }
 0x312   :  { %v390_v39 = vpack.c.bf16 %v373_v36, %v372_v34  ;;  %v4230_v34 = vld [vmem:[%s5595_s11 + $0x58] sm:$0xff]   ;;  %v4225_v36 = vld [vmem:[%s5595_s11 + $0x20] sm:$0xff]  }
 0x313   :  { %v486_v60 = vpack.c.bf16 %v484_v38, %v483_v37  ;;  %v4226_v37 = vld [vmem:[%s5595_s11 + $0x28] sm:$0xff]   ;;  %v4227_v38 = vld [vmem:[%s5595_s11 + $0x30] sm:$0xff]  }
 0x314   :  { %3591 = vmatmul.mubr.bf16.vlgmr.msra.gmra.mrb[4].mxu0 %v390_v39  ;;  %v4228_v39 = vld [vmem:[%s5595_s11 + $0x38] sm:$0xff]  }
 0x315   :  { %3599 = vmatmul.mubr.msk.bf16.vlgmr.msra.gmra.mrb[4].mxu1 %vm90_vm0, %v486_v60  ;;  %3612 = vmatprep.mubr.msk.bf16.mxu0 %vm696_vm10, %v4219_v53  ;;  %v4731_v60 = vld [vmem:[%s5596_s12 + $0x90] sm:$0xff] }
 0x316   :  { %3604 = vmatprep.mubr.msk.bf16.mxu1 %vm4315_vm1, %v5607_v16  ;;  %3603 = vmatpush3.bf16.msra.mxu1 %v545_v61 }
 0x3e7   :  { %v4623_v41 = vpop.f32.mrb[4].mxu0 }
 0x3e8   :  { %v530_v35 = vpop.f32.mrb[4].mxu1  ;;  %607 = vrot.lane.b32.xlu0 %v4623_v41, %s4313_s30  ;;  %v3592_v42 = vpop.f32.mrb[5].mxu0 }
 0x3e9   :  { %v4627_v43 = vpop.f32.mrb[6].mxu0  ;;  %v3600_v44 = vpop.f32.mrb[5].mxu1  ;;  %4267 = vtanh.f32 %v530_v35  ;;  %v4741_v35 = vld [vmem:[%s5596_s12 + $0x10] sm:$0xff]  ;;  %v4746_v42 = vld [vmem:[%s5596_s12 + $0x18] sm:$0xff] }
 0x3ea   :  { %5636 = vst [vmem:[#allocation9_spill] sm:$0xff] %v4627_v43  ;;  %v533_v45 = vpop.f32.mrb[6].mxu1  ;;  %1107 = vrot.lane.b32.xlu1 %v4627_v43, %s4313_s30  ;;  %v3593_v46 = vpop.f32.mrb[7].mxu0 }
 0x3eb   :  { %4269 = vtanh.f32 %v533_v45  ;;  %v3601_v47 = vpop.f32.mrb[7].mxu1  ;;  %v4751_v45 = vld [vmem:[%s5596_s12 + $0x98] sm:$0xff] }
 0x3ec   :  { %1565 = vrot.lane.b32.xlu0 %v4623_v41, %s4317_s29  ;;  %v4756_v47 = vld [vmem:[%s5596_s12] sm:$0xff] }
 0x3f3   :  { %v4268_v48 = vpop.eup %4267 }
 0x3f5   :  { %v4270_v49 = vpop.eup %4269 }
 0x3f6   :  { %v539_v50 = vpack.c.bf16 %v4270_v49, %v4268_v48  ;;  %v4761_v48 = vld [vmem:[%s5596_s12 + $0x8] sm:$0xff] }
 0x3f8   :  { %3605 = vmatmul.mubr.msk.bf16.vlgmr.msra.gmra.mrb[8].mxu1 %vm540_vm9, %v539_v50 }
 0x3f9   :  { %3628 = vmatprep.mubr.msk.bf16.mxu1 %vm696_vm10, %v4641_v55 }
 0x45a   :  { %v608_v51 = vpop.permute.xlu0 %607 }
 0x45b   :  { %v634_v52 = vpack.c.bf16 %v608_v51, %v4623_v41  ;;  %v4769_v51 = vld [vmem:[%s5596_s12 + $0x88] sm:$0xff] }
 0x45c   :  { %v4649_v18 = vpop.permute.xlu1 %1107 }
 0x45d   :  { %3608 = vmatprep.subr.bf16.mxu0 %v634_v52  ;;  %4154 = vmatprep.subr.bf16.mxu1 %v634_v52  ;;  %v1110_v21 = vpack.c.bf16 %v4649_v18, %v4627_v43  ;;  %v1624_v43 = vsub.s32 3, %v4436_v24 }
 0x45e   :  { %3609 = vmatpush3.bf16.msra.mxu0 %v634_v52  ;;  %4156 = vmatpush3.bf16.msra.mxu1 %v634_v52 }
 0x4cb   :  { %v581_v58 = vpop.f32.mrb[8].mxu1 }
 0x4cc   :  { %v594_v59 = vadd.f32 %v3274_v57, %v581_v58  ;;  %v3606_v62 = vpop.f32.mrb[9].mxu1 }
 0x4cd   :  { %v584_v63 = vpop.f32.mrb[10].mxu1 }
 0x4ce   :  { %v596_v0 = vmul.f32 1.442695, %v594_v59  ;;  %v595_v1 = vadd.f32 %v3274_v57, %v584_v63  ;;  %v3607_v2 = vpop.f32.mrb[11].mxu1 }
 0x4d0   :  { %4271 = vpow2.f32 %v596_v0  ;;  %v598_v3 = vmul.f32 1.442695, %v595_v1 }
 0x4d2   :  { %4273 = vpow2.f32 %v598_v3 }
 0x4da   :  { %v4272_v4 = vpop.eup %4271 }
 0x4db   :  { %v600_v5 = vsub.f32 0.0, %v4272_v4 }
 0x4dc   :  { %v4274_v6 = vpop.eup %4273 }
 0x4dd   :  { %v602_v7 = vmul.f32 1.442695, %v600_v5  ;;  %v601_v8 = vsub.f32 0.0, %v4274_v6 }
 0x4df   :  { %4275 = vpow2.f32 %v602_v7  ;;  %v604_v13 = vmul.f32 1.442695, %v601_v8  ;;  %v4791_v7 = vld [vmem:[%s5596_s12 + $0xb0] sm:$0xff]  ;;  %v4796_v8 = vld [vmem:[%s5596_s12 + $0xa0] sm:$0xff] }
 0x4e1   :  { %4277 = vpow2.f32 %v604_v13 }
 0x4e9   :  { %v4276_v17 = vpop.eup %4275 }
 0x4ea   :  { %v635_v19 = vpack.c.bf16 %v4276_v17, %v4276_v17  ;;  %v4801_v17 = vld [vmem:[%s5596_s12 + $0x30] sm:$0xff] }
 0x4eb   :  { %v4278_v27 = vpop.eup %4277 }
 0x4ec   :  { %4178 = vmatprep.subr.msk.bf16.mxu0 %vm251_vm5, %v635_v19  ;;  %4179 = vmatprep.subr.msk.bf16.mxu1 %vm251_vm5, %v635_v19  ;;  %v734_v23 = vsel %vm251_vm5, %v635_v19, 0  ;;  %v1111_v30 = vpack.c.bf16 %v4278_v27, %v4278_v27  ;;  %v4807_v19 = vld [vmem:[%s5596_s12 + $0x38] sm:$0xff]  ;;  %v4821_v27 = vld [vmem:[%s5596_s12 + $0x28] sm:$0xff] }
 0x4ed   :  { %3611 = vmatpush3.bf16.msra.mxu0 %v734_v23  ;;  %4157 = vmatpush3.bf16.msra.mxu1 %v734_v23  ;;  %v4812_v23 = vld [vmem:[%s5596_s12 + $0xb8] sm:$0xff] }
 0x4ee   :  { %3664 = vmatprep.subr.bf16.mxu1 %v1110_v21  ;;  %3636 = vmatprep.subr.bf16.mxu0 %v4654_v20  ;;  %v1113_v32 = vsel %vm251_vm5, %v1111_v30, 0 }
 0x4f0   :  { %3613 = vmatmul.mubr.msk.bf16.vlgmr.msra.gmra.mrb[8].mxu0 %vm696_vm10, %v4220_v25  ;;  %3629 = vmatmul.mubr.msk.bf16.vlgmr.msra.gmra.mrb[12].mxu1 %vm696_vm10, %v4222_v26 }
 0x4f1   :  { %3665 = vmatpush3.bf16.msra.mxu1 %v1110_v21  ;;  %3616 = vmatprep.mubr.msk.bf16.mxu0 %vm696_vm10, %v4223_v28 }
 0x4f2   :  { %4180 = vmatprep.subr.msk.bf16.mxu1 %vm251_vm5, %v1111_v30  ;;  %3632 = vmatprep.mubr.msk.bf16.mxu1 %vm696_vm10, %v4229_v29  ;;  %v4829_v30 = vld [vmem:[%s5596_s12 + $0xa8] sm:$0xff] }
 0x4f3   :  { %3637 = vmatpush3.bf16.msra.mxu0 %v4654_v20 }
 0x4f4   :  { %3638 = vmatprep.subr.bf16.mxu0 %v4679_v31 }
 0x4f5   :  { %3667 = vmatpush3.bf16.msra.mxu1 %v1113_v32 }
 0x4f7   :  { %3639 = vmatpush3.bf16.msra.mxu0 %v4679_v31 }
 0x4f8   :  { %3617 = vmatmul.mubr.msk.bf16.gmra.mrb[12].mxu0 %vm696_vm10, %v4224_v33  ;;  %3633 = vmatmul.mubr.msk.bf16.gmra.mrb[16].mxu1 %vm696_vm10, %v4230_v34 }
 0x4f9   :  { %3620 = vmatprep.mubr.msk.bf16.mxu0 %vm696_vm10, %v4225_v36  ;;  %3668 = vmatprep.mubr.msk.bf16.mxu1 %vm696_vm10, %v4219_v53 }
 0x4fa   :  { %3692 = vmatprep.subr.bf16.mxu0 %v4654_v20 }
 0x500   :  { %3621 = vmatmul.mubr.msk.bf16.gmra.mrb[16].mxu0 %vm696_vm10, %v4226_v37  ;;  %3669 = vmatmul.mubr.msk.bf16.vlgmr.msra.gmra.mrb[20].mxu1 %vm696_vm10, %v4220_v25 }
 0x501   :  { %3624 = vmatprep.mubr.msk.bf16.mxu0 %vm696_vm10, %v4227_v38  ;;  %3672 = vmatprep.mubr.msk.bf16.mxu1 %vm696_vm10, %v4223_v28 }
 0x508   :  { %3625 = vmatmul.mubr.msk.bf16.gmra.mrb[20].mxu0 %vm696_vm10, %v4228_v39  ;;  %3673 = vmatmul.mubr.msk.bf16.gmra.mrb[24].mxu1 %vm696_vm10, %v4224_v33 }
 0x509   :  { %3676 = vmatprep.mubr.msk.bf16.mxu1 %vm696_vm10, %v4225_v36 }
 0x510   :  { %3677 = vmatmul.mubr.msk.bf16.gmra.mrb[28].mxu1 %vm696_vm10, %v4226_v37 }
 0x511   :  { %3680 = vmatprep.mubr.msk.bf16.mxu1 %vm696_vm10, %v4227_v38 }
 0x518   :  { %3681 = vmatmul.mubr.msk.bf16.gmra.mrb[32].mxu1 %vm696_vm10, %v4228_v39 }
 0x519   :  { %3684 = vmatprep.mubr.msk.bf16.mxu1 %vm696_vm10, %v4641_v55 }
 0x520   :  { %3685 = vmatmul.mubr.msk.bf16.gmra.mrb[36].mxu1 %vm696_vm10, %v4222_v26  ;;  %v869_v26 = vld [vmem:[%s5596_s12 + $0x20] sm:$0xff] }
 0x521   :  { %3688 = vmatprep.mubr.msk.bf16.mxu1 %vm696_vm10, %v4229_v29 }
 0x528   :  { %3689 = vmatmul.mubr.msk.bf16.gmra.mrb[40].mxu1 %vm696_vm10, %v4230_v34 }
 0x529   :  { %3752 = vmatprep.mubr.msk.f32.mxu1 %vm4315_vm1, %v5607_v16 }
 0x5c3   :  { %v3614_v61 = vpop.f32.mrb[8].mxu0  ;;  %v3630_v44 = vpop.f32.mrb[12].mxu1 }
 0x5c4   :  { %v770_v46 = vpop.f32.mrb[9].mxu0  ;;  %v4764_v49 = vmul.f32 %v3630_v44, %v4731_v60  ;;  %v834_v50 = vpop.f32.mrb[13].mxu1  ;;  %v891_v57 = vmul.f32 %v3614_v61, %v4741_v35 }
 0x5c5   :  { %v3615_v52 = vpop.f32.mrb[10].mxu0  ;;  %v4772_v53 = vmul.f32 %v4736_v40, %v834_v50  ;;  %v3631_v55 = vpop.f32.mrb[14].mxu1  ;;  %v889_v0 = vmul.f32 %v4756_v47, %v770_v46 }
 0x5c6   :  { %v892_v58 = vmul.f32 %v3615_v52, %v4746_v42  ;;  %v773_v59 = vpop.f32.mrb[11].mxu0  ;;  %v4777_v62 = vmul.f32 %v3631_v55, %v4751_v45  ;;  %v837_v63 = vpop.f32.mrb[15].mxu1 }
 0x5c7   :  { %v890_v1 = vmul.f32 %v4761_v48, %v773_v59  ;;  %v4782_v2 = vmul.f32 %v4769_v51, %v837_v63  ;;  %v875_v59 = vld [vmem:[%s5596_s12 + $0x50] sm:$0xff]  ;;  %v876_v63 = vld [vmem:[%s5596_s12 + $0x58] sm:$0xff] }
 0x5c8   :  { %v918_v3 = vpack.c.bf16 %v892_v58, %v891_v57  ;;  %v926_v4 = vpack.c.bf16 %v4777_v62, %v4764_v49 }
 0x5c9   :  { %v917_v5 = vpack.c.bf16 %v890_v1, %v889_v0  ;;  %v925_v6 = vpack.c.bf16 %v4782_v2, %v4772_v53 }
 0x5cb   :  { %v3618_v13 = vpop.f32.mrb[12].mxu0  ;;  %3640 = vmatprep.mubr.msk.bf16.mxu0 %vm90_vm0, %v917_v5  ;;  %v3634_v21 = vpop.f32.mrb[16].mxu1 }
 0x5cc   :  { %v786_v25 = vpop.f32.mrb[13].mxu0  ;;  %3641 = vmatmul.mubr.msk.bf16.vlgmr.msra.gmra.mrb[24].mxu0 %vm90_vm0, %v918_v3  ;;  %v4824_v28 = vmul.f32 %v3634_v21, %v4791_v7  ;;  %v850_v29 = vpop.f32.mrb[17].mxu1  ;;  %v895_v36 = vmul.f32 %v3618_v13, %v4801_v17  ;;  %v874_v3 = vld [vmem:[%s5596_s12 + $0x48] sm:$0xff] }
 0x5cd   :  { %v3619_v32 = vpop.f32.mrb[14].mxu0  ;;  %3693 = vmatpush3.bf16.msra.mxu0 %v4654_v20  ;;  %v4833_v33 = vmul.f32 %v4796_v8, %v850_v29  ;;  %v3635_v34 = vpop.f32.mrb[18].mxu1  ;;  %v893_v44 = vmul.f32 %v869_v26, %v786_v25 }
 0x5ce   :  { %v896_v37 = vmul.f32 %v3619_v32, %v4807_v19  ;;  %v789_v38 = vpop.f32.mrb[15].mxu0  ;;  %3694 = vmatprep.subr.bf16.mxu0 %v4679_v31  ;;  %v4839_v39 = vmul.f32 %v3635_v34, %v4812_v23  ;;  %v853_v61 = vpop.f32.mrb[19].mxu1 }
 0x5cf   :  { %v894_v46 = vmul.f32 %v4821_v27, %v789_v38  ;;  %v4843_v20 = vmul.f32 %v4829_v30, %v853_v61 }
 0x5d0   :  { %v920_v50 = vpack.c.bf16 %v896_v37, %v895_v36  ;;  %v928_v52 = vpack.c.bf16 %v4839_v39, %v4824_v28 }
 0x5d1   :  { %v919_v55 = vpack.c.bf16 %v894_v46, %v893_v44  ;;  %3695 = vmatpush3.bf16.msra.mxu0 %v4679_v31  ;;  %v927_v57 = vpack.c.bf16 %v4843_v20, %v4833_v33  ;;  %v873_v31 = vld [vmem:[%s5596_s12 + $0x40] sm:$0xff] }
 0x5d3   :  { %v3622_v58 = vpop.f32.mrb[16].mxu0  ;;  %3644 = vmatprep.mubr.msk.bf16.mxu0 %vm90_vm0, %v919_v55  ;;  %v3670_v0 = vpop.f32.mrb[20].mxu1 }
 0x5d4   :  { %v802_v1 = vpop.f32.mrb[17].mxu0  ;;  %3645 = vmatmul.mubr.msk.bf16.gmra.mrb[28].mxu0 %vm90_vm0, %v920_v50  ;;  %v4865_v5 = vmul.f32 %v3670_v0, %v4741_v35  ;;  %v1149_v13 = vpop.f32.mrb[21].mxu1  ;;  %v899_v32 = vmul.f32 %v3622_v58, %v875_v59  ;;  %v879_v58 = vld [vmem:[%s5596_s12 + $0x70] sm:$0xff] }
 0x5d5   :  { %v3623_v21 = vpop.f32.mrb[18].mxu0  ;;  %v4868_v25 = vmul.f32 %v1149_v13, %v4756_v47  ;;  %v3671_v29 = vpop.f32.mrb[22].mxu1  ;;  %v897_v61 = vmul.f32 %v873_v31, %v802_v1  ;;  %v877_v13 = vld [vmem:[%s5596_s12 + $0x60] sm:$0xff] }
 0x5d6   :  { %v900_v34 = vmul.f32 %v3623_v21, %v876_v63  ;;  %v805_v36 = vpop.f32.mrb[19].mxu0  ;;  %v4871_v37 = vmul.f32 %v3671_v29, %v4746_v42  ;;  %v1152_v38 = vpop.f32.mrb[23].mxu1  ;;  %v880_v42 = vld [vmem:[%s5596_s12 + $0x78] sm:$0xff]  ;;  %v878_v21 = vld [vmem:[%s5596_s12 + $0x68] sm:$0xff] }
 0x5d7   :  { %v898_v44 = vmul.f32 %v874_v3, %v805_v36  ;;  %v1245_v46 = vmul.f32 %v1152_v38, %v4761_v48 }
 0x5d8   :  { %v922_v50 = vpack.c.bf16 %v900_v34, %v899_v32  ;;  %v1269_v35 = vpack.c.bf16 %v4871_v37, %v4865_v5 }
 0x5d9   :  { %v921_v55 = vpack.c.bf16 %v898_v44, %v897_v61  ;;  %v1268_v47 = vpack.c.bf16 %v1245_v46, %v4868_v25 }
 0x5db   :  { %v3626_v0 = vpop.f32.mrb[20].mxu0  ;;  %3648 = vmatprep.mubr.msk.bf16.mxu0 %vm90_vm0, %v921_v55  ;;  %v3674_v1 = vpop.f32.mrb[24].mxu1 }
 0x5dc   :  { %v818_v48 = vpop.f32.mrb[21].mxu0  ;;  %3649 = vmatmul.mubr.msk.bf16.gmra.mrb[32].mxu0 %vm90_vm0, %v922_v50  ;;  %v4892_v25 = vmul.f32 %v3674_v1, %v4801_v17  ;;  %v1165_v29 = vpop.f32.mrb[25].mxu1  ;;  %v903_v38 = vmul.f32 %v3626_v0, %v879_v58 }
 0x5dd   :  { %v3627_v32 = vpop.f32.mrb[22].mxu0  ;;  %v1248_v34 = vmul.f32 %v1165_v29, %v869_v26  ;;  %v3675_v36 = vpop.f32.mrb[26].mxu1  ;;  %v901_v15 = vmul.f32 %v877_v13, %v818_v48 }
 0x5de   :  { %v904_v61 = vmul.f32 %v3627_v32, %v880_v42  ;;  %v821_v44 = vpop.f32.mrb[23].mxu0  ;;  %v1251_v46 = vmul.f32 %v3675_v36, %v4807_v19  ;;  %v1168_v55 = vpop.f32.mrb[27].mxu1 }
 0x5df   :  { %v902_v14 = vmul.f32 %v878_v21, %v821_v44  ;;  %v1249_v50 = vmul.f32 %v1168_v55, %v4821_v27 }
 0x5e0   :  { %v924_v22 = vpack.c.bf16 %v904_v61, %v903_v38  ;;  %v1271_v54 = vpack.c.bf16 %v1251_v46, %v4892_v25 }
 0x5e1   :  { %v923_v56 = vpack.c.bf16 %v902_v14, %v901_v15  ;;  %v1270_v17 = vpack.c.bf16 %v1249_v50, %v1248_v34 }
 0x5e3   :  { %3652 = vmatprep.mubr.msk.bf16.mxu0 %vm90_vm0, %v923_v56  ;;  %v3678_v1 = vpop.f32.mrb[28].mxu1 }
 0x5e4   :  { %3653 = vmatmul.mubr.msk.bf16.gmra.mrb[36].mxu0 %vm90_vm0, %v924_v22  ;;  %v1254_v26 = vmul.f32 %v3678_v1, %v875_v59  ;;  %v1181_v0 = vpop.f32.mrb[29].mxu1 }
 0x5e5   :  { %3656 = vmatprep.mubr.msk.bf16.mxu0 %vm90_vm0, %v925_v6  ;;  %v1252_v19 = vmul.f32 %v1181_v0, %v873_v31  ;;  %v3679_v48 = vpop.f32.mrb[30].mxu1 }
 0x5e6   :  { %v1255_v27 = vmul.f32 %v3679_v48, %v876_v63  ;;  %v1184_v29 = vpop.f32.mrb[31].mxu1 }
 0x5e7   :  { %v1253_v32 = vmul.f32 %v1184_v29, %v874_v3 }
 0x5e8   :  { %v1273_v25 = vpack.c.bf16 %v1255_v27, %v1254_v26 }
 0x5e9   :  { %v1272_v14 = vpack.c.bf16 %v1253_v32, %v1252_v19 }
 0x5eb   :  { %v3682_v15 = vpop.f32.mrb[32].mxu1 }
 0x5ec   :  { %3657 = vmatmul.mubr.msk.bf16.gmra.mrb[40].mxu0 %vm90_vm0, %v926_v4  ;;  %v1258_v22 = vmul.f32 %v3682_v15, %v879_v58  ;;  %v1197_v56 = vpop.f32.mrb[33].mxu1 }
 0x5ed   :  { %3660 = vmatprep.mubr.msk.bf16.mxu0 %vm90_vm0, %v927_v57  ;;  %v1256_v53 = vmul.f32 %v1197_v56, %v877_v13  ;;  %v3683_v2 = vpop.f32.mrb[34].mxu1 }
 0x5ee   :  { %v1259_v6 = vmul.f32 %v3683_v2, %v880_v42  ;;  %v1200_v59 = vpop.f32.mrb[35].mxu1 }
 0x5ef   :  { %v1257_v63 = vmul.f32 %v1200_v59, %v878_v21 }
 0x5f0   :  { %v1275_v31 = vpack.c.bf16 %v1259_v6, %v1258_v22 }
 0x5f1   :  { %v1274_v3 = vpack.c.bf16 %v1257_v63, %v1256_v53 }
 0x5f3   :  { %v3686_v34 = vpop.f32.mrb[36].mxu1 }
 0x5f4   :  { %3661 = vmatmul.mubr.msk.bf16.gmra.mrb[44].mxu0 %vm90_vm0, %v928_v52  ;;  %v1262_v49 = vmul.f32 %v3686_v34, %v4731_v60  ;;  %v1213_v62 = vpop.f32.mrb[37].mxu1 }
 0x5f5   :  { %3696 = vmatprep.mubr.msk.bf16.mxu0 %vm90_vm0, %v1268_v47  ;;  %v1260_v4 = vmul.f32 %v1213_v62, %v4736_v40  ;;  %v3687_v33 = vpop.f32.mrb[38].mxu1 }
 0x5f6   :  { %v1263_v20 = vmul.f32 %v3687_v33, %v4751_v45  ;;  %v1216_v57 = vpop.f32.mrb[39].mxu1 }
 0x5f7   :  { %v1261_v58 = vmul.f32 %v1216_v57, %v4769_v51 }
 0x5f8   :  { %v1277_v42 = vpack.c.bf16 %v1263_v20, %v1262_v49 }
 0x5f9   :  { %v1276_v13 = vpack.c.bf16 %v1261_v58, %v1260_v4 }
 0x5fb   :  { %v3690_v21 = vpop.f32.mrb[40].mxu1 }
 0x5fc   :  { %3697 = vmatmul.mubr.msk.bf16.vlgmr.msra.gmra.mrb[48].mxu0 %vm90_vm0, %v1269_v35  ;;  %v1266_v60 = vmul.f32 %v3690_v21, %v4791_v7  ;;  %v1229_v28 = vpop.f32.mrb[41].mxu1 }
 0x5fd   :  { %3700 = vmatprep.mubr.msk.bf16.mxu0 %vm90_vm0, %v1270_v17  ;;  %v1264_v40 = vmul.f32 %v1229_v28, %v4796_v8  ;;  %v3691_v39 = vpop.f32.mrb[42].mxu1 }
 0x5fe   :  { %v1267_v45 = vmul.f32 %v3691_v39, %v4812_v23  ;;  %v1232_v52 = vpop.f32.mrb[43].mxu1  ;;  %v1727_v39 = vld [vmem:[%s5598_s14 + $0x8] sm:$0xff] }
 0x5ff   :  { %v1265_v51 = vmul.f32 %v1232_v52, %v4829_v30  ;;  %v5609_v52 = vmov 0.0|0.0  }
 0x600   :  { %v1279_v47 = vpack.c.bf16 %v1267_v45, %v1266_v60  ;;  %v1728_v45 = vld [vmem:[%s5598_s14 + $0x10] sm:$0xff]  ;;  %3992 = vmatprep.subr.bf16.mxu1 %v5609_v52  ;;  %4136 = vmatprep.subr.bf16.mxu0 %v5609_v52 }
 0x601   :  { %v1278_v36 = vpack.c.bf16 %v1265_v51, %v1264_v40  ;;  %v1726_v40 = vld [vmem:[%s5598_s14] sm:$0xff] }
 0x602   :  { %v1743_v51 = vand.u32 4294901760, %v1726_v40 }
 0x604   :  { %3701 = vmatmul.mubr.msk.bf16.gmra.mrb[52].mxu0 %vm90_vm0, %v1271_v54 }
 0x605   :  { %3704 = vmatprep.mubr.msk.bf16.mxu0 %vm90_vm0, %v1272_v14 }
 0x60c   :  { %3705 = vmatmul.mubr.msk.bf16.gmra.mrb[56].mxu0 %vm90_vm0, %v1273_v25 }
 0x60d   :  { %3708 = vmatprep.mubr.msk.bf16.mxu0 %vm90_vm0, %v1274_v3 }
 0x614   :  { %3709 = vmatmul.mubr.msk.bf16.gmra.mrb[60].mxu0 %vm90_vm0, %v1275_v31 }
 0x615   :  { %3712 = vmatprep.mubr.msk.bf16.mxu0 %vm90_vm0, %v1276_v13 }
 0x61c   :  { %3713 = vmatmul.mubr.msk.bf16.gmra.mrb[64].mxu0 %vm90_vm0, %v1277_v42 }
 0x61d   :  { %3716 = vmatprep.mubr.msk.bf16.mxu0 %vm90_vm0, %v1278_v36  ;;  %v1729_v36 = vld [vmem:[%s5598_s14 + $0x18] sm:$0xff] }
 0x624   :  { %3717 = vmatmul.mubr.msk.bf16.gmra.mrb[68].mxu0 %vm90_vm0, %v1279_v47  ;;  %v1746_v47 = vand.u32 4294901760, %v1727_v39 }
 0x625   :  { %3934 = vmatprep.mubr.msk.f32.mxu0 %vm4315_vm1, %v5607_v16 }
 0x69f   :  { %v4940_v54 = vpop.f32.mrb[24].mxu0 }
 0x6a0   :  { %v4942_v7 = vpop.f32.mrb[25].mxu0 }
 0x6a1   :  { %v4944_v8 = vpop.f32.mrb[26].mxu0 }
 0x6a2   :  { %v4946_v23 = vpop.f32.mrb[27].mxu0 }
 0x6a7   :  { %v4948_v30 = vpop.f32.mrb[28].mxu0 }
 0x6a8   :  { %v4950_v5 = vpop.f32.mrb[29].mxu0 }
 0x6a9   :  { %v4952_v37 = vpop.f32.mrb[30].mxu0 }
 0x6aa   :  { %v4954_v35 = vpop.f32.mrb[31].mxu0 }
 0x6af   :  { %v4956_v38 = vpop.f32.mrb[32].mxu0 }
 0x6b0   :  { %v4958_v61 = vpop.f32.mrb[33].mxu0 }
 0x6b1   :  { %v4960_v44 = vpop.f32.mrb[34].mxu0 }
 0x6b2   :  { %v4962_v46 = vpop.f32.mrb[35].mxu0 }
 0x6b7   :  { %v4964_v55 = vpop.f32.mrb[36].mxu0 }
 0x6b8   :  { %v4966_v50 = vpop.f32.mrb[37].mxu0 }
 0x6b9   :  { %v4968_v17 = vpop.f32.mrb[38].mxu0 }
 0x6ba   :  { %v4970_v1 = vpop.f32.mrb[39].mxu0 }
 0x6bf   :  { %v4972_v26 = vpop.f32.mrb[40].mxu0 }
 0x6c0   :  { %v4974_v0 = vpop.f32.mrb[41].mxu0 }
 0x6c1   :  { %v4976_v19 = vpop.f32.mrb[42].mxu0 }
 0x6c2   :  { %v4978_v48 = vpop.f32.mrb[43].mxu0 }
 0x6c7   :  { %v4980_v27 = vpop.f32.mrb[44].mxu0 }
 0x6c8   :  { %v4982_v29 = vpop.f32.mrb[45].mxu0 }
 0x6c9   :  { %v4984_v32 = vpop.f32.mrb[46].mxu0 }
 0x6ca   :  { %5637 = vst [vmem:[#allocation10_spill] sm:$0xff] %v4984_v32  ;;  %v4986_v25 = vpop.f32.mrb[47].mxu0 }
 0x6cf   :  { %v3698_v14 = vpop.f32.mrb[48].mxu0 }
 0x6d0   :  { %v1350_v15 = vpop.f32.mrb[49].mxu0 }
 0x6d1   :  { %v3699_v22 = vpop.f32.mrb[50].mxu0 }
 0x6d2   :  { %v1353_v56 = vpop.f32.mrb[51].mxu0 }
 0x6d7   :  { %v3702_v53 = vpop.f32.mrb[52].mxu0 }
 0x6d8   :  { %v1366_v2 = vpop.f32.mrb[53].mxu0 }
 0x6d9   :  { %v3703_v6 = vpop.f32.mrb[54].mxu0 }
 0x6da   :  { %v1369_v59 = vpop.f32.mrb[55].mxu0 }
 0x6df   :  { %v3706_v63 = vpop.f32.mrb[56].mxu0 }
 0x6e0   :  { %1489 = vrot.lane.b32.xlu1 %v3706_v63, %s4316_s28  ;;  %v1382_v31 = vpop.f32.mrb[57].mxu0  ;;  %v1734_v63 = vld [vmem:[%s5598_s14 + $0x40] sm:$0xff] }
 0x6e1   :  { %v3707_v3 = vpop.f32.mrb[58].mxu0 }
 0x6e2   :  { %v1385_v34 = vpop.f32.mrb[59].mxu0 }
 0x6e4   :  { %1485 = vrot.lane.b32.xlu1 %v1382_v31, %s4316_s28  ;;  %v5042_v31 = vpack.c.bf16 %v1746_v47, %v1743_v51 }
 0x6e6   :  { %3994 = vmatpush3.bf16.msra.mxu1 %v5042_v31 }
 0x6e7   :  { %v3710_v49 = vpop.f32.mrb[60].mxu0  ;;  %3995 = vmatprep.subr.bf16.mxu1 %v5609_v52 }
 0x6e8   :  { %1491 = vrot.lane.b32.xlu1 %v3707_v3, %s4316_s28  ;;  %v1398_v62 = vpop.f32.mrb[61].mxu0  ;;  %v5044_v3 = vsub.f32 %v1726_v40, %v1743_v51 }
 0x6e9   :  { %v3711_v4 = vpop.f32.mrb[62].mxu0 }
 0x6ea   :  { %v1401_v33 = vpop.f32.mrb[63].mxu0 }
 0x6ec   :  { %1487 = vrot.lane.b32.xlu1 %v1385_v34, %s4316_s28  ;;  %v5046_v34 = vsub.f32 %v1727_v39, %v1746_v47 }
 0x6ef   :  { %v3714_v20 = vpop.f32.mrb[64].mxu0 }
 0x6f0   :  { %1497 = vrot.lane.b32.xlu1 %v3710_v49, %s4316_s28  ;;  %1505 = vrot.lane.b32.xlu0 %v3714_v20, %s4316_s28  ;;  %v1414_v57 = vpop.f32.mrb[65].mxu0 }
 0x6f1   :  { %v3715_v58 = vpop.f32.mrb[66].mxu0 }
 0x6f2   :  { %v1417_v42 = vpop.f32.mrb[67].mxu0 }
 0x6f4   :  { %1493 = vrot.lane.b32.xlu1 %v1398_v62, %s4316_s28  ;;  %1501 = vrot.lane.b32.xlu0 %v1414_v57, %s4316_s28  ;;  %v1735_v62 = vld [vmem:[%s5598_s14 + $0x48] sm:$0xff] }
 0x6f5   :  { %v1770_v40 = vand.u32 4294901760, %v1735_v62 }
 0x6f7   :  { %v3718_v13 = vpop.f32.mrb[68].mxu0 }
 0x6f8   :  { %1495 = vrot.lane.b32.xlu1 %v1401_v33, %s4316_s28  ;;  %1507 = vrot.lane.b32.xlu0 %v3715_v58, %s4316_s28  ;;  %v1430_v21 = vpop.f32.mrb[69].mxu0  ;;  %v1737_v58 = vld [vmem:[%s5598_s14 + $0x58] sm:$0xff] }
 0x6f9   :  { %v4998_v60 = vpop.f32.mrb[70].mxu0 }
 0x6fa   :  { %5638 = vst [vmem:[#allocation11_spill] sm:$0xff] %v4998_v60  ;;  %v1433_v28 = vpop.f32.mrb[71].mxu0 }
 0x6fc   :  { %1471 = vrot.lane.b32.xlu1 %v1353_v56, %s4316_s28  ;;  %1503 = vrot.lane.b32.xlu0 %v1417_v42, %s4316_s28  ;;  %v1752_v56 = vand.u32 4294901760, %v1729_v36 }
 0x6fe   :  { %v5058_v20 = vsub.f32 %v1729_v36, %v1752_v56  ;;  %v1776_v36 = vand.u32 4294901760, %v1737_v58 }
 0x700   :  { %1469 = vrot.lane.b32.xlu0 %v1350_v15, %s4316_s28  ;;  %1513 = vrot.lane.b32.xlu1 %v3718_v13, %s4316_s28  ;;  %v1730_v15 = vld [vmem:[%s5598_s14 + $0x20] sm:$0xff] }
 0x704   :  { %1499 = vrot.lane.b32.xlu0 %v3711_v4, %s4316_s28  ;;  %1475 = vrot.lane.b32.xlu1 %v3699_v22, %s4316_s28  ;;  %v1731_v22 = vld [vmem:[%s5598_s14 + $0x28] sm:$0xff]  ;;  %v1736_v4 = vld [vmem:[%s5598_s14 + $0x50] sm:$0xff] }
 0x705   :  { %v1773_v39 = vand.u32 4294901760, %v1736_v4 }
 0x708   :  { %1479 = vrot.lane.b32.xlu1 %v1369_v59, %s4316_s28  ;;  %1509 = vrot.lane.b32.xlu0 %v1430_v21, %s4316_s28  ;;  %v1733_v59 = vld [vmem:[%s5598_s14 + $0x38] sm:$0xff] }
 0x709   :  { %v1764_v21 = vand.u32 4294901760, %v1733_v59 }
 0x70b   :  { %v5071_v51 = vsub.f32 %v1733_v59, %v1764_v21 }
 0x70c   :  { %1483 = vrot.lane.b32.xlu1 %v3703_v6, %s4316_s28  ;;  %1511 = vrot.lane.b32.xlu0 %v1433_v28, %s4316_s28  ;;  %v1732_v6 = vld [vmem:[%s5598_s14 + $0x30] sm:$0xff]  ;;  %v1767_v28 = vand.u32 4294901760, %v1734_v63 }
 0x70d   :  { %v1761_v13 = vand.u32 4294901760, %v1732_v6 }
 0x70e   :  { %v5073_v47 = vsub.f32 %v1734_v63, %v1767_v28  ;;  %v5090_v59 = vpack.c.bf16 %v1770_v40, %v1767_v28 }
 0x710   :  { %1473 = vrot.lane.b32.xlu0 %v3698_v14, %s4316_s28  ;;  %v1749_v14 = vand.u32 4294901760, %v1728_v45  ;;  %5641 = vst [vmem:[#allocation14_spill] sm:$0xff] %v5090_v59 }
 0x712   :  { %v5048_v49 = vsub.f32 %v1728_v45, %v1749_v14  ;;  %v5056_v33 = vpack.c.bf16 %v1752_v56, %v1749_v14  ;;  %v5069_v45 = vsub.f32 %v1732_v6, %v1761_v13  ;;  %v5075_v14 = vsub.f32 %v1735_v62, %v1770_v40 }
 0x713   :  { %v5082_v56 = vsub.f32 %v1737_v58, %v1776_v36  ;;  %v5086_v6 = vpack.c.bf16 %v1764_v21, %v1761_v13 }
 0x714   :  { %1477 = vrot.lane.b32.xlu0 %v1366_v2, %s4316_s28  ;;  %v1758_v2 = vand.u32 4294901760, %v1731_v22  ;;  %3997 = vmatpush3.bf16.msra.mxu1 %v5056_v33 }
 0x715   :  { %3998 = vmatprep.subr.bf16.mxu1 %v5609_v52  ;;  %5640 = vst [vmem:[#allocation13_spill] sm:$0xff] %v5086_v6 }
 0x716   :  { %v5066_v42 = vsub.f32 %v1731_v22, %v1758_v2 }
 0x718   :  { %1481 = vrot.lane.b32.xlu0 %v3702_v53, %s4316_s28  ;;  %v1755_v53 = vand.u32 4294901760, %v1730_v15 }
 0x71a   :  { %v5060_v57 = vsub.f32 %v1730_v15, %v1755_v53  ;;  %v5077_v15 = vsub.f32 %v1736_v4, %v1773_v39  ;;  %v5080_v22 = vpack.c.bf16 %v1758_v2, %v1755_v53  ;;  %v5094_v53 = vpack.c.bf16 %v1776_v36, %v1773_v39  ;;  %v1566_v4 = vpop.permute.xlu0 %1565 }
 0x71b   :  { %v5101_v13 = vsel %vm90_vm0, %v1566_v4, %v4649_v18  ;;  %v5643_v39 = vsub.s32 1, %v4436_v24 }
 0x71c   :  { %5639 = vst [vmem:[#allocation12_spill] sm:$0xff] %v5080_v22  ;;  %4000 = vmatpush3.bf16.msra.mxu1 %v5080_v22  ;;  %5642 = vst [vmem:[#allocation15_spill] sm:$0xff] %v5094_v53  ;;  %v1608_v10 = vrot.slane %v5101_v13, %v1607_v11  ;;  %v1641_v11 = vsub.s32 4, %v4436_v24 }
 0x71d   :  { %4001 = vmatprep.subr.bf16.mxu1 %v5609_v52  ;;  %v1591_v36 = vrot.slane %v5101_v13, %v5643_v39 }
 0x720   :  { %4003 = vmatpush3.bf16.msra.mxu1 %v5086_v6 }
 0x721   :  { %4004 = vmatprep.subr.bf16.mxu1 %v5609_v52 }
 0x724   :  { %4006 = vmatpush3.bf16.msra.mxu1 %v5090_v59 }
 0x725   :  { %4007 = vmatprep.subr.bf16.mxu1 %v5609_v52 }
 0x728   :  { %4009 = vmatpush3.bf16.msra.mxu1 %v5094_v53 }
 0x729   :  { %4010 = vmatprep.subr.bf16.mxu1 %v5609_v52  ;;  %v5644_v52 = vsub.s32 0, %v4436_v24 }
 0x72b   :  { %v1574_v32 = vrot.slane %v5101_v13, %v5644_v52 }
 0x752   :  { %v1490_v2 = vpop.permute.xlu1 %1489 }
 0x753   :  { %v1551_v52 = vsel %vm90_vm0, %v4956_v38, %v1490_v2  ;;  %v1625_v2 = vrot.slane %v5101_v13, %v1624_v43 }
 0x756   :  { %v1486_v63 = vpop.permute.xlu1 %1485 }
 0x757   :  { %v1549_v16 = vsel %vm90_vm0, %v4958_v61, %v1486_v63  ;;  %v5124_v61 = vld [vmem:[%s5593_s9] sm:$0xff] }
 0x758   :  { %v1575_v39 = vmul.f32 %v1574_v32, %v1549_v16  ;;  %v1609_v16 = vmul.f32 %v1608_v10, %v1551_v52 }
 0x75a   :  { %v1492_v62 = vpop.permute.xlu1 %1491  ;;  %v1576_v32 = vmul.f32 %v1575_v39, %v5124_v61  ;;  %v1610_v10 = vmul.f32 %v1609_v16, %v5124_v61 }
 0x75b   :  { %v1552_v53 = vsel %vm90_vm0, %v4960_v44, %v1492_v62 }
 0x75c   :  { %v1626_v52 = vmul.f32 %v1625_v2, %v1552_v53 }
 0x75e   :  { %v1488_v58 = vpop.permute.xlu1 %1487 }
 0x75f   :  { %v1550_v40 = vsel %vm90_vm0, %v4962_v46, %v1488_v58  ;;  %v1570_v46 = vld [vmem:[%s5594_s10] sm:$0xff] }
 0x760   :  { %v1592_v60 = vmul.f32 %v1591_v36, %v1550_v40  ;;  %v1577_v62 = vadd.f32 %v1576_v32, %v1570_v46  ;;  %v1627_v32 = vmul.f32 %v1626_v52, %v5124_v61 }
 0x762   :  { %v5103_v21 = vpop.permute.xlu1 %1497  ;;  %v1506_v28 = vpop.permute.xlu0 %1505  ;;  %v1593_v63 = vmul.f32 %v1592_v60, %v5124_v61 }
 0x766   :  { %v1494_v18 = vpop.permute.xlu1 %1493  ;;  %v1502_v4 = vpop.permute.xlu0 %1501 }
 0x767   :  { %v1557_v58 = vsel %vm90_vm0, %v4974_v0, %v1502_v4  ;;  %v1553_v43 = vsel %vm90_vm0, %v4966_v50, %v1494_v18 }
 0x768   :  { %v1586_v12 = vmul.f32 %v1570_v46, %v1557_v58 }
 0x76a   :  { %v1587_v40 = vadd.f32 %v1586_v12, %v1575_v39  ;;  %v1496_v36 = vpop.permute.xlu1 %1495  ;;  %v1508_v9 = vpop.permute.xlu0 %1507  ;;  %v1658_v39 = vsub.s32 5, %v4436_v24 }
 0x76b   :  { %v1554_v18 = vsel %vm90_vm0, %v4970_v1, %v1496_v36 }
 0x76c   :  { %v1594_v0 = vadd.f32 %v1593_v63, %v1587_v40 }
 0x76e   :  { %v1472_v4 = vpop.permute.xlu1 %1471  ;;  %v1504_v58 = vpop.permute.xlu0 %1503 }
 0x76f   :  { %v1542_v38 = vsel %vm90_vm0, %v4946_v23, %v1472_v4  ;;  %v1558_v12 = vsel %vm90_vm0, %v4978_v48, %v1504_v58  ;;  %v1559_v48 = vsel %vm90_vm0, %v4972_v26, %v1506_v28  ;;  %v1642_v4 = vrot.slane %v5101_v13, %v1641_v11 }
 0x770   :  { %v1595_v59 = vmul.f32 %v1594_v0, %v1542_v38  ;;  %v1603_v63 = vmul.f32 %v1587_v40, %v1558_v12  ;;  %v1659_v11 = vrot.slane %v5101_v13, %v1658_v39 }
 0x771   :  { %v1643_v38 = vmul.f32 %v1642_v4, %v1553_v43 }
 0x772   :  { %v1596_v6 = vsel %vm338_vm7, %v1595_v59, 0.0  ;;  %v1604_v44 = vadd.f32 %v1603_v63, %v1592_v60  ;;  %v1470_v22 = vpop.permute.xlu0 %1469  ;;  %v5143_v23 = vpop.permute.xlu1 %1513  ;;  %v1675_v60 = vsub.s32 6, %v4436_v24  ;;  %v1660_v36 = vmul.f32 %v1659_v11, %v1554_v18 }
 0x773   :  { %v1597_v0 = vrot.slane %v1596_v6, 4  ;;  %v1541_v40 = vsel %vm90_vm0, %v4942_v7, %v1470_v22  ;;  %v1560_v7 = vsel %vm90_vm0, %v4976_v19, %v1508_v9  ;;  %v1644_v1 = vmul.f32 %v1643_v38, %v5124_v61 }
 0x774   :  { %v1620_v53 = vmul.f32 %v1604_v44, %v1559_v48  ;;  %v1578_v58 = vmul.f32 %v1577_v62, %v1541_v40  ;;  %v1611_v59 = vadd.f32 %v1610_v10, %v1604_v44  ;;  %v1555_v10 = vsel %vm90_vm0, %v4964_v55, %v5103_v21 }
 0x775   :  { %v1598_v46 = vadd.f32 %v1597_v0, %v1596_v6  ;;  %v1676_v43 = vrot.slane %v5101_v13, %v1675_v60  ;;  %v1692_v40 = vsub.s32 7, %v4436_v24 }
 0x776   :  { %v1579_v26 = vsel %vm338_vm7, %v1578_v58, 0.0  ;;  %v1500_v28 = vpop.permute.xlu0 %1499  ;;  %v1621_v12 = vadd.f32 %v1620_v53, %v1609_v16  ;;  %v1476_v50 = vpop.permute.xlu1 %1475 }
 0x777   :  { %v1599_v22 = vrot.slane %v1598_v46, 2  ;;  %v1580_v2 = vrot.slane %v1579_v26, 4  ;;  %v1544_v16 = vsel %vm90_vm0, %v4944_v8, %v1476_v50  ;;  %v1677_v53 = vmul.f32 %v1676_v43, %v1555_v10 }
 0x778   :  { %v1628_v63 = vadd.f32 %v1627_v32, %v1621_v12  ;;  %v1637_v6 = vmul.f32 %v1621_v12, %v1560_v7  ;;  %v1556_v50 = vsel %vm90_vm0, %v4968_v17, %v1500_v28 }
 0x779   :  { %v1600_v44 = vadd.f32 %v1599_v22, %v1598_v46  ;;  %v1581_v62 = vadd.f32 %v1580_v2, %v1579_v26  ;;  %v1661_v46 = vmul.f32 %v1660_v36, %v5124_v61  ;;  %v1678_v22 = vmul.f32 %v1677_v53, %v5124_v61 }
 0x77a   :  { %v1629_v48 = vmul.f32 %v1628_v63, %v1544_v16  ;;  %v1638_v9 = vadd.f32 %v1637_v6, %v1626_v52  ;;  %v1510_v19 = vpop.permute.xlu0 %1509  ;;  %v1480_v52 = vpop.permute.xlu1 %1479 }
 0x77b   :  { %v1582_v39 = vrot.slane %v1581_v62, 2  ;;  %v1561_v0 = vsel %vm90_vm0, %v4982_v29, %v1510_v19  ;;  %v1601_v8 = vrot.slane %v1600_v44, 1  ;;  %v1693_v29 = vrot.slane %v5101_v13, %v1692_v40 }
 0x77c   :  { %v1630_v55 = vsel %vm338_vm7, %v1629_v48, 0.0  ;;  %v1654_v21 = vmul.f32 %v1638_v9, %v1561_v0  ;;  %v1645_v4 = vadd.f32 %v1644_v1, %v1638_v9 }
 0x77d   :  { %v1583_v58 = vadd.f32 %v1582_v39, %v1581_v62  ;;  %v1631_v32 = vrot.slane %v1630_v55, 4  ;;  %v1602_v2 = vadd.f32 %v1601_v8, %v1600_v44  ;;  %v5180_v63 = vmul.f32 %v1693_v29, %v1556_v50 }
 0x77e   :  { %v1655_v26 = vadd.f32 %v1654_v21, %v1643_v38  ;;  %v1512_v12 = vpop.permute.xlu0 %1511  ;;  %v1546_v38 = vsel %vm90_vm0, %v4954_v35, %v1480_v52 }
 0x77f   :  { %v1584_v60 = vrot.slane %v1583_v58, 1  ;;  %v1562_v24 = vsel %vm90_vm0, %v4986_v25, %v1512_v12  ;;  %v1632_v6 = vadd.f32 %v1631_v32, %v1630_v55  ;;  %v1563_v25 = vsel %vm90_vm0, %v4980_v27, %v5143_v23 }
 0x780   :  { %v1662_v18 = vadd.f32 %v1661_v46, %v1655_v26  ;;  %v1671_v7 = vmul.f32 %v1655_v26, %v1562_v24  ;;  %v1695_v9 = vmul.f32 %v5180_v63, %v5124_v61 }
 0x781   :  { %v1585_v11 = vadd.f32 %v1584_v60, %v1583_v58  ;;  %v1633_v19 = vrot.slane %v1632_v6, 2 }
 0x782   :  { %v1663_v10 = vmul.f32 %v1662_v18, %v1546_v38  ;;  %v1672_v17 = vadd.f32 %v1671_v7, %v1660_v36  ;;  %v1474_v28 = vpop.permute.xlu0 %1473  ;;  %v1484_v36 = vpop.permute.xlu1 %1483 }
 0x783   :  { %v1708_v62 = vsel %vm1707_vm11, %v1585_v11, %v1602_v2  ;;  %v1543_v13 = vsel %vm90_vm0, %v4940_v54, %v1474_v28  ;;  %v1548_v55 = vsel %vm90_vm0, %v4952_v37, %v1484_v36  ;;  %v1634_v8 = vadd.f32 %v1633_v19, %v1632_v6 }
 0x784   :  { %v1664_v44 = vsel %vm338_vm7, %v1663_v10, 0.0  ;;  %v1688_v16 = vmul.f32 %v1672_v17, %v1563_v25  ;;  %v1612_v1 = vmul.f32 %v1611_v59, %v1543_v13  ;;  %v1679_v48 = vadd.f32 %v1678_v22, %v1672_v17  ;;  %v1738_v10 = vld [vmem:[%s5598_s14 + $0x60] sm:$0xff]  ;;  %v1739_v17 = vld [vmem:[%s5598_s14 + $0x68] sm:$0xff] }
 0x785   :  { %v1665_v35 = vrot.slane %v1664_v44, 4  ;;  %v1635_v37 = vrot.slane %v1634_v8, 1  ;;  %v1779_v13 = vand.u32 4294901760, %v1738_v10 }
 0x786   :  { %v5190_v43 = vadd.f32 %v1688_v16, %v1677_v53  ;;  %v1613_v39 = vsel %vm338_vm7, %v1612_v1, 0.0  ;;  %v1478_v0 = vpop.permute.xlu0 %1477 }
 0x787   :  { %v1666_v27 = vadd.f32 %v1665_v35, %v1664_v44  ;;  %v1614_v23 = vrot.slane %v1613_v39, 4  ;;  %v1545_v54 = vsel %vm90_vm0, %v4950_v5, %v1478_v0  ;;  %v1636_v28 = vadd.f32 %v1635_v37, %v1634_v8 }
 0x788   :  { %v1696_v40 = vadd.f32 %v1695_v9, %v5190_v43  ;;  %v1646_v59 = vmul.f32 %v1645_v4, %v1545_v54  ;;  %v1782_v44 = vand.u32 4294901760, %v1739_v17  ;;  %v1843_v8 = vand.u32 4294901760, %v5046_v34 }
 0x789   :  { %v1667_v21 = vrot.slane %v1666_v27, 2  ;;  %v1615_v61 = vadd.f32 %v1614_v23, %v1613_v39  ;;  %v1741_v23 = vld [vmem:[%s5598_s14 + $0x78] sm:$0xff] }
 0x78a   :  { %v1697_v58 = vmul.f32 %v1696_v40, %v1548_v55  ;;  %v1647_v53 = vsel %vm338_vm7, %v1646_v59, 0.0  ;;  %v1482_v46 = vpop.permute.xlu0 %1481  ;;  %v5209_v19 = vpack.c.bf16 %v1782_v44, %v1779_v13  ;;  %v1788_v40 = vand.u32 4294901760, %v1741_v23 }
 0x78b   :  { %v1616_v32 = vrot.slane %v1615_v61, 2  ;;  %v1648_v52 = vrot.slane %v1647_v53, 4  ;;  %v1547_v26 = vsel %vm90_vm0, %v4948_v30, %v1482_v46  ;;  %v1668_v60 = vadd.f32 %v1667_v21, %v1666_v27  ;;  %v1740_v27 = vld [vmem:[%s5598_s14 + $0x70] sm:$0xff] }
 0x78c   :  { %v1698_v5 = vsel %vm338_vm7, %v1697_v58, 0.0  ;;  %v1680_v12 = vmul.f32 %v1679_v48, %v1547_v26  ;;  %4012 = vmatpush3.bf16.msra.mxu1 %v5209_v19  ;;  %v1836_v59 = vand.u32 4294901760, %v5044_v3 }
 0x78d   :  { %v1699_v4 = vrot.slane %v1698_v5, 4  ;;  %v1617_v50 = vadd.f32 %v1616_v32, %v1615_v61  ;;  %v1649_v24 = vadd.f32 %v1648_v52, %v1647_v53  ;;  %v1669_v11 = vrot.slane %v1668_v60, 1 }
 0x78e   :  { %v1681_v29 = vsel %vm338_vm7, %v1680_v12, 0.0  ;;  %v5645_v61 = vmov 0.0|0.0   ;;  %v1837_v46 = vsub.f32 %v5044_v3, %v1836_v59  ;;  %v1844_v52 = vsub.f32 %v5046_v34, %v1843_v8 }
 0x78f   :  { %v1618_v18 = vrot.slane %v1617_v50, 1  ;;  %v1650_v7 = vrot.slane %v1649_v24, 2  ;;  %v1682_v22 = vrot.slane %v1681_v29, 4  ;;  %v1700_v2 = vadd.f32 %v1699_v4, %v1698_v5  ;;  %4013 = vmatprep.subr.bf16.mxu1 %v5645_v61 }
 0x790   :  { %v1670_v0 = vadd.f32 %v1669_v11, %v1668_v60  ;;  %v1838_v5 = vand.u32 4294901760, %v1837_v46  ;;  %v1850_v12 = vand.u32 4294901760, %v5048_v49  ;;  %v1857_v60 = vand.u32 4294901760, %v5058_v20 }
 0x791   :  { %v1619_v38 = vadd.f32 %v1618_v18, %v1617_v50  ;;  %v1651_v6 = vadd.f32 %v1650_v7, %v1649_v24  ;;  %v1683_v30 = vadd.f32 %v1682_v22, %v1681_v29  ;;  %v1701_v25 = vrot.slane %v1700_v2, 2 }
 0x792   :  { %v5233_v50 = vsub.f32 %v1738_v10, %v1779_v13  ;;  %v5235_v24 = vsub.f32 %v1739_v17, %v1782_v44  ;;  %v5242_v18 = vsub.f32 %v1741_v23, %v1788_v40  ;;  %v1845_v7 = vand.u32 4294901760, %v1844_v52 }
 0x793   :  { %v1710_v16 = vsel %vm1709_vm12, %v1708_v62, %v1619_v38  ;;  %v1652_v1 = vrot.slane %v1651_v6, 1  ;;  %v1684_v48 = vrot.slane %v1683_v30, 2  ;;  %v1702_v35 = vadd.f32 %v1701_v25, %v1700_v2 }
 0x794   :  { %v1712_v9 = vsel %vm1711_vm13, %v1710_v16, %v1636_v28  ;;  %v1785_v62 = vand.u32 4294901760, %v1740_v27  ;;  %v1851_v22 = vsub.f32 %v5048_v49, %v1850_v12  ;;  %v1858_v11 = vsub.f32 %v5058_v20, %v1857_v60 }
 0x795   :  { %v1653_v36 = vadd.f32 %v1652_v1, %v1651_v6  ;;  %v1685_v39 = vadd.f32 %v1684_v48, %v1683_v30  ;;  %v1703_v54 = vrot.slane %v1702_v35, 1  ;;  %v5252_v38 = vpack.c.bf16 %v1845_v7, %v1838_v5 }
 0x796   :  { %v5222_v53 = vpack.c.bf16 %v1788_v40, %v1785_v62  ;;  %v5237_v37 = vsub.f32 %v1740_v27, %v1785_v62  ;;  %v1852_v6 = vand.u32 4294901760, %v1851_v22  ;;  %v1864_v30 = vand.u32 4294901760, %v5060_v57 }
 0x797   :  { %v1686_v55 = vrot.slane %v1685_v39, 1  ;;  %v1713_v21 = vsel %vm251_vm5, %v1712_v9, %v1653_v36  ;;  %v1704_v26 = vadd.f32 %v1703_v54, %v1702_v35  ;;  %v1871_v10 = vand.u32 4294901760, %v5066_v42 }
 0x798   :  { %v1715_v58 = vsel %vm1714_vm14, %v1713_v21, %v1670_v0  ;;  %4015 = vmatpush3.bf16.msra.mxu1 %v5222_v53  ;;  %v1859_v17 = vand.u32 4294901760, %v1858_v11  ;;  %v1865_v28 = vsub.f32 %v5060_v57, %v1864_v30  ;;  %v1878_v1 = vand.u32 4294901760, %v5069_v45 }
 0x799   :  { %v1687_v32 = vadd.f32 %v1686_v55, %v1685_v39  ;;  %4016 = vmatprep.subr.bf16.mxu1 %v5645_v61  ;;  %v1872_v25 = vsub.f32 %v5066_v42, %v1871_v10  ;;  %v1885_v48 = vand.u32 4294901760, %v5071_v51  ;;  %v1892_v27 = vand.u32 4294901760, %v5073_v47 }
 0x79a   :  { %v4020_v13 = vpack.c.bf16 %v1859_v17, %v1852_v6  ;;  %v1866_v44 = vand.u32 4294901760, %v1865_v28  ;;  %v1879_v9 = vsub.f32 %v5069_v45, %v1878_v1  ;;  %v1899_v23 = vand.u32 4294901760, %v5075_v14 }
 0x79b   :  { %v1717_v4 = vsel %vm1716_vm15, %v1715_v58, %v1687_v32  ;;  %v1873_v16 = vand.u32 4294901760, %v1872_v25  ;;  %v1886_v36 = vsub.f32 %v5071_v51, %v1885_v48  ;;  %v1906_v21 = vand.u32 4294901760, %v5077_v15 }
 0x79c   :  { %v5240_v29 = vsel %vm1718_vm2, %v1717_v4, %v1704_v26  ;;  %v1880_v39 = vand.u32 4294901760, %v1879_v9  ;;  %v1900_v62 = vsub.f32 %v5075_v14, %v1899_v23  ;;  %v1913_v58 = vand.u32 4294901760, %v5082_v56 }
 0x79d   :  { %v1720_v2 = vmul.f32 %v5240_v29, %v5240_v29  ;;  %v4023_v35 = vpack.c.bf16 %v1873_v16, %v1866_v44  ;;  %v1887_v0 = vand.u32 4294901760, %v1886_v36  ;;  %v1907_v32 = vsub.f32 %v5077_v15, %v1906_v21 }
 0x79e   :  { %v1901_v55 = vand.u32 4294901760, %v1900_v62  ;;  %v1914_v52 = vsub.f32 %v5082_v56, %v1913_v58  ;;  %v1920_v4 = vand.u32 4294901760, %v5233_v50  ;;  %v1927_v7 = vand.u32 4294901760, %v5235_v24 }
 0x79f   :  { %1722 = vrot.lane.b32.xlu0 %v1720_v2, %s4317_s29  ;;  %v4026_v54 = vpack.c.bf16 %v1887_v0, %v1880_v39  ;;  %v1908_v26 = vand.u32 4294901760, %v1907_v32  ;;  %v1934_v28 = vand.u32 4294901760, %v5237_v37  ;;  %v1941_v25 = vand.u32 4294901760, %v5242_v18 }
 0x7a0   :  { %v1915_v5 = vand.u32 4294901760, %v1914_v52  ;;  %v1921_v2 = vsub.f32 %v5233_v50, %v1920_v4  ;;  %v1928_v11 = vsub.f32 %v5235_v24, %v1927_v7  ;;  %v4044_v62 = vpack.c.bf16 %v5058_v20, %v5048_v49 }
 0x7a1   :  { %v1935_v16 = vsub.f32 %v5237_v37, %v1934_v28  ;;  %v1942_v9 = vsub.f32 %v5242_v18, %v1941_v25  ;;  %v4053_v32 = vpack.c.bf16 %v5075_v14, %v5073_v47  ;;  %v4056_v52 = vpack.c.bf16 %v5082_v56, %v5077_v15 }
 0x7a2   :  { %v4032_v22 = vpack.c.bf16 %v1915_v5, %v1908_v26  ;;  %v1922_v6 = vand.u32 4294901760, %v1921_v2  ;;  %v1929_v17 = vand.u32 4294901760, %v1928_v11  ;;  %v4059_v26 = vpack.c.bf16 %v5235_v24, %v5233_v50  ;;  %v5651_v24 = vld [vmem:[#allocation9_spill] sm:$0xff] }
 0x7a3   :  { %2877 = vrot.lane.b32.xlu0 %v4623_v41, %s4316_s28  ;;  %v1893_v41 = vsub.f32 %v5073_v47, %v1892_v27  ;;  %v1936_v36 = vand.u32 4294901760, %v1935_v16  ;;  %v1943_v39 = vand.u32 4294901760, %v1942_v9  ;;  %v4062_v5 = vpack.c.bf16 %v5242_v18, %v5237_v37 }
 0x7a4   :  { %v4035_v44 = vpack.c.bf16 %v1929_v17, %v1922_v6  ;;  %v4101_v49 = vpack.c.bf16 %v1899_v23, %v1892_v27  ;;  %v4104_v20 = vpack.c.bf16 %v1913_v58, %v1906_v21 }
 0x7a5   :  { %v1894_v40 = vand.u32 4294901760, %v1893_v41  ;;  %v4038_v0 = vpack.c.bf16 %v1943_v39, %v1936_v36  ;;  %v4041_v41 = vpack.c.bf16 %v5046_v34, %v5044_v3  ;;  %v5646_v39 = vmov 0.0  }
 0x7a6   :  { %v4095_v3 = vpack.c.bf16 %v1871_v10, %v1864_v30  ;;  %v4098_v34 = vpack.c.bf16 %v1885_v48, %v1878_v1 }
 0x7a7   :  { %v4029_v46 = vpack.c.bf16 %v1901_v55, %v1894_v40  ;;  %v4047_v40 = vpack.c.bf16 %v5066_v42, %v5060_v57  ;;  %v4050_v55 = vpack.c.bf16 %v5071_v51, %v5069_v45  ;;  %v4107_v57 = vpack.c.bf16 %v1927_v7, %v1920_v4 }
 0x7a8   :  { %v4110_v42 = vpack.c.bf16 %v1941_v25, %v1934_v28 }
 0x811   :  { %v1723_v2 = vpop.permute.xlu0 %1722 }
 0x812   :  { %v1725_v11 = vsel %vm338_vm7, %v5240_v29, %v1723_v2  ;;  %v5653_v2 = vld [vmem:[#allocation6_spill] sm:$0xff] }
 0x813   :  { %v5323_v6 = vand.u32 4294901760, %v1725_v11 }
 0x815   :  { %v1824_v17 = vsub.f32 %v1725_v11, %v5323_v6  ;;  %v5654_v11 = vld [vmem:[#allocation5_spill] sm:$0xff] }
 0x817   :  { %v1825_v16 = vand.u32 4294901760, %v1824_v17 }
 0x819   :  { %v1826_v9 = vsub.f32 %v1824_v17, %v1825_v16 }
 0x81b   :  { %v1827_v36 = vand.u32 4294901760, %v1826_v9  ;;  %v4242_v9 = vld [vmem:[%s5591_s7 + $0x30] ss:$8 sps:$4 sm:$0xff]  }
 0x81d   :  { %3753 = vmatmul.mubr.f32.vlgmr.msra.gmra.mrb[44].mxu1 %v1827_v36 }
 0x81e   :  { %4018 = vmatpush3.bf16.msra.mxu1 %v5252_v38  ;;  %3787 = vmatprep.mubr.msk.f32.mxu1 %vm4315_vm1, %v5646_v39  ;;  %v5647_v38 = vld [vmem:[#allocation12_spill] sm:$0xff] }
 0x81f   :  { %4019 = vmatprep.subr.bf16.mxu1 %v5645_v61 }
 0x822   :  { %4021 = vmatpush3.bf16.msra.mxu1 %v4020_v13  ;;  %v5648_v13 = vld [vmem:[#allocation13_spill] sm:$0xff] }
 0x823   :  { %4022 = vmatprep.subr.bf16.mxu1 %v5645_v61 }
 0x826   :  { %4024 = vmatpush3.bf16.msra.mxu1 %v4023_v35  ;;  %v5649_v35 = vld [vmem:[#allocation14_spill] sm:$0xff] }
 0x827   :  { %4025 = vmatprep.subr.bf16.mxu1 %v5645_v61 }
 0x82a   :  { %4027 = vmatpush3.bf16.msra.mxu1 %v4026_v54  ;;  %v5650_v54 = vld [vmem:[#allocation15_spill] sm:$0xff] }
 0x82b   :  { %4028 = vmatprep.subr.bf16.mxu1 %v5645_v61 }
 0x82e   :  { %4030 = vmatpush3.bf16.msra.mxu1 %v4029_v46  ;;  %v4089_v46 = vpack.c.bf16 %v1843_v8, %v1836_v59 }
 0x82f   :  { %4031 = vmatprep.subr.bf16.mxu1 %v5645_v61 }
 0x832   :  { %4033 = vmatpush3.bf16.msra.mxu1 %v4032_v22  ;;  %v4092_v22 = vpack.c.bf16 %v1857_v60, %v1850_v12 }
 0x833   :  { %4034 = vmatprep.subr.bf16.mxu1 %v5645_v61 }
 0x836   :  { %4036 = vmatpush3.bf16.msra.mxu1 %v4035_v44 }
 0x837   :  { %4037 = vmatprep.subr.bf16.mxu1 %v5645_v61 }
 0x83a   :  { %4039 = vmatpush3.bf16.msra.mxu1 %v4038_v0  ;;  %v5652_v0 = vmov 0  }
 0x83b   :  { %4040 = vmatprep.subr.bf16.mxu1 %v5645_v61 }
 0x83d   :  { %3788 = vmatmul.mubr.f32.vlgmr.msra.gmra.mrb[44].mxu1 %v5323_v6 }
 0x83e   :  { %4042 = vmatpush3.bf16.msra.mxu1 %v4041_v41  ;;  %3822 = vmatprep.mubr.msk.f32.mxu1 %vm4315_vm1, %v5646_v39 }
 0x83f   :  { %4043 = vmatprep.subr.bf16.mxu1 %v5645_v61 }
 0x842   :  { %4045 = vmatpush3.bf16.msra.mxu1 %v4044_v62 }
 0x843   :  { %4046 = vmatprep.subr.bf16.mxu1 %v5645_v61 }
 0x846   :  { %4048 = vmatpush3.bf16.msra.mxu1 %v4047_v40 }
 0x847   :  { %4049 = vmatprep.subr.bf16.mxu1 %v5645_v61 }
 0x84a   :  { %4051 = vmatpush3.bf16.msra.mxu1 %v4050_v55 }
 0x84b   :  { %4052 = vmatprep.subr.bf16.mxu1 %v5645_v61 }
 0x84e   :  { %4054 = vmatpush3.bf16.msra.mxu1 %v4053_v32  ;;  %v4233_v32 = vld [vmem:[%s5591_s7] ss:$8 sps:$4 sm:$0xff]  }
 0x84f   :  { %4055 = vmatprep.subr.bf16.mxu1 %v5645_v61 }
 0x852   :  { %4057 = vmatpush3.bf16.msra.mxu1 %v4056_v52  ;;  %v4238_v52 = vld [vmem:[%s5591_s7 + $0x14] ss:$8 sps:$4 sm:$0xff]  }
 0x853   :  { %4058 = vmatprep.subr.bf16.mxu1 %v5645_v61 }
 0x856   :  { %4060 = vmatpush3.bf16.msra.mxu1 %v4059_v26  ;;  %v4236_v26 = vld [vmem:[%s5591_s7 + $0x10] ss:$8 sps:$4 sm:$0xff]  }
 0x857   :  { %4061 = vmatprep.subr.bf16.mxu1 %v5645_v61 }
 0x85a   :  { %4063 = vmatpush3.bf16.msra.mxu1 %v4062_v5  ;;  %v4241_v5 = vld [vmem:[%s5591_s7 + $0x24] ss:$8 sps:$4 sm:$0xff]  }
 0x85b   :  { %4064 = vmatprep.subr.bf16.mxu1 %v5645_v61 }
 0x85d   :  { %3823 = vmatmul.mubr.f32.vlgmr.msra.gmra.mrb[44].mxu1 %v1824_v17  ;;  %v4239_v17 = vld [vmem:[%s5591_s7 + $0x20] ss:$8 sps:$4 sm:$0xff]  }
 0x85e   :  { %4066 = vmatpush3.bf16.msra.mxu1 %v5042_v31  ;;  %3857 = vmatprep.mubr.msk.f32.mxu1 %vm4315_vm1, %v5646_v39 }
 0x85f   :  { %4067 = vmatprep.subr.bf16.mxu1 %v5645_v61 }
 0x862   :  { %4069 = vmatpush3.bf16.msra.mxu1 %v5056_v33 }
 0x863   :  { %4070 = vmatprep.subr.bf16.mxu1 %v5645_v61 }
 0x866   :  { %4072 = vmatpush3.bf16.msra.mxu1 %v5647_v38 }
 0x867   :  { %4073 = vmatprep.subr.bf16.mxu1 %v5645_v61 }
 0x86a   :  { %4075 = vmatpush3.bf16.msra.mxu1 %v5648_v13 }
 0x86b   :  { %4076 = vmatprep.subr.bf16.mxu1 %v5645_v61 }
 0x86e   :  { %4078 = vmatpush3.bf16.msra.mxu1 %v5649_v35 }
 0x86f   :  { %4079 = vmatprep.subr.bf16.mxu1 %v5645_v61 }
 0x872   :  { %4081 = vmatpush3.bf16.msra.mxu1 %v5650_v54 }
 0x873   :  { %4082 = vmatprep.subr.bf16.mxu1 %v5645_v61 }
 0x876   :  { %4084 = vmatpush3.bf16.msra.mxu1 %v5209_v19 }
 0x877   :  { %4085 = vmatprep.subr.bf16.mxu1 %v5645_v61 }
 0x87a   :  { %4087 = vmatpush3.bf16.msra.mxu1 %v5222_v53 }
 0x87b   :  { %4088 = vmatprep.subr.bf16.mxu1 %v5645_v61 }
 0x87d   :  { %3858 = vmatmul.mubr.f32.vlgmr.msra.gmra.mrb[44].mxu1 %v1825_v16  ;;  %v4244_v16 = vld [vmem:[%s5591_s7 + $0x34] ss:$8 sps:$4 sm:$0xff]  }
 0x87e   :  { %4090 = vmatpush3.bf16.msra.mxu1 %v4089_v46  ;;  %3892 = vmatprep.mubr.msk.f32.mxu1 %vm4315_vm1, %v5646_v39  ;;  %v4247_v46 = vld [vmem:[%s5591_s7 + $0x44] ss:$8 sps:$4 sm:$0xff]  }
 0x87f   :  { %4091 = vmatprep.subr.bf16.mxu1 %v5645_v61 }
 0x882   :  { %4093 = vmatpush3.bf16.msra.mxu1 %v4092_v22  ;;  %v4245_v22 = vld [vmem:[%s5591_s7 + $0x40] ss:$8 sps:$4 sm:$0xff]  }
 0x883   :  { %4094 = vmatprep.subr.bf16.mxu1 %v5645_v61 }
 0x886   :  { %4096 = vmatpush3.bf16.msra.mxu1 %v4095_v3 }
 0x887   :  { %4097 = vmatprep.subr.bf16.mxu1 %v5645_v61 }
 0x88a   :  { %4099 = vmatpush3.bf16.msra.mxu1 %v4098_v34 }
 0x88b   :  { %4100 = vmatprep.subr.bf16.mxu1 %v5645_v61 }
 0x88e   :  { %4102 = vmatpush3.bf16.msra.mxu1 %v4101_v49  ;;  %v4250_v49 = vld [vmem:[%s5591_s7 + $0x54] ss:$8 sps:$4 sm:$0xff]  }
 0x88f   :  { %4103 = vmatprep.subr.bf16.mxu1 %v5645_v61 }
 0x892   :  { %4105 = vmatpush3.bf16.msra.mxu1 %v4104_v20  ;;  %v3337_v20 = vld [vmem:[%s5586_s2] ss:$0 sm:$0xff] }
 0x893   :  { %4106 = vmatprep.subr.bf16.mxu1 %v5645_v61 }
 0x896   :  { %4108 = vmatpush3.bf16.msra.mxu1 %v4107_v57 }
 0x897   :  { %4109 = vmatprep.subr.bf16.mxu1 %v5645_v61 }
 0x89a   :  { %4111 = vmatpush3.bf16.msra.mxu1 %v4110_v42  ;;  %v4248_v42 = vld [vmem:[%s5591_s7 + $0x50] ss:$8 sps:$4 sm:$0xff]  }
 0x89b   :  { %4112 = vmatprep.subr.bf16.mxu1 %v5645_v61 }
 0x89d   :  { %3893 = vmatmul.mubr.f32.vlgmr.msra.gmra.mrb[44].mxu1 %v5323_v6 }
 0x89e   :  { %4114 = vmatpush3.bf16.msra.mxu1 %v5042_v31  ;;  %3927 = vmatprep.mubr.msk.f32.mxu1 %vm4315_vm1, %v5646_v39  ;;  %v2392_v31 = vld [vmem:[%s5599_s15] sm:$0xff] }
 0x89f   :  { %4115 = vmatprep.subr.bf16.mxu1 %v5645_v61  ;;  %v2399_v45 = vand.u32 4294901760, %v2392_v31 }
 0x8a1   :  { %v2477_v14 = vsub.f32 %v2392_v31, %v2399_v45 }
 0x8a2   :  { %4117 = vmatpush3.bf16.msra.mxu1 %v5056_v33  ;;  %v2393_v33 = vld [vmem:[%s5599_s15 + $0x8] sm:$0xff] }
 0x8a3   :  { %4118 = vmatprep.subr.bf16.mxu1 %v5645_v61  ;;  %v2402_v51 = vand.u32 4294901760, %v2393_v33 }
 0x8a5   :  { %v4137_v47 = vpack.c.bf16 %v2402_v51, %v2399_v45  ;;  %v2484_v15 = vsub.f32 %v2393_v33, %v2402_v51 }
 0x8a6   :  { %4120 = vmatpush3.bf16.msra.mxu1 %v5647_v38  ;;  %v2878_v38 = vpop.permute.xlu0 %2877 }
 0x8a7   :  { %4121 = vmatprep.subr.bf16.mxu1 %v5645_v61  ;;  %4138 = vmatpush3.bf16.msra.mxu0 %v4137_v47  ;;  %v2485_v12 = vand.u32 4294901760, %v2484_v15  ;;  %v4143_v10 = vpack.c.bf16 %v2484_v15, %v2477_v14 }
 0x8a8   :  { %4139 = vmatprep.subr.bf16.mxu0 %v5645_v61 }
 0x8a9   :  { %v2486_v50 = vsub.f32 %v2484_v15, %v2485_v12  ;;  %v5656_v15 = vld [vmem:[#allocation8_spill] sm:$0xff] }
 0x8aa   :  { %4123 = vmatpush3.bf16.msra.mxu1 %v5648_v13 }
 0x8ab   :  { %4124 = vmatprep.subr.bf16.mxu1 %v5645_v61  ;;  %v2487_v18 = vand.u32 4294901760, %v2486_v50 }
 0x8ae   :  { %4126 = vmatpush3.bf16.msra.mxu1 %v5649_v35 }
 0x8af   :  { %4127 = vmatprep.subr.bf16.mxu1 %v5645_v61 }
 0x8b2   :  { %4129 = vmatpush3.bf16.msra.mxu1 %v5650_v54 }
 0x8b3   :  { %4130 = vmatprep.subr.bf16.mxu1 %v5645_v61 }
 0x8b6   :  { %4132 = vmatpush3.bf16.msra.mxu1 %v5209_v19 }
 0x8b7   :  { %4133 = vmatprep.subr.bf16.mxu1 %v5645_v61 }
 0x8ba   :  { %4135 = vmatpush3.bf16.msra.mxu1 %v5222_v53  ;;  %v2478_v53 = vand.u32 4294901760, %v2477_v14 }
 0x8bc   :  { %v2479_v60 = vsub.f32 %v2477_v14, %v2478_v53  ;;  %v4149_v1 = vpack.c.bf16 %v2485_v12, %v2478_v53 }
 0x8bd   :  { %3928 = vmatmul.mubr.f32.vlgmr.msra.gmra.mrb[44].mxu1 %v5323_v6  ;;  %v5655_v6 = vpack.i.bf16 %v5653_v2, %v5654_v11 }
 0x8be   :  { %v2480_v37 = vand.u32 4294901760, %v2479_v60 }
 0x8c0   :  { %v4140_v30 = vpack.c.bf16 %v2487_v18, %v2480_v37 }
 0x990   :  { %v2379_v56 = vpop.f32.mrb[44].mxu1 }
 0x991   :  { %v2383_v19 = vmul.f32 0.125, %v2379_v56  ;;  %v3929_v59 = vpop.f32.mrb[45].mxu1  ;;  %v5657_v56 = vld [vmem:[#allocation7_spill] sm:$0xff] }
 0x993   :  { %v2384_v8 = vmul.f32 %v2383_v19, %v2383_v19 }
 0x995   :  { %2386 = vrot.lane.b32.xlu1 %v2384_v8, %s4320_s23 }
 0x999   :  { %2880 = vrot.lane.b32.xlu1 %v5651_v24, %s4317_s29 }
 0xa07   :  { %v2387_v48 = vpop.permute.xlu1 %2386 }
 0xa08   :  { %v2389_v27 = vsub.f32 %v2383_v19, %v2387_v48  ;;  %v4251_v48 = vld [vmem:[%s5592_s8] sm:$0xff]  }
 0xa0a   :  { %v2390_v23 = vmax.f32 %v2389_v27, 0.0  ;;  %v4252_v27 = vld [vmem:[%s5592_s8 + $0x8] sm:$0xff]  }
 0xa0b   :  { %v2881_v36 = vpop.permute.xlu1 %2880 }
 0xa0c   :  { %v2391_v21 = vsel %vm540_vm9, %v2383_v19, %v2390_v23  ;;  %v2883_v13 = vsel %vm90_vm0, %v2878_v38, %v2881_v36  ;;  %v5658_v19 = vpack.i.bf16 %v5656_v15, %v5657_v56  ;;  %v4253_v23 = vld [vmem:[%s5592_s8 + $0x10] sm:$0xff]   ;;  %v4287_v15 = vld [vmem:[%s5626_s26] sm:$0xff] }
 0xa0d   :  { %v2396_v58 = vsel %vm2394_vm3, %v2391_v21, 0  ;;  %v2884_v35 = vmul.f32 0.5, %v2883_v13  ;;  %v4254_v21 = vld [vmem:[%s5592_s8 + $0x18] sm:$0xff]  }
 0xa0e   :  { %v2465_v4 = vand.u32 4294901760, %v2396_v58 }
 0xa10   :  { %v2466_v7 = vsub.f32 %v2396_v58, %v2465_v4  ;;  %v4255_v58 = vld [vmem:[%s5592_s8 + $0x20] sm:$0xff]  }
 0xa12   :  { %v2467_v28 = vand.u32 4294901760, %v2466_v7 }
 0xa14   :  { %v2468_v25 = vsub.f32 %v2466_v7, %v2467_v28 }
 0xa16   :  { %v2469_v44 = vand.u32 4294901760, %v2468_v25 }
 0xa18   :  { %3935 = vmatmul.mubr.f32.vlgmr.msra.gmra.mrb[72].mxu0 %v2469_v44 }
 0xa19   :  { %4141 = vmatpush3.bf16.msra.mxu0 %v4140_v30  ;;  %3941 = vmatprep.mubr.msk.f32.mxu0 %vm4315_vm1, %v5646_v39 }
 0xa1a   :  { %4142 = vmatprep.subr.bf16.mxu0 %v5645_v61 }
 0xa20   :  { %3942 = vmatmul.mubr.f32.vlgmr.msra.gmra.mrb[72].mxu0 %v2465_v4 }
 0xa21   :  { %4144 = vmatpush3.bf16.msra.mxu0 %v4143_v10  ;;  %3948 = vmatprep.mubr.msk.f32.mxu0 %vm4315_vm1, %v5646_v39 }
 0xa22   :  { %4145 = vmatprep.subr.bf16.mxu0 %v5645_v61 }
 0xa28   :  { %3949 = vmatmul.mubr.f32.vlgmr.msra.gmra.mrb[72].mxu0 %v2466_v7  ;;  %v4257_v7 = vld [vmem:[%s5592_s8 + $0x30] sm:$0xff]  }
 0xa29   :  { %4147 = vmatpush3.bf16.msra.mxu0 %v4137_v47  ;;  %3955 = vmatprep.mubr.msk.f32.mxu0 %vm4315_vm1, %v5646_v39 }
 0xa2a   :  { %4148 = vmatprep.subr.bf16.mxu0 %v5645_v61 }
 0xa30   :  { %3956 = vmatmul.mubr.f32.vlgmr.msra.gmra.mrb[72].mxu0 %v2467_v28  ;;  %v4258_v28 = vld [vmem:[%s5592_s8 + $0x38] sm:$0xff]  }
 0xa31   :  { %4150 = vmatpush3.bf16.msra.mxu0 %v4149_v1  ;;  %3962 = vmatprep.mubr.msk.f32.mxu0 %vm4315_vm1, %v5646_v39 }
 0xa32   :  { %4151 = vmatprep.subr.bf16.mxu0 %v5645_v61  ;;  %v4235_v61 = vld [vmem:[%s5591_s7 + $0x4] ss:$8 sps:$4 sm:$0xff]  }
 0xa38   :  { %3963 = vmatmul.mubr.f32.vlgmr.msra.gmra.mrb[72].mxu0 %v2465_v4 }
 0xa39   :  { %4153 = vmatpush3.bf16.msra.mxu0 %v4137_v47  ;;  %3969 = vmatprep.mubr.msk.f32.mxu0 %vm4315_vm1, %v5646_v39 }
 0xa3a   :  { %3030 = vmatprep.subr.bf16.mxu0 %v4235_v61 }
 0xa40   :  { %3970 = vmatmul.mubr.f32.vlgmr.msra.gmra.mrb[72].mxu0 %v2465_v4  ;;  %v4256_v4 = vld [vmem:[%s5592_s8 + $0x28] sm:$0xff]  }
 0xa41   :  { %3062 = vmatprep.mubr.bf16.mxu0 %v5652_v0  ;;  %3031 = vmatpush1.bf16.msra.mxu0 %v4233_v32 }
 0xa42   :  { %3032 = vmatprep.subr.bf16.mxu0 %v4238_v52 }
 0xa45   :  { %3033 = vmatpush1.bf16.msra.mxu0 %v4236_v26 }
 0xa46   :  { %3034 = vmatprep.subr.bf16.mxu0 %v4241_v5 }
 0xa49   :  { %3035 = vmatpush1.bf16.msra.mxu0 %v4239_v17 }
 0xa4a   :  { %3036 = vmatprep.subr.bf16.mxu0 %v4244_v16 }
 0xa4d   :  { %3037 = vmatpush1.bf16.msra.mxu0 %v4242_v9 }
 0xa4e   :  { %3038 = vmatprep.subr.bf16.mxu0 %v4247_v46 }
 0xa51   :  { %3039 = vmatpush1.bf16.msra.mxu0 %v4245_v22 }
 0xa52   :  { %3040 = vmatprep.subr.bf16.mxu0 %v4250_v49 }
 0xa55   :  { %3041 = vmatpush1.bf16.msra.mxu0 %v4248_v42 }
 0xa56   :  { %3972 = vmatprep.subr.bf16.mxu0 %v5646_v39 }
 0xb13   :  { %v2853_v41 = vpop.f32.mrb[72].mxu0 }
 0xb14   :  { %v2858_v62 = vadd.f32 1e-05, %v2853_v41  ;;  %v3971_v40 = vpop.f32.mrb[73].mxu0  ;;  %v2857_v34 = vsub.f32 %v5240_v29, %v2853_v41  ;;  %v3338_v29 = vld [vmem:[%s5586_s2 + $0x1] ss:$0 sm:$0xff] }
 0xb16   :  { %4279 = vrsqrt.f32 %v2858_v62 }
 0xb17   :  { %4281 = vtanh.f32 %v2884_v35 }
 0xb20   :  { %v4280_v55 = vpop.eup %4279 }
 0xb21   :  { %2861 = vrot.lane.b32.xlu0 %v4280_v55, %s4317_s29  ;;  %v4282_v54 = vpop.eup %4281 }
 0xb22   :  { %v2886_v3 = vadd.f32 1.0, %v4282_v54 }
 0xb24   :  { %v2887_v31 = vmul.f32 0.5, %v2886_v3 }
 0xb25   :  { %4192 = vrot.lane.b32.xlu0 %v5655_v6, %s4316_s28 }
 0xb26   :  { %v2888_v51 = vmul.f32 %v2887_v31, %v2883_v13  ;;  %v5659_v13 = vld [vmem:[#allocation11_spill] sm:$0xff] }
 0xb93   :  { %v2862_v57 = vpop.permute.xlu0 %2861 }
 0xb94   :  { %v2864_v33 = vmul.f32 %v2862_v57, %v2857_v34 }
 0xb96   :  { %v2870_v45 = vmul.f32 %v3337_v20, %v2864_v33 }
 0xb97   :  { %v4193_v8 = vpop.permute.xlu0 %4192 }
 0xb98   :  { %v2876_v47 = vadd.f32 %v3338_v29, %v2870_v45  ;;  %v4195_v53 = vunpack.i.h.bf16 %v4193_v8  ;;  %v4194_v12 = vunpack.i.l.bf16 %v4193_v8  ;;  %v5660_v45 = vld [vmem:[#allocation10_spill] sm:$0xff] }
 0xb9a   :  { %v2889_v14 = vmul.f32 %v2888_v51, %v2876_v47 }
 0xb9c   :  { %2891 = vrot.lane.b32.xlu1 %v2889_v14, %s4313_s30  ;;  %v2950_v18 = vsel %vm90_vm0, %v2889_v14, %v4194_v12 }
 0xba0   :  { %4197 = vrot.lane.b32.xlu1 %v5658_v19, %s4317_s29 }
 0xc0e   :  { %v2892_v59 = vpop.permute.xlu1 %2891 }
 0xc0f   :  { %v2951_v37 = vsel %vm90_vm0, %v2892_v59, %v4195_v53 }
 0xc12   :  { %v4198_v60 = vpop.permute.xlu1 %4197 }
 0xc13   :  { %v4200_v50 = vunpack.i.h.bf16 %v4198_v60  ;;  %v4199_v24 = vunpack.i.l.bf16 %v4198_v60 }
 0xc15   :  { %v2952_v30 = vsel %vm338_vm7, %v2950_v18, %v4199_v24  ;;  %v2953_v10 = vsel %vm338_vm7, %v2951_v37, %v4200_v50 }
 0xc16   :  { %v2966_v1 = vpack.c.bf16 %v2953_v10, %v2952_v30 }
 0xc18   :  { %3355 = vmatmul.mubr.msk.bf16.vlgmr.msra.gmra.mrb[76].mxu0 %vm341_vm8, %v2966_v1 }
 0xc19   :  { %3988 = vmatprep.mubr.msk.bf16.mxu0 %vm4315_vm1, %v5646_v39  ;;  %3973 = vmatpush3.bf16.msra.mxu0 %v4251_v48 }
 0xc1a   :  { %3974 = vmatprep.subr.bf16.mxu0 %v5646_v39 }
 0xc1d   :  { %3975 = vmatpush3.bf16.msra.mxu0 %v4252_v27 }
 0xc1e   :  { %3976 = vmatprep.subr.bf16.mxu0 %v5646_v39 }
 0xc21   :  { %3977 = vmatpush3.bf16.msra.mxu0 %v4253_v23 }
 0xc22   :  { %3978 = vmatprep.subr.bf16.mxu0 %v5646_v39 }
 0xc25   :  { %3979 = vmatpush3.bf16.msra.mxu0 %v4254_v21 }
 0xc26   :  { %3980 = vmatprep.subr.bf16.mxu0 %v5646_v39 }
 0xc29   :  { %3981 = vmatpush3.bf16.msra.mxu0 %v4255_v58 }
 0xc2a   :  { %3982 = vmatprep.subr.bf16.mxu0 %v5646_v39 }
 0xc2d   :  { %3983 = vmatpush3.bf16.msra.mxu0 %v4256_v4 }
 0xc2e   :  { %3984 = vmatprep.subr.bf16.mxu0 %v5646_v39 }
 0xc31   :  { %3985 = vmatpush3.bf16.msra.mxu0 %v4257_v7 }
 0xc32   :  { %3986 = vmatprep.subr.bf16.mxu0 %v5646_v39 }
 0xc35   :  { %3987 = vmatpush3.bf16.msra.mxu0 %v4258_v28 }
 0xceb   :  { %v3064_v25 = vpop.f32.mrb[76].mxu0 }
 0xcec   :  { %v3073_v44 = vmax.f32 %v3064_v25, 0.0  ;;  %v3066_v0 = vpop.f32.mrb[77].mxu0  ;;  %v3197_v35 = vmul.f32 0.5, %v3064_v25  ;;  %v3215_v56 = vadd.f32 %v4287_v15, %v3064_v25 }
 0xced   :  { %v3074_v41 = vmax.f32 %v3066_v0, 0.0  ;;  %v3068_v62 = vpop.f32.mrb[78].mxu0 }
 0xcee   :  { %v3075_v40 = vmax.f32 %v3068_v62, 0.0  ;;  %v3070_v55 = vpop.f32.mrb[79].mxu0  ;;  %v3077_v61 = vmul.f32 %v3073_v44, %v3073_v44  ;;  %v3198_v54 = vmul.f32 0.5, %v3068_v62  ;;  %4283 = vtanh.f32 %v3197_v35 }
 0xcef   :  { %v3076_v32 = vmax.f32 %v3070_v55, 0.0  ;;  %v3078_v26 = vmul.f32 %v3074_v41, %v3074_v41 }
 0xcf0   :  { %v3079_v52 = vmul.f32 %v3075_v40, %v3075_v40  ;;  %4285 = vtanh.f32 %v3198_v54 }
 0xcf1   :  { %v3080_v5 = vmul.f32 %v3076_v32, %v3076_v32 }
 0xcf2   :  { %v3097_v2 = vpack.c.bf16 %v3079_v52, %v3077_v61 }
 0xcf3   :  { %v3098_v11 = vpack.c.bf16 %v3080_v5, %v3078_v26 }
 0xcf4   :  { %3101 = vrot.lane.b32.xlu0 %v3097_v2, %s4317_s29 }
 0xcf5   :  { %3103 = vrot.lane.b32.xlu1 %v3098_v11, %s4317_s29 }
 0xcf8   :  { %v4284_v46 = vpop.eup %4283 }
 0xcf9   :  { %v3201_v3 = vadd.f32 1.0, %v4284_v46 }
 0xcfa   :  { %v4286_v22 = vpop.eup %4285 }
 0xcfb   :  { %v3202_v34 = vadd.f32 1.0, %v4286_v22  ;;  %v3203_v49 = vmul.f32 0.5, %v3201_v3 }
 0xcfd   :  { %v3204_v42 = vmul.f32 0.5, %v3202_v34 }
 0xd66   :  { %v3102_v39 = vpop.permute.xlu0 %3101 }
 0xd67   :  { %v3104_v6 = vpop.permute.xlu1 %3103 }
 0xd68   :  { %v3106_v17 = vsel %vm338_vm7, %v3102_v39, %v3104_v6 }
 0xd69   :  { %3989 = vmatmul.mubr.bf16.vlgmr.msra.gmra.mrb[80].mxu0 %v3106_v17 }
 0xe3c   :  { %v3190_v16 = vpop.f32.mrb[80].mxu0 }
 0xe3d   :  { %3207 = vrot.lane.b32.xlu0 %v3190_v16, %s4316_s28  ;;  %v3990_v9 = vpop.f32.mrb[81].mxu0 }
 0xe3e   :  { %v3193_v36 = vpop.f32.mrb[82].mxu0 }
 0xe3f   :  { %3209 = vrot.lane.b32.xlu1 %v3193_v36, %s4316_s28  ;;  %v3991_v38 = vpop.f32.mrb[83].mxu0 }
 0xe41   :  { %1515 = vrot.lane.b32.xlu0 %v5659_v13, %s4316_s28 }
 0xeaf   :  { %v3208_v20 = vpop.permute.xlu0 %3207 }
 0xeb0   :  { %v3213_v57 = vmul.f32 %v3208_v20, %v3203_v49 }
 0xeb1   :  { %v3210_v31 = vpop.permute.xlu1 %3209 }
 0xeb2   :  { %v3214_v33 = vmul.f32 %v3210_v31, %v3204_v42  ;;  %3219 = vrot.lane.b32.xlu1 %v3213_v57, %s4313_s30 }
 0xeb3   :  { %v1516_v29 = vpop.permute.xlu0 %1515 }
 0xeb4   :  { %v1564_v51 = vsel %vm90_vm0, %v5660_v45, %v1516_v29  ;;  %3221 = vrot.lane.b32.xlu0 %v3214_v33, %s4313_s30 }
 0xeb5   :  { %v1705_v47 = vmul.f32 %v5190_v43, %v1564_v51  ;;  %v4288_v43 = vld [vmem:[%s5626_s26 + $0x8] sm:$0xff] }
 0xeb6   :  { %v3216_v8 = vadd.f32 %v4288_v43, %v3068_v62 }
 0xeb7   :  { %v1706_v14 = vadd.f32 %v1705_v47, %v5180_v63 }
 0xeb9   :  { %3229 = vst.msk [vmem:[%s5601_s17] sm:$0xff] %vm338_vm7, %v1706_v14  ;;  %s4289_s17 = scalar_lea.vmem %s3236_s6, 256 }
 0xeba   :  { %p4290_p0 = scmp.ne.s32.totalorder %s3236_s6, %s4289_s17  ;;  %p4295_p2 = scmp.lt.s32.totalorder %s4289_s17, %s4289_s17 }
 0xebc   :  { %p4296_p3 = por %p4295_p2, %p4294_p1 }
 0xebe   :  { %p4297_p4 = pnand %p4296_p3, %p4290_p0 }
 0xf24   :  { %v3220_v19 = vpop.permute.xlu1 %3219 }
 0xf25   :  { %v3225_v59 = vadd.f32 %v3220_v19, %v3215_v56 }
 0xf26   :  { %v3222_v63 = vpop.permute.xlu0 %3221 }
 0xf27   :  { %3227 = vst.msk [vmem:[#allocation2] sm:$0xff] %vm90_vm0, %v3225_v59  ;;  %v3226_v53 = vadd.f32 %v3222_v63, %v3216_v8 }
 0xf29   :  { %3228 = vst.msk [vmem:[#allocation2 + $0x8] sm:$0xff] %vm90_vm0, %v3226_v53 }
 0xf2a   :  { %4300 = shalt.err (!%p4297_p4)
}
 0xf2b   :  { %s4301_s27 = scalar_lea.hbm %s5600_s16, 256 }
 0xf2c   :  { %p4302_p5 = scmp.ne.s32.totalorder %s5600_s16, %s4301_s27  ;;  %p4305_p6 = scmp.lt.u32.totalorder %s4301_s27, %s5600_s16 }
 0xf2e   :  { %p4307_p7 = pnand %p4305_p6, %p4302_p5 }
 0xf30   :  { %4310 = shalt.err (!%p4307_p7)
}
 0xf31   :  { %s4322_s18 = smov 128  }
 0xf32   :  { %3241 = dma.vmem_to_hbm [thread:$0]  %s3236_s6, 256, %s5600_s16, [#allocation3], %s4322_s18, %s4322_s18, %s4320_s23  }
 0xf33   :  { %4311 = dma.done.wait [#allocation3], 256  }
 0xf34   :  { %4312 = vsyncadd [#allocation3], 4294967040 }
 0xf35   :  { %3249 = vsyncpa [#allocation3], 1 }

</bundles_post_ra>
